<compile_context>
chip_gen: v5e
topology: v5e:2x2
jax: 0.10.0
libtpu: 0.0.40
codegen_flags: <defaults>
</compile_context>

<pallas_src>
import math

import jax
import jax.numpy as jnp
from jax import lax
from jax.experimental import pallas as pl
from jax.experimental.pallas import tpu as pltpu

LOG_2PI = math.log(2.0 * math.pi)


def _softplus(x):
    # numerically stable softplus: max(x,0) + log(1 + exp(-|x|))
    return jnp.maximum(x, 0.0) + jnp.log(1.0 + jnp.exp(-jnp.abs(x)))


def _chip_caps():
    """Per-generation VMEM budgets and TensorCore count (defensive defaults)."""
    kind = ""
    try:
        kind = jax.devices()[0].device_kind.lower()
    except Exception:
        pass
    if "v7" in kind or "7x" in kind:
        # v7x: 64 MiB physical VMEM per TC, 2 TCs per chip.
        return {"vmem_limit": 48 << 20, "stream_budget": 20 << 20, "two_tc": True}
    if "v6" in kind:
        # v6e: 128 MiB physical, single TC.
        return {"vmem_limit": 96 << 20, "stream_budget": 48 << 20, "two_tc": False}
    if "v5p" in kind or "v4" in kind:
        return {"vmem_limit": 96 << 20, "stream_budget": 48 << 20, "two_tc": True}
    # v5e / unknown: default scoped limit is only 16 MiB -> raise explicitly.
    return {"vmem_limit": 64 << 20, "stream_budget": 24 << 20, "two_tc": False}


def _pack_aligned(mats, align=128):
    """Concatenate (K, n_i) matrices along the lane axis, zero-padding every
    segment to a multiple of `align` lanes.  Returns (packed, start_offsets)."""
    segs, offs, cur = [], [], 0
    for m in mats:
        n = m.shape[-1]
        n_pad = -(-n // align) * align
        if n_pad != n:
            m = jnp.pad(m, ((0, 0), (0, n_pad - n)))
        segs.append(m)
        offs.append(cur)
        cur += n_pad
    return jnp.concatenate(segs, axis=-1), tuple(offs)


def _make_vrnn_kernel(D, L, Tc, Bc, unroll, offs_h, offs_x, offs_z):
    o_pr, o_eh, o_dh, o_hh = offs_h      # segments of mm_h (128-aligned starts)
    o_ex, o_ix = offs_x                  # segments of mm_x
    o_dz, o_iz = offs_z                  # segments of mm_z
    half_l_log2pi = 0.5 * L * LOG_2PI

    def kernel(beta_ref, x_ref, eps_ref,
               wpx_ref, bpx_ref,                       # phi_x
               wx_ref, bx_ref,                         # x_hat-side pack (+bias)
               wh_ref, wz_ref, wpz_ref,                # h-side / z_hat-side / phi_z
               bpr_ref, bde_ref, mlog_ref, bpz_ref,    # per-step biases
               diag_ref,
               mmx_sc, h_sc, c_sc):
        t_blk = pl.program_id(1)

        @pl.when(t_blk == 0)
        def _():
            h_sc[...] = jnp.zeros_like(h_sc)
            c_sc[...] = jnp.zeros_like(c_sc)

        beta = beta_ref[0]

        # --- hoisted state-independent matmuls over the whole time chunk ----
        # MXU M = Tc*Bc (instead of Bc), and 2 of the 5 per-step matmuls leave
        # the sequential recurrence.  b_enc and (b_ih + b_hh) are pre-folded
        # into bx_ref lane-for-lane with the wx pack.
        x_all = x_ref[...].astype(jnp.float32).reshape(Tc * Bc, D)
        x_hat_all = jnp.maximum(
            jnp.dot(x_all, wpx_ref[...], preferred_element_type=jnp.float32)
            + bpx_ref[...], 0.0)
        mmx_sc[...] = (jnp.dot(x_hat_all, wx_ref[...],
                               preferred_element_type=jnp.float32)
                       + bx_ref[...]).reshape(mmx_sc.shape)

        # --- hoisted bias broadcasts (JAX does not CSE broadcast_in_dim) ----
        b_prior = jnp.broadcast_to(bpr_ref[...], (Bc, 2 * L))
        b_dec = jnp.broadcast_to(bde_ref[...], (Bc, D))
        m_log = jnp.broadcast_to(mlog_ref[...], (Bc, D))
        b_pz = jnp.broadcast_to(bpz_ref[...], (Bc, L))

        def step(tt, carry):
            h, c = carry                        # h doubles as the module's `out`
            x = x_ref[tt].astype(jnp.float32)   # (Bc, D)
            eps = eps_ref[tt].astype(jnp.float32)
            mm_x = mmx_sc[tt]                   # (Bc, Wx), biases folded in

            # mm_h = h @ [W_prior | W_enc[:L] | W_dec[L:] | W_hh]  (128-aligned)
            mm_h = jnp.dot(h, wh_ref[...], preferred_element_type=jnp.float32)

            # prior(out): Linear + ReLU, chunk into (mu, log_sigma)
            pr = jnp.maximum(mm_h[:, o_pr:o_pr + 2 * L] + b_prior, 0.0)
            mu_p = pr[:, :L]
            log_sig_p = pr[:, L:]

            # posterior(out, x_hat, prior_mu); b_enc already inside mm_x
            en = jnp.maximum(mm_h[:, o_eh:o_eh + 2 * L]
                             + mm_x[:, o_ex:o_ex + 2 * L], 0.0)
            mu_q = en[:, :L] + mu_p
            log_sig_q = en[:, L:]

            # reparameterized sample z ~ N(mu_q, sigma_q)
            z = mu_q + jnp.exp(log_sig_q) * eps

            # phi_z: Linear + ReLU
            z_hat = jnp.maximum(
                jnp.dot(z, wpz_ref[...], preferred_element_type=jnp.float32)
                + b_pz, 0.0)

            # mm_z = z_hat @ [W_dec[:L] | W_ih[L:]]  (128-aligned)
            mm_z = jnp.dot(z_hat, wz_ref[...], preferred_element_type=jnp.float32)

            # generative: decoder(ReLU) + mean_logits -> Bernoulli logits
            logits = jnp.maximum(mm_h[:, o_dh:o_dh + D] + mm_z[:, o_dz:o_dz + D]
                                 + b_dec, 0.0) + m_log

            # LSTM cell step (PyTorch gate order i, f, g, o).  Whole-block
            # nonlinearities: one sigmoid + one tanh over (Bc, 4L).
            gates = (mm_h[:, o_hh:o_hh + 4 * L] + mm_x[:, o_ix:o_ix + 4 * L]
                     + mm_z[:, o_iz:o_iz + 4 * L])
            sig_g = jax.nn.sigmoid(gates)
            tanh_g = jnp.tanh(gates)
            i_g = sig_g[:, 0 * L:1 * L]
            f_g = sig_g[:, 1 * L:2 * L]
            g_g = tanh_g[:, 2 * L:3 * L]
            o_g = sig_g[:, 3 * L:4 * L]
            c_new = f_g * c + i_g * g_g
            h_new = o_g * jnp.tanh(c_new)

            # Bernoulli(logits).log_prob(x) = x*l - softplus(l), summed over D
            log_px = jnp.sum(x * logits - _softplus(logits),
                             axis=1, keepdims=True)
            # log q(z|x): exact, since (z - mu_q)/sigma_q == eps
            log_qz = (-jnp.sum(log_sig_q, axis=1, keepdims=True)
                      - half_l_log2pi
                      - 0.5 * jnp.sum(eps * eps, axis=1, keepdims=True))
            # log p(z): multiply by exp(-log_sigma) instead of dividing
            dev = (z - mu_p) * jnp.exp(-log_sig_p)
            log_pz = (-jnp.sum(log_sig_p, axis=1, keepdims=True)
                      - half_l_log2pi
                      - 0.5 * jnp.sum(dev * dev, axis=1, keepdims=True))

            kl = log_qz - log_pz
            neg_elbo = beta * kl - log_px        # == -(log_px - beta*kl)

            # diagnostics: static-lane stores into the chunk-resident output
            # block (trailing dim padded to 8); no in-loop concatenate.
            diag_ref[tt, :, 0:1] = neg_elbo
            diag_ref[tt, :, 1:2] = kl
            diag_ref[tt, :, 2:3] = log_px
            diag_ref[tt, :, 3:4] = jnp.sum(mu_p, axis=1, keepdims=True)
            diag_ref[tt, :, 4:5] = jnp.sum(mu_q, axis=1, keepdims=True)

            return h_new, c_new

        h_fin, c_fin = lax.fori_loop(0, Tc, step, (h_sc[...], c_sc[...]),
                                     unroll=unroll)
        h_sc[...] = h_fin
        c_sc[...] = c_fin

    return kernel


def init_params(key, input_shape, latent_shape):
    """Deterministic parameter init matching the module's shapes."""
    D, L = input_shape, latent_shape
    ks = jax.random.split(key, 10)

    def lin(k, fan_in, fan_out):
        kw, kb = jax.random.split(k)
        bound = 1.0 / math.sqrt(fan_in)
        w = jax.random.uniform(kw, (fan_in, fan_out), jnp.float32, -bound, bound)
        b = jax.random.uniform(kb, (1, fan_out), jnp.float32, -bound, bound)
        return w, b

    p = {}
    p['w_phi_x'], p['b_phi_x'] = lin(ks[0], D, L)
    p['w_prior'], p['b_prior'] = lin(ks[1], L, 2 * L)
    p['w_enc'], p['b_enc'] = lin(ks[2], 2 * L, 2 * L)
    p['w_phi_z'], p['b_phi_z'] = lin(ks[3], L, L)
    p['w_dec'], p['b_dec'] = lin(ks[4], 2 * L, D)
    bound = 1.0 / math.sqrt(L)
    p['w_ih'] = jax.random.uniform(ks[5], (2 * L, 4 * L), jnp.float32, -bound, bound)
    p['w_hh'] = jax.random.uniform(ks[6], (L, 4 * L), jnp.float32, -bound, bound)
    p['b_ih'] = jax.random.uniform(ks[7], (1, 4 * L), jnp.float32, -bound, bound)
    p['b_hh'] = jax.random.uniform(ks[8], (1, 4 * L), jnp.float32, -bound, bound)
    p['mean_logits'] = jax.random.normal(ks[9], (1, D), jnp.float32) * 0.1
    return p


def vrnn_forward(inputs, beta, params, eps, *, t_chunk=None):
    """inputs: (B, T, D) batch-first, like the PyTorch module.  eps: (B, T, L)."""
    B, T, D = inputs.shape
    L = params['w_phi_x'].shape[1]
    caps = _chip_caps()

    # --- time-major layout, bf16 streaming, batch padded to 8 sublanes ------
    x_tbd = jnp.transpose(inputs, (1, 0, 2)).astype(jnp.bfloat16)   # (T, B, D)
    eps_tbl = jnp.transpose(eps, (1, 0, 2)).astype(jnp.bfloat16)    # (T, B, L)
    B_pad = ((B + 7) // 8) * 8
    if B_pad != B:
        pad = ((0, 0), (0, B_pad - B), (0, 0))
        x_tbd = jnp.pad(x_tbd, pad)
        eps_tbl = jnp.pad(eps_tbl, pad)

    # --- split the batch only on 2-TensorCore chips (v7x / v5p / v4) --------
    if caps['two_tc'] and B_pad >= 16 and B_pad % 16 == 0:
        Bc = B_pad // 2
    else:
        Bc = B_pad
    nb = B_pad // Bc

    # --- 128-lane-aligned fused weight packs (shared-LHS matmuls) -----------
    w_h, offs_h = _pack_aligned([params['w_prior'], params['w_enc'][:L, :],
                                 params['w_dec'][L:, :], params['w_hh']])
    w_x, offs_x = _pack_aligned([params['w_enc'][L:, :], params['w_ih'][:L, :]])
    w_z, offs_z = _pack_aligned([params['w_dec'][:L, :], params['w_ih'][L:, :]])
    b_x, _ = _pack_aligned([params['b_enc'], params['b_ih'] + params['b_hh']])
    Wh, Wx, Wz = w_h.shape[1], w_x.shape[1], w_z.shape[1]

    # --- time chunk: amortize per-grid-step overhead within per-gen budget --
    if t_chunk is None:
        per_t = (2 * Bc * (D + L) * 2        # double-buffered bf16 x + eps
                 + 2 * Bc * 8 * 4            # double-buffered f32 diag block
                 + 2 * Bc * Wx * 4           # mm_x scratch + transient copy
                 + Bc * (D + L) * 4)         # f32 transients of hoisted matmuls
        budget = max(caps['stream_budget'] - (2 << 20), 1 << 20)
        t_chunk = max(1, min(T, budget // max(per_t, 1)))
    Tc = int(t_chunk)
    nt = -(-T // Tc)                         # pad T instead of shrinking Tc
    T_pad = nt * Tc
    if T_pad != T:
        pad_t = ((0, T_pad - T), (0, 0), (0, 0))
        x_tbd = jnp.pad(x_tbd, pad_t)
        eps_tbl = jnp.pad(eps_tbl, pad_t)
    unroll = True if Tc <= 16 else 2         # partial unroll for long chunks

    beta_arr = jnp.asarray([beta], dtype=jnp.float32)

    def full(shape):
        return pl.BlockSpec(shape, lambda b, t, _n=len(shape): (0,) * _n)

    in_specs = [
        pl.BlockSpec(memory_space=pltpu.MemorySpace.SMEM),        # beta
        pl.BlockSpec((Tc, Bc, D), lambda b, t: (t, b, 0)),        # x chunk (bf16)
        pl.BlockSpec((Tc, Bc, L), lambda b, t: (t, b, 0)),        # eps chunk (bf16)
        full((D, L)), full((1, L)),                               # phi_x w, b
        full((L, Wx)), full((1, Wx)),                             # w_x pack, b_x pack
        full((L, Wh)),                                            # w_h pack
        full((L, Wz)),                                            # w_z pack
        full((L, L)),                                             # phi_z w
        full((1, 2 * L)),                                         # b_prior
        full((1, D)), full((1, D)),                               # b_dec, mean_logits
        full((1, L)),                                             # b_phi_z
    ]
    out_spec = pl.BlockSpec((Tc, Bc, 8), lambda b, t: (t, b, 0))

    diag = pl.pallas_call(
        _make_vrnn_kernel(D, L, Tc, Bc, unroll, offs_h, offs_x, offs_z),
        out_shape=jax.ShapeDtypeStruct((T_pad, B_pad, 8), jnp.float32),
        grid_spec=pltpu.PrefetchScalarGridSpec(
            num_scalar_prefetch=0,
            grid=(nb, nt),
            in_specs=in_specs,
            out_specs=out_spec,
            scratch_shapes=[
                pltpu.VMEM((Tc, Bc, Wx), jnp.float32),  # hoisted mm_x per chunk
                pltpu.VMEM((Bc, L), jnp.float32),       # h (== LSTM "out")
                pltpu.VMEM((Bc, L), jnp.float32),       # c
            ]),
        compiler_params=pltpu.CompilerParams(
            dimension_semantics=("parallel", "arbitrary"),
            vmem_limit_bytes=caps['vmem_limit']),
    )(beta_arr, x_tbd, eps_tbl,
      params['w_phi_x'], params['b_phi_x'],
      w_x, b_x, w_h, w_z, params['w_phi_z'],
      params['b_prior'], params['b_dec'], params['mean_logits'],
      params['b_phi_z'])

    diag = diag[:T, :B, :]                # drop time/batch padding
    loss_list = diag[..., 0]              # (T, B)  = -elbo_beta per step
    kl = diag[..., 1]
    log_px = diag[..., 2]
    mu_prior = diag[..., 3]
    mu_post = diag[..., 4]

    # loss = mean(acc_loss / T); module returns -loss
    neg_loss = jnp.mean(jnp.sum(loss_list, axis=0) / T)
    # Keep diagnostics as device arrays; converting to numpy (as the PyTorch
    # module does) is left to the caller so the wrapper never forces a sync.
    diagnostics = {
        'loss_list': loss_list,
        'log_px': log_px,
        'kl': kl,
        'mu_prior': mu_prior,
        'mu_post': mu_post,
    }
    return neg_loss, diagnostics


if __name__ == "__main__":
    key = jax.random.PRNGKey(0)
    B, T, D, L = 4, 8, 64, 32          # batch, seq, input_shape, latent_shape
    k_in, k_eps, k_par = jax.random.split(key, 3)

    # Bernoulli-style targets in [0, 1]
    inputs = jax.nn.sigmoid(jax.random.normal(k_in, (B, T, D), jnp.float32))
    eps = jax.random.normal(k_eps, (B, T, L), jnp.float32)   # reparam. noise
    params = init_params(k_par, D, L)
    beta = 1.0

    neg_loss, diags = vrnn_forward(inputs, beta, params, eps)
    jax.block_until_ready(neg_loss)
    print("KERNEL_OK")
</pallas_src>

<mosaic_0001>
module attributes {stable_mosaic.version = 11 : i64} {
  func.func @kernel(%arg0: i32, %arg1: i32, %arg2: memref<1xf32, #tpu.memory_space<smem>>, %arg3: memref<8x8x64xbf16, #tpu.memory_space<vmem>>, %arg4: memref<8x8x32xbf16, #tpu.memory_space<vmem>>, %arg5: memref<64x32xf32, #tpu.memory_space<vmem>>, %arg6: memref<1x32xf32, #tpu.memory_space<vmem>>, %arg7: memref<32x256xf32, #tpu.memory_space<vmem>>, %arg8: memref<1x256xf32, #tpu.memory_space<vmem>>, %arg9: memref<32x512xf32, #tpu.memory_space<vmem>>, %arg10: memref<32x256xf32, #tpu.memory_space<vmem>>, %arg11: memref<32x32xf32, #tpu.memory_space<vmem>>, %arg12: memref<1x64xf32, #tpu.memory_space<vmem>>, %arg13: memref<1x64xf32, #tpu.memory_space<vmem>>, %arg14: memref<1x64xf32, #tpu.memory_space<vmem>>, %arg15: memref<1x32xf32, #tpu.memory_space<vmem>>, %arg16: memref<8x8x8xf32, #tpu.memory_space<vmem>>, %arg17: memref<8x8x256xf32, #tpu.memory_space<vmem>>, %arg18: memref<8x32xf32, #tpu.memory_space<vmem>>, %arg19: memref<8x32xf32, #tpu.memory_space<vmem>>) attributes {dimension_semantics = [#tpu.dimension_semantics<parallel>, #tpu.dimension_semantics<arbitrary>], iteration_bounds = array<i64: 1, 1>, scalar_prefetch = 0 : i64, scratch_operands = 3 : i64, tpu.core_type = #tpu.core_type<tc>, window_params = [{transform_indices = @transform_0, window_bounds = array<i64: 1>}, {transform_indices = @transform_1, window_bounds = array<i64: 8, 8, 64>}, {transform_indices = @transform_2, window_bounds = array<i64: 8, 8, 32>}, {pipeline_mode = #tpu.pipeline_mode<synchronous>, transform_indices = @transform_3, window_bounds = array<i64: 64, 32>}, {pipeline_mode = #tpu.pipeline_mode<synchronous>, transform_indices = @transform_4, window_bounds = array<i64: 1, 32>}, {pipeline_mode = #tpu.pipeline_mode<synchronous>, transform_indices = @transform_5, window_bounds = array<i64: 32, 256>}, {pipeline_mode = #tpu.pipeline_mode<synchronous>, transform_indices = @transform_6, window_bounds = array<i64: 1, 256>}, {pipeline_mode = #tpu.pipeline_mode<synchronous>, transform_indices = @transform_7, window_bounds = array<i64: 32, 512>}, {pipeline_mode = #tpu.pipeline_mode<synchronous>, transform_indices = @transform_8, window_bounds = array<i64: 32, 256>}, {pipeline_mode = #tpu.pipeline_mode<synchronous>, transform_indices = @transform_9, window_bounds = array<i64: 32, 32>}, {pipeline_mode = #tpu.pipeline_mode<synchronous>, transform_indices = @transform_10, window_bounds = array<i64: 1, 64>}, {pipeline_mode = #tpu.pipeline_mode<synchronous>, transform_indices = @transform_11, window_bounds = array<i64: 1, 64>}, {pipeline_mode = #tpu.pipeline_mode<synchronous>, transform_indices = @transform_12, window_bounds = array<i64: 1, 64>}, {pipeline_mode = #tpu.pipeline_mode<synchronous>, transform_indices = @transform_13, window_bounds = array<i64: 1, 32>}, {transform_indices = @transform_14, window_bounds = array<i64: 8, 8, 8>}]} {
    %c0_i32 = arith.constant 0 : i32
    %0 = arith.cmpi eq, %arg1, %c0_i32 : i32
    %1 = arith.extui %0 : i1 to i32
    %c0_i32_0 = arith.constant 0 : i32
    %2 = arith.cmpi ne, %1, %c0_i32_0 : i32
    scf.if %2 {
      %cst_406 = arith.constant 0.000000e+00 : f32
      %1117 = vector.broadcast %cst_406 : f32 to vector<8x32xf32>
      %c0_407 = arith.constant 0 : index
      %c0_408 = arith.constant 0 : index
      %1118 = vector.load %arg18[%c0_407, %c0_408] : memref<8x32xf32, #tpu.memory_space<vmem>>, vector<8x32xf32>
      tpu.vector_store %arg18[%c0_407, %c0_408], %1117 {strides = array<i32>} : memref<8x32xf32, #tpu.memory_space<vmem>>, vector<8x32xf32>,
      %cst_409 = arith.constant 0.000000e+00 : f32
      %1119 = vector.broadcast %cst_409 : f32 to vector<8x32xf32>
      %c0_410 = arith.constant 0 : index
      %c0_411 = arith.constant 0 : index
      %1120 = vector.load %arg19[%c0_410, %c0_411] : memref<8x32xf32, #tpu.memory_space<vmem>>, vector<8x32xf32>
      tpu.vector_store %arg19[%c0_410, %c0_411], %1119 {strides = array<i32>} : memref<8x32xf32, #tpu.memory_space<vmem>>, vector<8x32xf32>,
    } else {
    }
    %c0 = arith.constant 0 : index
    %3 = memref.load %arg2[%c0] : memref<1xf32, #tpu.memory_space<smem>>
    %c0_1 = arith.constant 0 : index
    %c0_2 = arith.constant 0 : index
    %c0_3 = arith.constant 0 : index
    %4 = vector.load %arg3[%c0_1, %c0_2, %c0_3] : memref<8x8x64xbf16, #tpu.memory_space<vmem>>, vector<8x8x64xbf16>
    %5 = arith.extf %4 : vector<8x8x64xbf16> to vector<8x8x64xf32>
    %6 = vector.shape_cast %5 : vector<8x8x64xf32> to vector<64x64xf32>
    %c0_4 = arith.constant 0 : index
    %c0_5 = arith.constant 0 : index
    %7 = vector.load %arg5[%c0_4, %c0_5] : memref<64x32xf32, #tpu.memory_space<vmem>>, vector<64x32xf32>
    %cst = arith.constant dense<0.000000e+00> : vector<64x32xf32>
    %8 = tpu.matmul %6, %7, %cst {dimension_numbers = #tpu.dot_dimension_numbers<[1], [0], [0], [1], [0, 0, 1, 1], [], []>} : vector<64x64xf32>, vector<64x32xf32>, vector<64x32xf32> -> vector<64x32xf32>
    %c0_6 = arith.constant 0 : index
    %c0_7 = arith.constant 0 : index
    %9 = vector.load %arg6[%c0_6, %c0_7] : memref<1x32xf32, #tpu.memory_space<vmem>>, vector<1x32xf32>
    %10 = vector.broadcast %9 : vector<1x32xf32> to vector<64x32xf32>
    %11 = arith.addf %8, %10 : vector<64x32xf32>
    %cst_8 = arith.constant 0.000000e+00 : f32
    %12 = vector.broadcast %cst_8 : f32 to vector<64x32xf32>
    %13 = arith.maximumf %11, %12 : vector<64x32xf32>
    %c0_9 = arith.constant 0 : index
    %c0_10 = arith.constant 0 : index
    %14 = vector.load %arg7[%c0_9, %c0_10] : memref<32x256xf32, #tpu.memory_space<vmem>>, vector<32x256xf32>
    %cst_11 = arith.constant dense<0.000000e+00> : vector<64x256xf32>
    %15 = tpu.matmul %13, %14, %cst_11 {dimension_numbers = #tpu.dot_dimension_numbers<[1], [0], [0], [1], [0, 0, 1, 1], [], []>} : vector<64x32xf32>, vector<32x256xf32>, vector<64x256xf32> -> vector<64x256xf32>
    %c0_12 = arith.constant 0 : index
    %c0_13 = arith.constant 0 : index
    %16 = vector.load %arg8[%c0_12, %c0_13] : memref<1x256xf32, #tpu.memory_space<vmem>>, vector<1x256xf32>
    %17 = vector.broadcast %16 : vector<1x256xf32> to vector<64x256xf32>
    %18 = arith.addf %15, %17 : vector<64x256xf32>
    %19 = vector.shape_cast %18 : vector<64x256xf32> to vector<8x8x256xf32>
    %c0_14 = arith.constant 0 : index
    %c0_15 = arith.constant 0 : index
    %c0_16 = arith.constant 0 : index
    %20 = vector.load %arg17[%c0_14, %c0_15, %c0_16] : memref<8x8x256xf32, #tpu.memory_space<vmem>>, vector<8x8x256xf32>
    tpu.vector_store %arg17[%c0_14, %c0_15, %c0_16], %19 {strides = array<i32>} : memref<8x8x256xf32, #tpu.memory_space<vmem>>, vector<8x8x256xf32>,
    %c0_17 = arith.constant 0 : index
    %c0_18 = arith.constant 0 : index
    %21 = vector.load %arg12[%c0_17, %c0_18] : memref<1x64xf32, #tpu.memory_space<vmem>>, vector<1x64xf32>
    %22 = vector.shape_cast %21 : vector<1x64xf32> to vector<1x64xf32>
    %23 = vector.broadcast %22 : vector<1x64xf32> to vector<8x64xf32>
    %c0_19 = arith.constant 0 : index
    %c0_20 = arith.constant 0 : index
    %24 = vector.load %arg13[%c0_19, %c0_20] : memref<1x64xf32, #tpu.memory_space<vmem>>, vector<1x64xf32>
    %25 = vector.shape_cast %24 : vector<1x64xf32> to vector<1x64xf32>
    %26 = vector.broadcast %25 : vector<1x64xf32> to vector<8x64xf32>
    %c0_21 = arith.constant 0 : index
    %c0_22 = arith.constant 0 : index
    %27 = vector.load %arg14[%c0_21, %c0_22] : memref<1x64xf32, #tpu.memory_space<vmem>>, vector<1x64xf32>
    %28 = vector.shape_cast %27 : vector<1x64xf32> to vector<1x64xf32>
    %29 = vector.broadcast %28 : vector<1x64xf32> to vector<8x64xf32>
    %c0_23 = arith.constant 0 : index
    %c0_24 = arith.constant 0 : index
    %30 = vector.load %arg15[%c0_23, %c0_24] : memref<1x32xf32, #tpu.memory_space<vmem>>, vector<1x32xf32>
    %31 = vector.shape_cast %30 : vector<1x32xf32> to vector<1x32xf32>
    %32 = vector.broadcast %31 : vector<1x32xf32> to vector<8x32xf32>
    %c0_25 = arith.constant 0 : index
    %c0_26 = arith.constant 0 : index
    %33 = vector.load %arg18[%c0_25, %c0_26] : memref<8x32xf32, #tpu.memory_space<vmem>>, vector<8x32xf32>
    %c0_27 = arith.constant 0 : index
    %c0_28 = arith.constant 0 : index
    %34 = vector.load %arg19[%c0_27, %c0_28] : memref<8x32xf32, #tpu.memory_space<vmem>>, vector<8x32xf32>
    %c0_i32_29 = arith.constant 0 : i32
    %35 = arith.index_cast %c0_i32_29 : i32 to index
    %c0_30 = arith.constant 0 : index
    %c0_31 = arith.constant 0 : index
    %36 = vector.load %arg3[%35, %c0_30, %c0_31] : memref<8x8x64xbf16, #tpu.memory_space<vmem>>, vector<1x8x64xbf16>
    %37 = vector.shape_cast %36 : vector<1x8x64xbf16> to vector<8x64xbf16>
    %38 = arith.extf %37 : vector<8x64xbf16> to vector<8x64xf32>
    %39 = arith.index_cast %c0_i32_29 : i32 to index
    %c0_32 = arith.constant 0 : index
    %c0_33 = arith.constant 0 : index
    %40 = vector.load %arg4[%39, %c0_32, %c0_33] : memref<8x8x32xbf16, #tpu.memory_space<vmem>>, vector<1x8x32xbf16>
    %41 = vector.shape_cast %40 : vector<1x8x32xbf16> to vector<8x32xbf16>
    %42 = arith.extf %41 : vector<8x32xbf16> to vector<8x32xf32>
    %43 = arith.index_cast %c0_i32_29 : i32 to index
    %c0_34 = arith.constant 0 : index
    %c0_35 = arith.constant 0 : index
    %44 = vector.load %arg17[%43, %c0_34, %c0_35] : memref<8x8x256xf32, #tpu.memory_space<vmem>>, vector<1x8x256xf32>
    %45 = vector.shape_cast %44 : vector<1x8x256xf32> to vector<8x256xf32>
    %c0_36 = arith.constant 0 : index
    %c0_37 = arith.constant 0 : index
    %46 = vector.load %arg9[%c0_36, %c0_37] : memref<32x512xf32, #tpu.memory_space<vmem>>, vector<32x512xf32>
    %cst_38 = arith.constant dense<0.000000e+00> : vector<8x512xf32>
    %47 = tpu.matmul %33, %46, %cst_38 {dimension_numbers = #tpu.dot_dimension_numbers<[1], [0], [0], [1], [0, 0, 1, 1], [], []>} : vector<8x32xf32>, vector<32x512xf32>, vector<8x512xf32> -> vector<8x512xf32>
    %48 = vector.extract_strided_slice %47 {offsets = [0, 0], sizes = [8, 64], strides = [1, 1]} : vector<8x512xf32> to vector<8x64xf32>
    %49 = arith.addf %48, %23 : vector<8x64xf32>
    %cst_39 = arith.constant 0.000000e+00 : f32
    %50 = vector.broadcast %cst_39 : f32 to vector<8x64xf32>
    %51 = arith.maximumf %49, %50 : vector<8x64xf32>
    %52 = vector.extract_strided_slice %51 {offsets = [0, 0], sizes = [8, 32], strides = [1, 1]} : vector<8x64xf32> to vector<8x32xf32>
    %53 = vector.extract_strided_slice %51 {offsets = [0, 32], sizes = [8, 32], strides = [1, 1]} : vector<8x64xf32> to vector<8x32xf32>
    %54 = vector.extract_strided_slice %47 {offsets = [0, 128], sizes = [8, 64], strides = [1, 1]} : vector<8x512xf32> to vector<8x64xf32>
    %55 = vector.extract_strided_slice %45 {offsets = [0, 0], sizes = [8, 64], strides = [1, 1]} : vector<8x256xf32> to vector<8x64xf32>
    %56 = arith.addf %54, %55 : vector<8x64xf32>
    %cst_40 = arith.constant 0.000000e+00 : f32
    %57 = vector.broadcast %cst_40 : f32 to vector<8x64xf32>
    %58 = arith.maximumf %56, %57 : vector<8x64xf32>
    %59 = vector.extract_strided_slice %58 {offsets = [0, 0], sizes = [8, 32], strides = [1, 1]} : vector<8x64xf32> to vector<8x32xf32>
    %60 = arith.addf %59, %52 : vector<8x32xf32>
    %61 = vector.extract_strided_slice %58 {offsets = [0, 32], sizes = [8, 32], strides = [1, 1]} : vector<8x64xf32> to vector<8x32xf32>
    %62 = math.exp %61 : vector<8x32xf32>
    %63 = arith.mulf %62, %42 : vector<8x32xf32>
    %64 = arith.addf %60, %63 : vector<8x32xf32>
    %c0_41 = arith.constant 0 : index
    %c0_42 = arith.constant 0 : index
    %65 = vector.load %arg11[%c0_41, %c0_42] : memref<32x32xf32, #tpu.memory_space<vmem>>, vector<32x32xf32>
    %cst_43 = arith.constant dense<0.000000e+00> : vector<8x32xf32>
    %66 = tpu.matmul %64, %65, %cst_43 {dimension_numbers = #tpu.dot_dimension_numbers<[1], [0], [0], [1], [0, 0, 1, 1], [], []>} : vector<8x32xf32>, vector<32x32xf32>, vector<8x32xf32> -> vector<8x32xf32>
    %67 = arith.addf %66, %32 : vector<8x32xf32>
    %cst_44 = arith.constant 0.000000e+00 : f32
    %68 = vector.broadcast %cst_44 : f32 to vector<8x32xf32>
    %69 = arith.maximumf %67, %68 : vector<8x32xf32>
    %c0_45 = arith.constant 0 : index
    %c0_46 = arith.constant 0 : index
    %70 = vector.load %arg10[%c0_45, %c0_46] : memref<32x256xf32, #tpu.memory_space<vmem>>, vector<32x256xf32>
    %cst_47 = arith.constant dense<0.000000e+00> : vector<8x256xf32>
    %71 = tpu.matmul %69, %70, %cst_47 {dimension_numbers = #tpu.dot_dimension_numbers<[1], [0], [0], [1], [0, 0, 1, 1], [], []>} : vector<8x32xf32>, vector<32x256xf32>, vector<8x256xf32> -> vector<8x256xf32>
    %72 = vector.extract_strided_slice %47 {offsets = [0, 256], sizes = [8, 64], strides = [1, 1]} : vector<8x512xf32> to vector<8x64xf32>
    %73 = vector.extract_strided_slice %71 {offsets = [0, 0], sizes = [8, 64], strides = [1, 1]} : vector<8x256xf32> to vector<8x64xf32>
    %74 = arith.addf %72, %73 : vector<8x64xf32>
    %75 = arith.addf %74, %26 : vector<8x64xf32>
    %cst_48 = arith.constant 0.000000e+00 : f32
    %76 = vector.broadcast %cst_48 : f32 to vector<8x64xf32>
    %77 = arith.maximumf %75, %76 : vector<8x64xf32>
    %78 = arith.addf %77, %29 : vector<8x64xf32>
    %79 = vector.extract_strided_slice %47 {offsets = [0, 384], sizes = [8, 128], strides = [1, 1]} : vector<8x512xf32> to vector<8x128xf32>
    %80 = vector.extract_strided_slice %45 {offsets = [0, 128], sizes = [8, 128], strides = [1, 1]} : vector<8x256xf32> to vector<8x128xf32>
    %81 = arith.addf %79, %80 : vector<8x128xf32>
    %82 = vector.extract_strided_slice %71 {offsets = [0, 128], sizes = [8, 128], strides = [1, 1]} : vector<8x256xf32> to vector<8x128xf32>
    %83 = arith.addf %81, %82 : vector<8x128xf32>
    %84 = arith.negf %83 : vector<8x128xf32>
    %85 = math.exp %84 : vector<8x128xf32>
    %cst_49 = arith.constant 1.000000e+00 : f32
    %86 = vector.broadcast %cst_49 : f32 to vector<8x128xf32>
    %87 = arith.addf %86, %85 : vector<8x128xf32>
    %88 = arith.divf %86, %87 : vector<8x128xf32>
    %89 = math.tanh %83 : vector<8x128xf32>
    %90 = vector.extract_strided_slice %88 {offsets = [0, 0], sizes = [8, 32], strides = [1, 1]} : vector<8x128xf32> to vector<8x32xf32>
    %91 = vector.extract_strided_slice %88 {offsets = [0, 32], sizes = [8, 32], strides = [1, 1]} : vector<8x128xf32> to vector<8x32xf32>
    %92 = vector.extract_strided_slice %89 {offsets = [0, 64], sizes = [8, 32], strides = [1, 1]} : vector<8x128xf32> to vector<8x32xf32>
    %93 = vector.extract_strided_slice %88 {offsets = [0, 96], sizes = [8, 32], strides = [1, 1]} : vector<8x128xf32> to vector<8x32xf32>
    %94 = arith.mulf %91, %34 : vector<8x32xf32>
    %95 = arith.mulf %90, %92 : vector<8x32xf32>
    %96 = arith.addf %94, %95 : vector<8x32xf32>
    %97 = math.tanh %96 : vector<8x32xf32>
    %98 = arith.mulf %93, %97 : vector<8x32xf32>
    %99 = arith.mulf %38, %78 : vector<8x64xf32>
    %cst_50 = arith.constant 0.000000e+00 : f32
    %100 = vector.broadcast %cst_50 : f32 to vector<8x64xf32>
    %101 = arith.maximumf %78, %100 : vector<8x64xf32>
    %102 = math.absf %78 : vector<8x64xf32>
    %cst_51 = arith.constant 0.000000e+00 : f32
    %103 = vector.broadcast %cst_51 : f32 to vector<8x64xf32>
    %104 = arith.subf %103, %102 : vector<8x64xf32>
    %105 = math.exp %104 : vector<8x64xf32>
    %cst_52 = arith.constant 1.000000e+00 : f32
    %106 = vector.broadcast %cst_52 : f32 to vector<8x64xf32>
    %107 = arith.addf %106, %105 : vector<8x64xf32>
    %108 = math.log %107 : vector<8x64xf32>
    %109 = arith.addf %101, %108 : vector<8x64xf32>
    %110 = arith.subf %99, %109 : vector<8x64xf32>
    %cst_53 = arith.constant dense<0.000000e+00> : vector<8xf32>
    %111 = vector.multi_reduction <add>, %110, %cst_53 [1] : vector<8x64xf32> to vector<8xf32>
    %112 = vector.shape_cast %111 : vector<8xf32> to vector<8x1xf32>
    %cst_54 = arith.constant dense<0.000000e+00> : vector<8xf32>
    %113 = vector.multi_reduction <add>, %61, %cst_54 [1] : vector<8x32xf32> to vector<8xf32>
    %114 = vector.shape_cast %113 : vector<8xf32> to vector<8x1xf32>
    %cst_55 = arith.constant 0.000000e+00 : f32
    %115 = vector.broadcast %cst_55 : f32 to vector<8x1xf32>
    %116 = arith.subf %115, %114 : vector<8x1xf32>
    %cst_56 = arith.constant 29.4060326 : f32
    %117 = vector.broadcast %cst_56 : f32 to vector<8x1xf32>
    %118 = arith.subf %116, %117 : vector<8x1xf32>
    %119 = arith.mulf %42, %42 : vector<8x32xf32>
    %cst_57 = arith.constant dense<0.000000e+00> : vector<8xf32>
    %120 = vector.multi_reduction <add>, %119, %cst_57 [1] : vector<8x32xf32> to vector<8xf32>
    %121 = vector.shape_cast %120 : vector<8xf32> to vector<8x1xf32>
    %cst_58 = arith.constant 5.000000e-01 : f32
    %122 = vector.broadcast %cst_58 : f32 to vector<8x1xf32>
    %123 = arith.mulf %122, %121 : vector<8x1xf32>
    %124 = arith.subf %118, %123 : vector<8x1xf32>
    %125 = arith.subf %64, %52 : vector<8x32xf32>
    %cst_59 = arith.constant 0.000000e+00 : f32
    %126 = vector.broadcast %cst_59 : f32 to vector<8x32xf32>
    %127 = arith.subf %126, %53 : vector<8x32xf32>
    %128 = math.exp %127 : vector<8x32xf32>
    %129 = arith.mulf %125, %128 : vector<8x32xf32>
    %cst_60 = arith.constant dense<0.000000e+00> : vector<8xf32>
    %130 = vector.multi_reduction <add>, %53, %cst_60 [1] : vector<8x32xf32> to vector<8xf32>
    %131 = vector.shape_cast %130 : vector<8xf32> to vector<8x1xf32>
    %cst_61 = arith.constant 0.000000e+00 : f32
    %132 = vector.broadcast %cst_61 : f32 to vector<8x1xf32>
    %133 = arith.subf %132, %131 : vector<8x1xf32>
    %cst_62 = arith.constant 29.4060326 : f32
    %134 = vector.broadcast %cst_62 : f32 to vector<8x1xf32>
    %135 = arith.subf %133, %134 : vector<8x1xf32>
    %136 = arith.mulf %129, %129 : vector<8x32xf32>
    %cst_63 = arith.constant dense<0.000000e+00> : vector<8xf32>
    %137 = vector.multi_reduction <add>, %136, %cst_63 [1] : vector<8x32xf32> to vector<8xf32>
    %138 = vector.shape_cast %137 : vector<8xf32> to vector<8x1xf32>
    %cst_64 = arith.constant 5.000000e-01 : f32
    %139 = vector.broadcast %cst_64 : f32 to vector<8x1xf32>
    %140 = arith.mulf %139, %138 : vector<8x1xf32>
    %141 = arith.subf %135, %140 : vector<8x1xf32>
    %142 = arith.subf %124, %141 : vector<8x1xf32>
    %143 = vector.broadcast %3 : f32 to vector<8x1xf32>
    %144 = arith.mulf %143, %142 : vector<8x1xf32>
    %145 = arith.subf %144, %112 : vector<8x1xf32>
    %146 = arith.index_cast %c0_i32_29 : i32 to index
    %c0_65 = arith.constant 0 : index
    %c0_66 = arith.constant 0 : index
    %147 = vector.load %arg16[%146, %c0_65, %c0_66] : memref<8x8x8xf32, #tpu.memory_space<vmem>>, vector<1x8x1xf32>
    %148 = vector.shape_cast %147 : vector<1x8x1xf32> to vector<8x1xf32>
    %149 = vector.shape_cast %145 : vector<8x1xf32> to vector<1x8x1xf32>
    tpu.vector_store %arg16[%146, %c0_65, %c0_66], %149 {strides = array<i32>} : memref<8x8x8xf32, #tpu.memory_space<vmem>>, vector<1x8x1xf32>,
    %150 = arith.index_cast %c0_i32_29 : i32 to index
    %c0_67 = arith.constant 0 : index
    %c1 = arith.constant 1 : index
    %151 = vector.load %arg16[%150, %c0_67, %c1] : memref<8x8x8xf32, #tpu.memory_space<vmem>>, vector<1x8x1xf32>
    %152 = vector.shape_cast %151 : vector<1x8x1xf32> to vector<8x1xf32>
    %153 = vector.shape_cast %142 : vector<8x1xf32> to vector<1x8x1xf32>
    tpu.vector_store %arg16[%150, %c0_67, %c1], %153 {strides = array<i32>} : memref<8x8x8xf32, #tpu.memory_space<vmem>>, vector<1x8x1xf32>,
    %154 = arith.index_cast %c0_i32_29 : i32 to index
    %c0_68 = arith.constant 0 : index
    %c2 = arith.constant 2 : index
    %155 = vector.load %arg16[%154, %c0_68, %c2] : memref<8x8x8xf32, #tpu.memory_space<vmem>>, vector<1x8x1xf32>
    %156 = vector.shape_cast %155 : vector<1x8x1xf32> to vector<8x1xf32>
    %157 = vector.shape_cast %112 : vector<8x1xf32> to vector<1x8x1xf32>
    tpu.vector_store %arg16[%154, %c0_68, %c2], %157 {strides = array<i32>} : memref<8x8x8xf32, #tpu.memory_space<vmem>>, vector<1x8x1xf32>,
    %cst_69 = arith.constant dense<0.000000e+00> : vector<8xf32>
    %158 = vector.multi_reduction <add>, %52, %cst_69 [1] : vector<8x32xf32> to vector<8xf32>
    %159 = vector.shape_cast %158 : vector<8xf32> to vector<8x1xf32>
    %160 = arith.index_cast %c0_i32_29 : i32 to index
    %c0_70 = arith.constant 0 : index
    %c3 = arith.constant 3 : index
    %161 = vector.load %arg16[%160, %c0_70, %c3] : memref<8x8x8xf32, #tpu.memory_space<vmem>>, vector<1x8x1xf32>
    %162 = vector.shape_cast %161 : vector<1x8x1xf32> to vector<8x1xf32>
    %163 = vector.shape_cast %159 : vector<8x1xf32> to vector<1x8x1xf32>
    tpu.vector_store %arg16[%160, %c0_70, %c3], %163 {strides = array<i32>} : memref<8x8x8xf32, #tpu.memory_space<vmem>>, vector<1x8x1xf32>,
    %cst_71 = arith.constant dense<0.000000e+00> : vector<8xf32>
    %164 = vector.multi_reduction <add>, %60, %cst_71 [1] : vector<8x32xf32> to vector<8xf32>
    %165 = vector.shape_cast %164 : vector<8xf32> to vector<8x1xf32>
    %166 = arith.index_cast %c0_i32_29 : i32 to index
    %c0_72 = arith.constant 0 : index
    %c4 = arith.constant 4 : index
    %167 = vector.load %arg16[%166, %c0_72, %c4] : memref<8x8x8xf32, #tpu.memory_space<vmem>>, vector<1x8x1xf32>
    %168 = vector.shape_cast %167 : vector<1x8x1xf32> to vector<8x1xf32>
    %169 = vector.shape_cast %165 : vector<8x1xf32> to vector<1x8x1xf32>
    tpu.vector_store %arg16[%166, %c0_72, %c4], %169 {strides = array<i32>} : memref<8x8x8xf32, #tpu.memory_space<vmem>>, vector<1x8x1xf32>,
    %c1_i32 = arith.constant 1 : i32
    %170 = arith.index_cast %c1_i32 : i32 to index
    %c0_73 = arith.constant 0 : index
    %c0_74 = arith.constant 0 : index
    %171 = vector.load %arg3[%170, %c0_73, %c0_74] : memref<8x8x64xbf16, #tpu.memory_space<vmem>>, vector<1x8x64xbf16>
    %172 = vector.shape_cast %171 : vector<1x8x64xbf16> to vector<8x64xbf16>
    %173 = arith.extf %172 : vector<8x64xbf16> to vector<8x64xf32>
    %174 = arith.index_cast %c1_i32 : i32 to index
    %c0_75 = arith.constant 0 : index
    %c0_76 = arith.constant 0 : index
    %175 = vector.load %arg4[%174, %c0_75, %c0_76] : memref<8x8x32xbf16, #tpu.memory_space<vmem>>, vector<1x8x32xbf16>
    %176 = vector.shape_cast %175 : vector<1x8x32xbf16> to vector<8x32xbf16>
    %177 = arith.extf %176 : vector<8x32xbf16> to vector<8x32xf32>
    %178 = arith.index_cast %c1_i32 : i32 to index
    %c0_77 = arith.constant 0 : index
    %c0_78 = arith.constant 0 : index
    %179 = vector.load %arg17[%178, %c0_77, %c0_78] : memref<8x8x256xf32, #tpu.memory_space<vmem>>, vector<1x8x256xf32>
    %180 = vector.shape_cast %179 : vector<1x8x256xf32> to vector<8x256xf32>
    %c0_79 = arith.constant 0 : index
    %c0_80 = arith.constant 0 : index
    %181 = vector.load %arg9[%c0_79, %c0_80] : memref<32x512xf32, #tpu.memory_space<vmem>>, vector<32x512xf32>
    %cst_81 = arith.constant dense<0.000000e+00> : vector<8x512xf32>
    %182 = tpu.matmul %98, %181, %cst_81 {dimension_numbers = #tpu.dot_dimension_numbers<[1], [0], [0], [1], [0, 0, 1, 1], [], []>} : vector<8x32xf32>, vector<32x512xf32>, vector<8x512xf32> -> vector<8x512xf32>
    %183 = vector.extract_strided_slice %182 {offsets = [0, 0], sizes = [8, 64], strides = [1, 1]} : vector<8x512xf32> to vector<8x64xf32>
    %184 = arith.addf %183, %23 : vector<8x64xf32>
    %cst_82 = arith.constant 0.000000e+00 : f32
    %185 = vector.broadcast %cst_82 : f32 to vector<8x64xf32>
    %186 = arith.maximumf %184, %185 : vector<8x64xf32>
    %187 = vector.extract_strided_slice %186 {offsets = [0, 0], sizes = [8, 32], strides = [1, 1]} : vector<8x64xf32> to vector<8x32xf32>
    %188 = vector.extract_strided_slice %186 {offsets = [0, 32], sizes = [8, 32], strides = [1, 1]} : vector<8x64xf32> to vector<8x32xf32>
    %189 = vector.extract_strided_slice %182 {offsets = [0, 128], sizes = [8, 64], strides = [1, 1]} : vector<8x512xf32> to vector<8x64xf32>
    %190 = vector.extract_strided_slice %180 {offsets = [0, 0], sizes = [8, 64], strides = [1, 1]} : vector<8x256xf32> to vector<8x64xf32>
    %191 = arith.addf %189, %190 : vector<8x64xf32>
    %cst_83 = arith.constant 0.000000e+00 : f32
    %192 = vector.broadcast %cst_83 : f32 to vector<8x64xf32>
    %193 = arith.maximumf %191, %192 : vector<8x64xf32>
    %194 = vector.extract_strided_slice %193 {offsets = [0, 0], sizes = [8, 32], strides = [1, 1]} : vector<8x64xf32> to vector<8x32xf32>
    %195 = arith.addf %194, %187 : vector<8x32xf32>
    %196 = vector.extract_strided_slice %193 {offsets = [0, 32], sizes = [8, 32], strides = [1, 1]} : vector<8x64xf32> to vector<8x32xf32>
    %197 = math.exp %196 : vector<8x32xf32>
    %198 = arith.mulf %197, %177 : vector<8x32xf32>
    %199 = arith.addf %195, %198 : vector<8x32xf32>
    %c0_84 = arith.constant 0 : index
    %c0_85 = arith.constant 0 : index
    %200 = vector.load %arg11[%c0_84, %c0_85] : memref<32x32xf32, #tpu.memory_space<vmem>>, vector<32x32xf32>
    %cst_86 = arith.constant dense<0.000000e+00> : vector<8x32xf32>
    %201 = tpu.matmul %199, %200, %cst_86 {dimension_numbers = #tpu.dot_dimension_numbers<[1], [0], [0], [1], [0, 0, 1, 1], [], []>} : vector<8x32xf32>, vector<32x32xf32>, vector<8x32xf32> -> vector<8x32xf32>
    %202 = arith.addf %201, %32 : vector<8x32xf32>
    %cst_87 = arith.constant 0.000000e+00 : f32
    %203 = vector.broadcast %cst_87 : f32 to vector<8x32xf32>
    %204 = arith.maximumf %202, %203 : vector<8x32xf32>
    %c0_88 = arith.constant 0 : index
    %c0_89 = arith.constant 0 : index
    %205 = vector.load %arg10[%c0_88, %c0_89] : memref<32x256xf32, #tpu.memory_space<vmem>>, vector<32x256xf32>
    %cst_90 = arith.constant dense<0.000000e+00> : vector<8x256xf32>
    %206 = tpu.matmul %204, %205, %cst_90 {dimension_numbers = #tpu.dot_dimension_numbers<[1], [0], [0], [1], [0, 0, 1, 1], [], []>} : vector<8x32xf32>, vector<32x256xf32>, vector<8x256xf32> -> vector<8x256xf32>
    %207 = vector.extract_strided_slice %182 {offsets = [0, 256], sizes = [8, 64], strides = [1, 1]} : vector<8x512xf32> to vector<8x64xf32>
    %208 = vector.extract_strided_slice %206 {offsets = [0, 0], sizes = [8, 64], strides = [1, 1]} : vector<8x256xf32> to vector<8x64xf32>
    %209 = arith.addf %207, %208 : vector<8x64xf32>
    %210 = arith.addf %209, %26 : vector<8x64xf32>
    %cst_91 = arith.constant 0.000000e+00 : f32
    %211 = vector.broadcast %cst_91 : f32 to vector<8x64xf32>
    %212 = arith.maximumf %210, %211 : vector<8x64xf32>
    %213 = arith.addf %212, %29 : vector<8x64xf32>
    %214 = vector.extract_strided_slice %182 {offsets = [0, 384], sizes = [8, 128], strides = [1, 1]} : vector<8x512xf32> to vector<8x128xf32>
    %215 = vector.extract_strided_slice %180 {offsets = [0, 128], sizes = [8, 128], strides = [1, 1]} : vector<8x256xf32> to vector<8x128xf32>
    %216 = arith.addf %214, %215 : vector<8x128xf32>
    %217 = vector.extract_strided_slice %206 {offsets = [0, 128], sizes = [8, 128], strides = [1, 1]} : vector<8x256xf32> to vector<8x128xf32>
    %218 = arith.addf %216, %217 : vector<8x128xf32>
    %219 = arith.negf %218 : vector<8x128xf32>
    %220 = math.exp %219 : vector<8x128xf32>
    %cst_92 = arith.constant 1.000000e+00 : f32
    %221 = vector.broadcast %cst_92 : f32 to vector<8x128xf32>
    %222 = arith.addf %221, %220 : vector<8x128xf32>
    %223 = arith.divf %221, %222 : vector<8x128xf32>
    %224 = math.tanh %218 : vector<8x128xf32>
    %225 = vector.extract_strided_slice %223 {offsets = [0, 0], sizes = [8, 32], strides = [1, 1]} : vector<8x128xf32> to vector<8x32xf32>
    %226 = vector.extract_strided_slice %223 {offsets = [0, 32], sizes = [8, 32], strides = [1, 1]} : vector<8x128xf32> to vector<8x32xf32>
    %227 = vector.extract_strided_slice %224 {offsets = [0, 64], sizes = [8, 32], strides = [1, 1]} : vector<8x128xf32> to vector<8x32xf32>
    %228 = vector.extract_strided_slice %223 {offsets = [0, 96], sizes = [8, 32], strides = [1, 1]} : vector<8x128xf32> to vector<8x32xf32>
    %229 = arith.mulf %226, %96 : vector<8x32xf32>
    %230 = arith.mulf %225, %227 : vector<8x32xf32>
    %231 = arith.addf %229, %230 : vector<8x32xf32>
    %232 = math.tanh %231 : vector<8x32xf32>
    %233 = arith.mulf %228, %232 : vector<8x32xf32>
    %234 = arith.mulf %173, %213 : vector<8x64xf32>
    %cst_93 = arith.constant 0.000000e+00 : f32
    %235 = vector.broadcast %cst_93 : f32 to vector<8x64xf32>
    %236 = arith.maximumf %213, %235 : vector<8x64xf32>
    %237 = math.absf %213 : vector<8x64xf32>
    %cst_94 = arith.constant 0.000000e+00 : f32
    %238 = vector.broadcast %cst_94 : f32 to vector<8x64xf32>
    %239 = arith.subf %238, %237 : vector<8x64xf32>
    %240 = math.exp %239 : vector<8x64xf32>
    %cst_95 = arith.constant 1.000000e+00 : f32
    %241 = vector.broadcast %cst_95 : f32 to vector<8x64xf32>
    %242 = arith.addf %241, %240 : vector<8x64xf32>
    %243 = math.log %242 : vector<8x64xf32>
    %244 = arith.addf %236, %243 : vector<8x64xf32>
    %245 = arith.subf %234, %244 : vector<8x64xf32>
    %cst_96 = arith.constant dense<0.000000e+00> : vector<8xf32>
    %246 = vector.multi_reduction <add>, %245, %cst_96 [1] : vector<8x64xf32> to vector<8xf32>
    %247 = vector.shape_cast %246 : vector<8xf32> to vector<8x1xf32>
    %cst_97 = arith.constant dense<0.000000e+00> : vector<8xf32>
    %248 = vector.multi_reduction <add>, %196, %cst_97 [1] : vector<8x32xf32> to vector<8xf32>
    %249 = vector.shape_cast %248 : vector<8xf32> to vector<8x1xf32>
    %cst_98 = arith.constant 0.000000e+00 : f32
    %250 = vector.broadcast %cst_98 : f32 to vector<8x1xf32>
    %251 = arith.subf %250, %249 : vector<8x1xf32>
    %cst_99 = arith.constant 29.4060326 : f32
    %252 = vector.broadcast %cst_99 : f32 to vector<8x1xf32>
    %253 = arith.subf %251, %252 : vector<8x1xf32>
    %254 = arith.mulf %177, %177 : vector<8x32xf32>
    %cst_100 = arith.constant dense<0.000000e+00> : vector<8xf32>
    %255 = vector.multi_reduction <add>, %254, %cst_100 [1] : vector<8x32xf32> to vector<8xf32>
    %256 = vector.shape_cast %255 : vector<8xf32> to vector<8x1xf32>
    %cst_101 = arith.constant 5.000000e-01 : f32
    %257 = vector.broadcast %cst_101 : f32 to vector<8x1xf32>
    %258 = arith.mulf %257, %256 : vector<8x1xf32>
    %259 = arith.subf %253, %258 : vector<8x1xf32>
    %260 = arith.subf %199, %187 : vector<8x32xf32>
    %cst_102 = arith.constant 0.000000e+00 : f32
    %261 = vector.broadcast %cst_102 : f32 to vector<8x32xf32>
    %262 = arith.subf %261, %188 : vector<8x32xf32>
    %263 = math.exp %262 : vector<8x32xf32>
    %264 = arith.mulf %260, %263 : vector<8x32xf32>
    %cst_103 = arith.constant dense<0.000000e+00> : vector<8xf32>
    %265 = vector.multi_reduction <add>, %188, %cst_103 [1] : vector<8x32xf32> to vector<8xf32>
    %266 = vector.shape_cast %265 : vector<8xf32> to vector<8x1xf32>
    %cst_104 = arith.constant 0.000000e+00 : f32
    %267 = vector.broadcast %cst_104 : f32 to vector<8x1xf32>
    %268 = arith.subf %267, %266 : vector<8x1xf32>
    %cst_105 = arith.constant 29.4060326 : f32
    %269 = vector.broadcast %cst_105 : f32 to vector<8x1xf32>
    %270 = arith.subf %268, %269 : vector<8x1xf32>
    %271 = arith.mulf %264, %264 : vector<8x32xf32>
    %cst_106 = arith.constant dense<0.000000e+00> : vector<8xf32>
    %272 = vector.multi_reduction <add>, %271, %cst_106 [1] : vector<8x32xf32> to vector<8xf32>
    %273 = vector.shape_cast %272 : vector<8xf32> to vector<8x1xf32>
    %cst_107 = arith.constant 5.000000e-01 : f32
    %274 = vector.broadcast %cst_107 : f32 to vector<8x1xf32>
    %275 = arith.mulf %274, %273 : vector<8x1xf32>
    %276 = arith.subf %270, %275 : vector<8x1xf32>
    %277 = arith.subf %259, %276 : vector<8x1xf32>
    %278 = vector.broadcast %3 : f32 to vector<8x1xf32>
    %279 = arith.mulf %278, %277 : vector<8x1xf32>
    %280 = arith.subf %279, %247 : vector<8x1xf32>
    %281 = arith.index_cast %c1_i32 : i32 to index
    %c0_108 = arith.constant 0 : index
    %c0_109 = arith.constant 0 : index
    %282 = vector.load %arg16[%281, %c0_108, %c0_109] : memref<8x8x8xf32, #tpu.memory_space<vmem>>, vector<1x8x1xf32>
    %283 = vector.shape_cast %282 : vector<1x8x1xf32> to vector<8x1xf32>
    %284 = vector.shape_cast %280 : vector<8x1xf32> to vector<1x8x1xf32>
    tpu.vector_store %arg16[%281, %c0_108, %c0_109], %284 {strides = array<i32>} : memref<8x8x8xf32, #tpu.memory_space<vmem>>, vector<1x8x1xf32>,
    %285 = arith.index_cast %c1_i32 : i32 to index
    %c0_110 = arith.constant 0 : index
    %c1_111 = arith.constant 1 : index
    %286 = vector.load %arg16[%285, %c0_110, %c1_111] : memref<8x8x8xf32, #tpu.memory_space<vmem>>, vector<1x8x1xf32>
    %287 = vector.shape_cast %286 : vector<1x8x1xf32> to vector<8x1xf32>
    %288 = vector.shape_cast %277 : vector<8x1xf32> to vector<1x8x1xf32>
    tpu.vector_store %arg16[%285, %c0_110, %c1_111], %288 {strides = array<i32>} : memref<8x8x8xf32, #tpu.memory_space<vmem>>, vector<1x8x1xf32>,
    %289 = arith.index_cast %c1_i32 : i32 to index
    %c0_112 = arith.constant 0 : index
    %c2_113 = arith.constant 2 : index
    %290 = vector.load %arg16[%289, %c0_112, %c2_113] : memref<8x8x8xf32, #tpu.memory_space<vmem>>, vector<1x8x1xf32>
    %291 = vector.shape_cast %290 : vector<1x8x1xf32> to vector<8x1xf32>
    %292 = vector.shape_cast %247 : vector<8x1xf32> to vector<1x8x1xf32>
    tpu.vector_store %arg16[%289, %c0_112, %c2_113], %292 {strides = array<i32>} : memref<8x8x8xf32, #tpu.memory_space<vmem>>, vector<1x8x1xf32>,
    %cst_114 = arith.constant dense<0.000000e+00> : vector<8xf32>
    %293 = vector.multi_reduction <add>, %187, %cst_114 [1] : vector<8x32xf32> to vector<8xf32>
    %294 = vector.shape_cast %293 : vector<8xf32> to vector<8x1xf32>
    %295 = arith.index_cast %c1_i32 : i32 to index
    %c0_115 = arith.constant 0 : index
    %c3_116 = arith.constant 3 : index
    %296 = vector.load %arg16[%295, %c0_115, %c3_116] : memref<8x8x8xf32, #tpu.memory_space<vmem>>, vector<1x8x1xf32>
    %297 = vector.shape_cast %296 : vector<1x8x1xf32> to vector<8x1xf32>
    %298 = vector.shape_cast %294 : vector<8x1xf32> to vector<1x8x1xf32>
    tpu.vector_store %arg16[%295, %c0_115, %c3_116], %298 {strides = array<i32>} : memref<8x8x8xf32, #tpu.memory_space<vmem>>, vector<1x8x1xf32>,
    %cst_117 = arith.constant dense<0.000000e+00> : vector<8xf32>
    %299 = vector.multi_reduction <add>, %195, %cst_117 [1] : vector<8x32xf32> to vector<8xf32>
    %300 = vector.shape_cast %299 : vector<8xf32> to vector<8x1xf32>
    %301 = arith.index_cast %c1_i32 : i32 to index
    %c0_118 = arith.constant 0 : index
    %c4_119 = arith.constant 4 : index
    %302 = vector.load %arg16[%301, %c0_118, %c4_119] : memref<8x8x8xf32, #tpu.memory_space<vmem>>, vector<1x8x1xf32>
    %303 = vector.shape_cast %302 : vector<1x8x1xf32> to vector<8x1xf32>
    %304 = vector.shape_cast %300 : vector<8x1xf32> to vector<1x8x1xf32>
    tpu.vector_store %arg16[%301, %c0_118, %c4_119], %304 {strides = array<i32>} : memref<8x8x8xf32, #tpu.memory_space<vmem>>, vector<1x8x1xf32>,
    %c2_i32 = arith.constant 2 : i32
    %305 = arith.index_cast %c2_i32 : i32 to index
    %c0_120 = arith.constant 0 : index
    %c0_121 = arith.constant 0 : index
    %306 = vector.load %arg3[%305, %c0_120, %c0_121] : memref<8x8x64xbf16, #tpu.memory_space<vmem>>, vector<1x8x64xbf16>
    %307 = vector.shape_cast %306 : vector<1x8x64xbf16> to vector<8x64xbf16>
    %308 = arith.extf %307 : vector<8x64xbf16> to vector<8x64xf32>
    %309 = arith.index_cast %c2_i32 : i32 to index
    %c0_122 = arith.constant 0 : index
    %c0_123 = arith.constant 0 : index
    %310 = vector.load %arg4[%309, %c0_122, %c0_123] : memref<8x8x32xbf16, #tpu.memory_space<vmem>>, vector<1x8x32xbf16>
    %311 = vector.shape_cast %310 : vector<1x8x32xbf16> to vector<8x32xbf16>
    %312 = arith.extf %311 : vector<8x32xbf16> to vector<8x32xf32>
    %313 = arith.index_cast %c2_i32 : i32 to index
    %c0_124 = arith.constant 0 : index
    %c0_125 = arith.constant 0 : index
    %314 = vector.load %arg17[%313, %c0_124, %c0_125] : memref<8x8x256xf32, #tpu.memory_space<vmem>>, vector<1x8x256xf32>
    %315 = vector.shape_cast %314 : vector<1x8x256xf32> to vector<8x256xf32>
    %c0_126 = arith.constant 0 : index
    %c0_127 = arith.constant 0 : index
    %316 = vector.load %arg9[%c0_126, %c0_127] : memref<32x512xf32, #tpu.memory_space<vmem>>, vector<32x512xf32>
    %cst_128 = arith.constant dense<0.000000e+00> : vector<8x512xf32>
    %317 = tpu.matmul %233, %316, %cst_128 {dimension_numbers = #tpu.dot_dimension_numbers<[1], [0], [0], [1], [0, 0, 1, 1], [], []>} : vector<8x32xf32>, vector<32x512xf32>, vector<8x512xf32> -> vector<8x512xf32>
    %318 = vector.extract_strided_slice %317 {offsets = [0, 0], sizes = [8, 64], strides = [1, 1]} : vector<8x512xf32> to vector<8x64xf32>
    %319 = arith.addf %318, %23 : vector<8x64xf32>
    %cst_129 = arith.constant 0.000000e+00 : f32
    %320 = vector.broadcast %cst_129 : f32 to vector<8x64xf32>
    %321 = arith.maximumf %319, %320 : vector<8x64xf32>
    %322 = vector.extract_strided_slice %321 {offsets = [0, 0], sizes = [8, 32], strides = [1, 1]} : vector<8x64xf32> to vector<8x32xf32>
    %323 = vector.extract_strided_slice %321 {offsets = [0, 32], sizes = [8, 32], strides = [1, 1]} : vector<8x64xf32> to vector<8x32xf32>
    %324 = vector.extract_strided_slice %317 {offsets = [0, 128], sizes = [8, 64], strides = [1, 1]} : vector<8x512xf32> to vector<8x64xf32>
    %325 = vector.extract_strided_slice %315 {offsets = [0, 0], sizes = [8, 64], strides = [1, 1]} : vector<8x256xf32> to vector<8x64xf32>
    %326 = arith.addf %324, %325 : vector<8x64xf32>
    %cst_130 = arith.constant 0.000000e+00 : f32
    %327 = vector.broadcast %cst_130 : f32 to vector<8x64xf32>
    %328 = arith.maximumf %326, %327 : vector<8x64xf32>
    %329 = vector.extract_strided_slice %328 {offsets = [0, 0], sizes = [8, 32], strides = [1, 1]} : vector<8x64xf32> to vector<8x32xf32>
    %330 = arith.addf %329, %322 : vector<8x32xf32>
    %331 = vector.extract_strided_slice %328 {offsets = [0, 32], sizes = [8, 32], strides = [1, 1]} : vector<8x64xf32> to vector<8x32xf32>
    %332 = math.exp %331 : vector<8x32xf32>
    %333 = arith.mulf %332, %312 : vector<8x32xf32>
    %334 = arith.addf %330, %333 : vector<8x32xf32>
    %c0_131 = arith.constant 0 : index
    %c0_132 = arith.constant 0 : index
    %335 = vector.load %arg11[%c0_131, %c0_132] : memref<32x32xf32, #tpu.memory_space<vmem>>, vector<32x32xf32>
    %cst_133 = arith.constant dense<0.000000e+00> : vector<8x32xf32>
    %336 = tpu.matmul %334, %335, %cst_133 {dimension_numbers = #tpu.dot_dimension_numbers<[1], [0], [0], [1], [0, 0, 1, 1], [], []>} : vector<8x32xf32>, vector<32x32xf32>, vector<8x32xf32> -> vector<8x32xf32>
    %337 = arith.addf %336, %32 : vector<8x32xf32>
    %cst_134 = arith.constant 0.000000e+00 : f32
    %338 = vector.broadcast %cst_134 : f32 to vector<8x32xf32>
    %339 = arith.maximumf %337, %338 : vector<8x32xf32>
    %c0_135 = arith.constant 0 : index
    %c0_136 = arith.constant 0 : index
    %340 = vector.load %arg10[%c0_135, %c0_136] : memref<32x256xf32, #tpu.memory_space<vmem>>, vector<32x256xf32>
    %cst_137 = arith.constant dense<0.000000e+00> : vector<8x256xf32>
    %341 = tpu.matmul %339, %340, %cst_137 {dimension_numbers = #tpu.dot_dimension_numbers<[1], [0], [0], [1], [0, 0, 1, 1], [], []>} : vector<8x32xf32>, vector<32x256xf32>, vector<8x256xf32> -> vector<8x256xf32>
    %342 = vector.extract_strided_slice %317 {offsets = [0, 256], sizes = [8, 64], strides = [1, 1]} : vector<8x512xf32> to vector<8x64xf32>
    %343 = vector.extract_strided_slice %341 {offsets = [0, 0], sizes = [8, 64], strides = [1, 1]} : vector<8x256xf32> to vector<8x64xf32>
    %344 = arith.addf %342, %343 : vector<8x64xf32>
    %345 = arith.addf %344, %26 : vector<8x64xf32>
    %cst_138 = arith.constant 0.000000e+00 : f32
    %346 = vector.broadcast %cst_138 : f32 to vector<8x64xf32>
    %347 = arith.maximumf %345, %346 : vector<8x64xf32>
    %348 = arith.addf %347, %29 : vector<8x64xf32>
    %349 = vector.extract_strided_slice %317 {offsets = [0, 384], sizes = [8, 128], strides = [1, 1]} : vector<8x512xf32> to vector<8x128xf32>
    %350 = vector.extract_strided_slice %315 {offsets = [0, 128], sizes = [8, 128], strides = [1, 1]} : vector<8x256xf32> to vector<8x128xf32>
    %351 = arith.addf %349, %350 : vector<8x128xf32>
    %352 = vector.extract_strided_slice %341 {offsets = [0, 128], sizes = [8, 128], strides = [1, 1]} : vector<8x256xf32> to vector<8x128xf32>
    %353 = arith.addf %351, %352 : vector<8x128xf32>
    %354 = arith.negf %353 : vector<8x128xf32>
    %355 = math.exp %354 : vector<8x128xf32>
    %cst_139 = arith.constant 1.000000e+00 : f32
    %356 = vector.broadcast %cst_139 : f32 to vector<8x128xf32>
    %357 = arith.addf %356, %355 : vector<8x128xf32>
    %358 = arith.divf %356, %357 : vector<8x128xf32>
    %359 = math.tanh %353 : vector<8x128xf32>
    %360 = vector.extract_strided_slice %358 {offsets = [0, 0], sizes = [8, 32], strides = [1, 1]} : vector<8x128xf32> to vector<8x32xf32>
    %361 = vector.extract_strided_slice %358 {offsets = [0, 32], sizes = [8, 32], strides = [1, 1]} : vector<8x128xf32> to vector<8x32xf32>
    %362 = vector.extract_strided_slice %359 {offsets = [0, 64], sizes = [8, 32], strides = [1, 1]} : vector<8x128xf32> to vector<8x32xf32>
    %363 = vector.extract_strided_slice %358 {offsets = [0, 96], sizes = [8, 32], strides = [1, 1]} : vector<8x128xf32> to vector<8x32xf32>
    %364 = arith.mulf %361, %231 : vector<8x32xf32>
    %365 = arith.mulf %360, %362 : vector<8x32xf32>
    %366 = arith.addf %364, %365 : vector<8x32xf32>
    %367 = math.tanh %366 : vector<8x32xf32>
    %368 = arith.mulf %363, %367 : vector<8x32xf32>
    %369 = arith.mulf %308, %348 : vector<8x64xf32>
    %cst_140 = arith.constant 0.000000e+00 : f32
    %370 = vector.broadcast %cst_140 : f32 to vector<8x64xf32>
    %371 = arith.maximumf %348, %370 : vector<8x64xf32>
    %372 = math.absf %348 : vector<8x64xf32>
    %cst_141 = arith.constant 0.000000e+00 : f32
    %373 = vector.broadcast %cst_141 : f32 to vector<8x64xf32>
    %374 = arith.subf %373, %372 : vector<8x64xf32>
    %375 = math.exp %374 : vector<8x64xf32>
    %cst_142 = arith.constant 1.000000e+00 : f32
    %376 = vector.broadcast %cst_142 : f32 to vector<8x64xf32>
    %377 = arith.addf %376, %375 : vector<8x64xf32>
    %378 = math.log %377 : vector<8x64xf32>
    %379 = arith.addf %371, %378 : vector<8x64xf32>
    %380 = arith.subf %369, %379 : vector<8x64xf32>
    %cst_143 = arith.constant dense<0.000000e+00> : vector<8xf32>
    %381 = vector.multi_reduction <add>, %380, %cst_143 [1] : vector<8x64xf32> to vector<8xf32>
    %382 = vector.shape_cast %381 : vector<8xf32> to vector<8x1xf32>
    %cst_144 = arith.constant dense<0.000000e+00> : vector<8xf32>
    %383 = vector.multi_reduction <add>, %331, %cst_144 [1] : vector<8x32xf32> to vector<8xf32>
    %384 = vector.shape_cast %383 : vector<8xf32> to vector<8x1xf32>
    %cst_145 = arith.constant 0.000000e+00 : f32
    %385 = vector.broadcast %cst_145 : f32 to vector<8x1xf32>
    %386 = arith.subf %385, %384 : vector<8x1xf32>
    %cst_146 = arith.constant 29.4060326 : f32
    %387 = vector.broadcast %cst_146 : f32 to vector<8x1xf32>
    %388 = arith.subf %386, %387 : vector<8x1xf32>
    %389 = arith.mulf %312, %312 : vector<8x32xf32>
    %cst_147 = arith.constant dense<0.000000e+00> : vector<8xf32>
    %390 = vector.multi_reduction <add>, %389, %cst_147 [1] : vector<8x32xf32> to vector<8xf32>
    %391 = vector.shape_cast %390 : vector<8xf32> to vector<8x1xf32>
    %cst_148 = arith.constant 5.000000e-01 : f32
    %392 = vector.broadcast %cst_148 : f32 to vector<8x1xf32>
    %393 = arith.mulf %392, %391 : vector<8x1xf32>
    %394 = arith.subf %388, %393 : vector<8x1xf32>
    %395 = arith.subf %334, %322 : vector<8x32xf32>
    %cst_149 = arith.constant 0.000000e+00 : f32
    %396 = vector.broadcast %cst_149 : f32 to vector<8x32xf32>
    %397 = arith.subf %396, %323 : vector<8x32xf32>
    %398 = math.exp %397 : vector<8x32xf32>
    %399 = arith.mulf %395, %398 : vector<8x32xf32>
    %cst_150 = arith.constant dense<0.000000e+00> : vector<8xf32>
    %400 = vector.multi_reduction <add>, %323, %cst_150 [1] : vector<8x32xf32> to vector<8xf32>
    %401 = vector.shape_cast %400 : vector<8xf32> to vector<8x1xf32>
    %cst_151 = arith.constant 0.000000e+00 : f32
    %402 = vector.broadcast %cst_151 : f32 to vector<8x1xf32>
    %403 = arith.subf %402, %401 : vector<8x1xf32>
    %cst_152 = arith.constant 29.4060326 : f32
    %404 = vector.broadcast %cst_152 : f32 to vector<8x1xf32>
    %405 = arith.subf %403, %404 : vector<8x1xf32>
    %406 = arith.mulf %399, %399 : vector<8x32xf32>
    %cst_153 = arith.constant dense<0.000000e+00> : vector<8xf32>
    %407 = vector.multi_reduction <add>, %406, %cst_153 [1] : vector<8x32xf32> to vector<8xf32>
    %408 = vector.shape_cast %407 : vector<8xf32> to vector<8x1xf32>
    %cst_154 = arith.constant 5.000000e-01 : f32
    %409 = vector.broadcast %cst_154 : f32 to vector<8x1xf32>
    %410 = arith.mulf %409, %408 : vector<8x1xf32>
    %411 = arith.subf %405, %410 : vector<8x1xf32>
    %412 = arith.subf %394, %411 : vector<8x1xf32>
    %413 = vector.broadcast %3 : f32 to vector<8x1xf32>
    %414 = arith.mulf %413, %412 : vector<8x1xf32>
    %415 = arith.subf %414, %382 : vector<8x1xf32>
    %416 = arith.index_cast %c2_i32 : i32 to index
    %c0_155 = arith.constant 0 : index
    %c0_156 = arith.constant 0 : index
    %417 = vector.load %arg16[%416, %c0_155, %c0_156] : memref<8x8x8xf32, #tpu.memory_space<vmem>>, vector<1x8x1xf32>
    %418 = vector.shape_cast %417 : vector<1x8x1xf32> to vector<8x1xf32>
    %419 = vector.shape_cast %415 : vector<8x1xf32> to vector<1x8x1xf32>
    tpu.vector_store %arg16[%416, %c0_155, %c0_156], %419 {strides = array<i32>} : memref<8x8x8xf32, #tpu.memory_space<vmem>>, vector<1x8x1xf32>,
    %420 = arith.index_cast %c2_i32 : i32 to index
    %c0_157 = arith.constant 0 : index
    %c1_158 = arith.constant 1 : index
    %421 = vector.load %arg16[%420, %c0_157, %c1_158] : memref<8x8x8xf32, #tpu.memory_space<vmem>>, vector<1x8x1xf32>
    %422 = vector.shape_cast %421 : vector<1x8x1xf32> to vector<8x1xf32>
    %423 = vector.shape_cast %412 : vector<8x1xf32> to vector<1x8x1xf32>
    tpu.vector_store %arg16[%420, %c0_157, %c1_158], %423 {strides = array<i32>} : memref<8x8x8xf32, #tpu.memory_space<vmem>>, vector<1x8x1xf32>,
    %424 = arith.index_cast %c2_i32 : i32 to index
    %c0_159 = arith.constant 0 : index
    %c2_160 = arith.constant 2 : index
    %425 = vector.load %arg16[%424, %c0_159, %c2_160] : memref<8x8x8xf32, #tpu.memory_space<vmem>>, vector<1x8x1xf32>
    %426 = vector.shape_cast %425 : vector<1x8x1xf32> to vector<8x1xf32>
    %427 = vector.shape_cast %382 : vector<8x1xf32> to vector<1x8x1xf32>
    tpu.vector_store %arg16[%424, %c0_159, %c2_160], %427 {strides = array<i32>} : memref<8x8x8xf32, #tpu.memory_space<vmem>>, vector<1x8x1xf32>,
    %cst_161 = arith.constant dense<0.000000e+00> : vector<8xf32>
    %428 = vector.multi_reduction <add>, %322, %cst_161 [1] : vector<8x32xf32> to vector<8xf32>
    %429 = vector.shape_cast %428 : vector<8xf32> to vector<8x1xf32>
    %430 = arith.index_cast %c2_i32 : i32 to index
    %c0_162 = arith.constant 0 : index
    %c3_163 = arith.constant 3 : index
    %431 = vector.load %arg16[%430, %c0_162, %c3_163] : memref<8x8x8xf32, #tpu.memory_space<vmem>>, vector<1x8x1xf32>
    %432 = vector.shape_cast %431 : vector<1x8x1xf32> to vector<8x1xf32>
    %433 = vector.shape_cast %429 : vector<8x1xf32> to vector<1x8x1xf32>
    tpu.vector_store %arg16[%430, %c0_162, %c3_163], %433 {strides = array<i32>} : memref<8x8x8xf32, #tpu.memory_space<vmem>>, vector<1x8x1xf32>,
    %cst_164 = arith.constant dense<0.000000e+00> : vector<8xf32>
    %434 = vector.multi_reduction <add>, %330, %cst_164 [1] : vector<8x32xf32> to vector<8xf32>
    %435 = vector.shape_cast %434 : vector<8xf32> to vector<8x1xf32>
    %436 = arith.index_cast %c2_i32 : i32 to index
    %c0_165 = arith.constant 0 : index
    %c4_166 = arith.constant 4 : index
    %437 = vector.load %arg16[%436, %c0_165, %c4_166] : memref<8x8x8xf32, #tpu.memory_space<vmem>>, vector<1x8x1xf32>
    %438 = vector.shape_cast %437 : vector<1x8x1xf32> to vector<8x1xf32>
    %439 = vector.shape_cast %435 : vector<8x1xf32> to vector<1x8x1xf32>
    tpu.vector_store %arg16[%436, %c0_165, %c4_166], %439 {strides = array<i32>} : memref<8x8x8xf32, #tpu.memory_space<vmem>>, vector<1x8x1xf32>,
    %c3_i32 = arith.constant 3 : i32
    %440 = arith.index_cast %c3_i32 : i32 to index
    %c0_167 = arith.constant 0 : index
    %c0_168 = arith.constant 0 : index
    %441 = vector.load %arg3[%440, %c0_167, %c0_168] : memref<8x8x64xbf16, #tpu.memory_space<vmem>>, vector<1x8x64xbf16>
    %442 = vector.shape_cast %441 : vector<1x8x64xbf16> to vector<8x64xbf16>
    %443 = arith.extf %442 : vector<8x64xbf16> to vector<8x64xf32>
    %444 = arith.index_cast %c3_i32 : i32 to index
    %c0_169 = arith.constant 0 : index
    %c0_170 = arith.constant 0 : index
    %445 = vector.load %arg4[%444, %c0_169, %c0_170] : memref<8x8x32xbf16, #tpu.memory_space<vmem>>, vector<1x8x32xbf16>
    %446 = vector.shape_cast %445 : vector<1x8x32xbf16> to vector<8x32xbf16>
    %447 = arith.extf %446 : vector<8x32xbf16> to vector<8x32xf32>
    %448 = arith.index_cast %c3_i32 : i32 to index
    %c0_171 = arith.constant 0 : index
    %c0_172 = arith.constant 0 : index
    %449 = vector.load %arg17[%448, %c0_171, %c0_172] : memref<8x8x256xf32, #tpu.memory_space<vmem>>, vector<1x8x256xf32>
    %450 = vector.shape_cast %449 : vector<1x8x256xf32> to vector<8x256xf32>
    %c0_173 = arith.constant 0 : index
    %c0_174 = arith.constant 0 : index
    %451 = vector.load %arg9[%c0_173, %c0_174] : memref<32x512xf32, #tpu.memory_space<vmem>>, vector<32x512xf32>
    %cst_175 = arith.constant dense<0.000000e+00> : vector<8x512xf32>
    %452 = tpu.matmul %368, %451, %cst_175 {dimension_numbers = #tpu.dot_dimension_numbers<[1], [0], [0], [1], [0, 0, 1, 1], [], []>} : vector<8x32xf32>, vector<32x512xf32>, vector<8x512xf32> -> vector<8x512xf32>
    %453 = vector.extract_strided_slice %452 {offsets = [0, 0], sizes = [8, 64], strides = [1, 1]} : vector<8x512xf32> to vector<8x64xf32>
    %454 = arith.addf %453, %23 : vector<8x64xf32>
    %cst_176 = arith.constant 0.000000e+00 : f32
    %455 = vector.broadcast %cst_176 : f32 to vector<8x64xf32>
    %456 = arith.maximumf %454, %455 : vector<8x64xf32>
    %457 = vector.extract_strided_slice %456 {offsets = [0, 0], sizes = [8, 32], strides = [1, 1]} : vector<8x64xf32> to vector<8x32xf32>
    %458 = vector.extract_strided_slice %456 {offsets = [0, 32], sizes = [8, 32], strides = [1, 1]} : vector<8x64xf32> to vector<8x32xf32>
    %459 = vector.extract_strided_slice %452 {offsets = [0, 128], sizes = [8, 64], strides = [1, 1]} : vector<8x512xf32> to vector<8x64xf32>
    %460 = vector.extract_strided_slice %450 {offsets = [0, 0], sizes = [8, 64], strides = [1, 1]} : vector<8x256xf32> to vector<8x64xf32>
    %461 = arith.addf %459, %460 : vector<8x64xf32>
    %cst_177 = arith.constant 0.000000e+00 : f32
    %462 = vector.broadcast %cst_177 : f32 to vector<8x64xf32>
    %463 = arith.maximumf %461, %462 : vector<8x64xf32>
    %464 = vector.extract_strided_slice %463 {offsets = [0, 0], sizes = [8, 32], strides = [1, 1]} : vector<8x64xf32> to vector<8x32xf32>
    %465 = arith.addf %464, %457 : vector<8x32xf32>
    %466 = vector.extract_strided_slice %463 {offsets = [0, 32], sizes = [8, 32], strides = [1, 1]} : vector<8x64xf32> to vector<8x32xf32>
    %467 = math.exp %466 : vector<8x32xf32>
    %468 = arith.mulf %467, %447 : vector<8x32xf32>
    %469 = arith.addf %465, %468 : vector<8x32xf32>
    %c0_178 = arith.constant 0 : index
    %c0_179 = arith.constant 0 : index
    %470 = vector.load %arg11[%c0_178, %c0_179] : memref<32x32xf32, #tpu.memory_space<vmem>>, vector<32x32xf32>
    %cst_180 = arith.constant dense<0.000000e+00> : vector<8x32xf32>
    %471 = tpu.matmul %469, %470, %cst_180 {dimension_numbers = #tpu.dot_dimension_numbers<[1], [0], [0], [1], [0, 0, 1, 1], [], []>} : vector<8x32xf32>, vector<32x32xf32>, vector<8x32xf32> -> vector<8x32xf32>
    %472 = arith.addf %471, %32 : vector<8x32xf32>
    %cst_181 = arith.constant 0.000000e+00 : f32
    %473 = vector.broadcast %cst_181 : f32 to vector<8x32xf32>
    %474 = arith.maximumf %472, %473 : vector<8x32xf32>
    %c0_182 = arith.constant 0 : index
    %c0_183 = arith.constant 0 : index
    %475 = vector.load %arg10[%c0_182, %c0_183] : memref<32x256xf32, #tpu.memory_space<vmem>>, vector<32x256xf32>
    %cst_184 = arith.constant dense<0.000000e+00> : vector<8x256xf32>
    %476 = tpu.matmul %474, %475, %cst_184 {dimension_numbers = #tpu.dot_dimension_numbers<[1], [0], [0], [1], [0, 0, 1, 1], [], []>} : vector<8x32xf32>, vector<32x256xf32>, vector<8x256xf32> -> vector<8x256xf32>
    %477 = vector.extract_strided_slice %452 {offsets = [0, 256], sizes = [8, 64], strides = [1, 1]} : vector<8x512xf32> to vector<8x64xf32>
    %478 = vector.extract_strided_slice %476 {offsets = [0, 0], sizes = [8, 64], strides = [1, 1]} : vector<8x256xf32> to vector<8x64xf32>
    %479 = arith.addf %477, %478 : vector<8x64xf32>
    %480 = arith.addf %479, %26 : vector<8x64xf32>
    %cst_185 = arith.constant 0.000000e+00 : f32
    %481 = vector.broadcast %cst_185 : f32 to vector<8x64xf32>
    %482 = arith.maximumf %480, %481 : vector<8x64xf32>
    %483 = arith.addf %482, %29 : vector<8x64xf32>
    %484 = vector.extract_strided_slice %452 {offsets = [0, 384], sizes = [8, 128], strides = [1, 1]} : vector<8x512xf32> to vector<8x128xf32>
    %485 = vector.extract_strided_slice %450 {offsets = [0, 128], sizes = [8, 128], strides = [1, 1]} : vector<8x256xf32> to vector<8x128xf32>
    %486 = arith.addf %484, %485 : vector<8x128xf32>
    %487 = vector.extract_strided_slice %476 {offsets = [0, 128], sizes = [8, 128], strides = [1, 1]} : vector<8x256xf32> to vector<8x128xf32>
    %488 = arith.addf %486, %487 : vector<8x128xf32>
    %489 = arith.negf %488 : vector<8x128xf32>
    %490 = math.exp %489 : vector<8x128xf32>
    %cst_186 = arith.constant 1.000000e+00 : f32
    %491 = vector.broadcast %cst_186 : f32 to vector<8x128xf32>
    %492 = arith.addf %491, %490 : vector<8x128xf32>
    %493 = arith.divf %491, %492 : vector<8x128xf32>
    %494 = math.tanh %488 : vector<8x128xf32>
    %495 = vector.extract_strided_slice %493 {offsets = [0, 0], sizes = [8, 32], strides = [1, 1]} : vector<8x128xf32> to vector<8x32xf32>
    %496 = vector.extract_strided_slice %493 {offsets = [0, 32], sizes = [8, 32], strides = [1, 1]} : vector<8x128xf32> to vector<8x32xf32>
    %497 = vector.extract_strided_slice %494 {offsets = [0, 64], sizes = [8, 32], strides = [1, 1]} : vector<8x128xf32> to vector<8x32xf32>
    %498 = vector.extract_strided_slice %493 {offsets = [0, 96], sizes = [8, 32], strides = [1, 1]} : vector<8x128xf32> to vector<8x32xf32>
    %499 = arith.mulf %496, %366 : vector<8x32xf32>
    %500 = arith.mulf %495, %497 : vector<8x32xf32>
    %501 = arith.addf %499, %500 : vector<8x32xf32>
    %502 = math.tanh %501 : vector<8x32xf32>
    %503 = arith.mulf %498, %502 : vector<8x32xf32>
    %504 = arith.mulf %443, %483 : vector<8x64xf32>
    %cst_187 = arith.constant 0.000000e+00 : f32
    %505 = vector.broadcast %cst_187 : f32 to vector<8x64xf32>
    %506 = arith.maximumf %483, %505 : vector<8x64xf32>
    %507 = math.absf %483 : vector<8x64xf32>
    %cst_188 = arith.constant 0.000000e+00 : f32
    %508 = vector.broadcast %cst_188 : f32 to vector<8x64xf32>
    %509 = arith.subf %508, %507 : vector<8x64xf32>
    %510 = math.exp %509 : vector<8x64xf32>
    %cst_189 = arith.constant 1.000000e+00 : f32
    %511 = vector.broadcast %cst_189 : f32 to vector<8x64xf32>
    %512 = arith.addf %511, %510 : vector<8x64xf32>
    %513 = math.log %512 : vector<8x64xf32>
    %514 = arith.addf %506, %513 : vector<8x64xf32>
    %515 = arith.subf %504, %514 : vector<8x64xf32>
    %cst_190 = arith.constant dense<0.000000e+00> : vector<8xf32>
    %516 = vector.multi_reduction <add>, %515, %cst_190 [1] : vector<8x64xf32> to vector<8xf32>
    %517 = vector.shape_cast %516 : vector<8xf32> to vector<8x1xf32>
    %cst_191 = arith.constant dense<0.000000e+00> : vector<8xf32>
    %518 = vector.multi_reduction <add>, %466, %cst_191 [1] : vector<8x32xf32> to vector<8xf32>
    %519 = vector.shape_cast %518 : vector<8xf32> to vector<8x1xf32>
    %cst_192 = arith.constant 0.000000e+00 : f32
    %520 = vector.broadcast %cst_192 : f32 to vector<8x1xf32>
    %521 = arith.subf %520, %519 : vector<8x1xf32>
    %cst_193 = arith.constant 29.4060326 : f32
    %522 = vector.broadcast %cst_193 : f32 to vector<8x1xf32>
    %523 = arith.subf %521, %522 : vector<8x1xf32>
    %524 = arith.mulf %447, %447 : vector<8x32xf32>
    %cst_194 = arith.constant dense<0.000000e+00> : vector<8xf32>
    %525 = vector.multi_reduction <add>, %524, %cst_194 [1] : vector<8x32xf32> to vector<8xf32>
    %526 = vector.shape_cast %525 : vector<8xf32> to vector<8x1xf32>
    %cst_195 = arith.constant 5.000000e-01 : f32
    %527 = vector.broadcast %cst_195 : f32 to vector<8x1xf32>
    %528 = arith.mulf %527, %526 : vector<8x1xf32>
    %529 = arith.subf %523, %528 : vector<8x1xf32>
    %530 = arith.subf %469, %457 : vector<8x32xf32>
    %cst_196 = arith.constant 0.000000e+00 : f32
    %531 = vector.broadcast %cst_196 : f32 to vector<8x32xf32>
    %532 = arith.subf %531, %458 : vector<8x32xf32>
    %533 = math.exp %532 : vector<8x32xf32>
    %534 = arith.mulf %530, %533 : vector<8x32xf32>
    %cst_197 = arith.constant dense<0.000000e+00> : vector<8xf32>
    %535 = vector.multi_reduction <add>, %458, %cst_197 [1] : vector<8x32xf32> to vector<8xf32>
    %536 = vector.shape_cast %535 : vector<8xf32> to vector<8x1xf32>
    %cst_198 = arith.constant 0.000000e+00 : f32
    %537 = vector.broadcast %cst_198 : f32 to vector<8x1xf32>
    %538 = arith.subf %537, %536 : vector<8x1xf32>
    %cst_199 = arith.constant 29.4060326 : f32
    %539 = vector.broadcast %cst_199 : f32 to vector<8x1xf32>
    %540 = arith.subf %538, %539 : vector<8x1xf32>
    %541 = arith.mulf %534, %534 : vector<8x32xf32>
    %cst_200 = arith.constant dense<0.000000e+00> : vector<8xf32>
    %542 = vector.multi_reduction <add>, %541, %cst_200 [1] : vector<8x32xf32> to vector<8xf32>
    %543 = vector.shape_cast %542 : vector<8xf32> to vector<8x1xf32>
    %cst_201 = arith.constant 5.000000e-01 : f32
    %544 = vector.broadcast %cst_201 : f32 to vector<8x1xf32>
    %545 = arith.mulf %544, %543 : vector<8x1xf32>
    %546 = arith.subf %540, %545 : vector<8x1xf32>
    %547 = arith.subf %529, %546 : vector<8x1xf32>
    %548 = vector.broadcast %3 : f32 to vector<8x1xf32>
    %549 = arith.mulf %548, %547 : vector<8x1xf32>
    %550 = arith.subf %549, %517 : vector<8x1xf32>
    %551 = arith.index_cast %c3_i32 : i32 to index
    %c0_202 = arith.constant 0 : index
    %c0_203 = arith.constant 0 : index
    %552 = vector.load %arg16[%551, %c0_202, %c0_203] : memref<8x8x8xf32, #tpu.memory_space<vmem>>, vector<1x8x1xf32>
    %553 = vector.shape_cast %552 : vector<1x8x1xf32> to vector<8x1xf32>
    %554 = vector.shape_cast %550 : vector<8x1xf32> to vector<1x8x1xf32>
    tpu.vector_store %arg16[%551, %c0_202, %c0_203], %554 {strides = array<i32>} : memref<8x8x8xf32, #tpu.memory_space<vmem>>, vector<1x8x1xf32>,
    %555 = arith.index_cast %c3_i32 : i32 to index
    %c0_204 = arith.constant 0 : index
    %c1_205 = arith.constant 1 : index
    %556 = vector.load %arg16[%555, %c0_204, %c1_205] : memref<8x8x8xf32, #tpu.memory_space<vmem>>, vector<1x8x1xf32>
    %557 = vector.shape_cast %556 : vector<1x8x1xf32> to vector<8x1xf32>
    %558 = vector.shape_cast %547 : vector<8x1xf32> to vector<1x8x1xf32>
    tpu.vector_store %arg16[%555, %c0_204, %c1_205], %558 {strides = array<i32>} : memref<8x8x8xf32, #tpu.memory_space<vmem>>, vector<1x8x1xf32>,
    %559 = arith.index_cast %c3_i32 : i32 to index
    %c0_206 = arith.constant 0 : index
    %c2_207 = arith.constant 2 : index
    %560 = vector.load %arg16[%559, %c0_206, %c2_207] : memref<8x8x8xf32, #tpu.memory_space<vmem>>, vector<1x8x1xf32>
    %561 = vector.shape_cast %560 : vector<1x8x1xf32> to vector<8x1xf32>
    %562 = vector.shape_cast %517 : vector<8x1xf32> to vector<1x8x1xf32>
    tpu.vector_store %arg16[%559, %c0_206, %c2_207], %562 {strides = array<i32>} : memref<8x8x8xf32, #tpu.memory_space<vmem>>, vector<1x8x1xf32>,
    %cst_208 = arith.constant dense<0.000000e+00> : vector<8xf32>
    %563 = vector.multi_reduction <add>, %457, %cst_208 [1] : vector<8x32xf32> to vector<8xf32>
    %564 = vector.shape_cast %563 : vector<8xf32> to vector<8x1xf32>
    %565 = arith.index_cast %c3_i32 : i32 to index
    %c0_209 = arith.constant 0 : index
    %c3_210 = arith.constant 3 : index
    %566 = vector.load %arg16[%565, %c0_209, %c3_210] : memref<8x8x8xf32, #tpu.memory_space<vmem>>, vector<1x8x1xf32>
    %567 = vector.shape_cast %566 : vector<1x8x1xf32> to vector<8x1xf32>
    %568 = vector.shape_cast %564 : vector<8x1xf32> to vector<1x8x1xf32>
    tpu.vector_store %arg16[%565, %c0_209, %c3_210], %568 {strides = array<i32>} : memref<8x8x8xf32, #tpu.memory_space<vmem>>, vector<1x8x1xf32>,
    %cst_211 = arith.constant dense<0.000000e+00> : vector<8xf32>
    %569 = vector.multi_reduction <add>, %465, %cst_211 [1] : vector<8x32xf32> to vector<8xf32>
    %570 = vector.shape_cast %569 : vector<8xf32> to vector<8x1xf32>
    %571 = arith.index_cast %c3_i32 : i32 to index
    %c0_212 = arith.constant 0 : index
    %c4_213 = arith.constant 4 : index
    %572 = vector.load %arg16[%571, %c0_212, %c4_213] : memref<8x8x8xf32, #tpu.memory_space<vmem>>, vector<1x8x1xf32>
    %573 = vector.shape_cast %572 : vector<1x8x1xf32> to vector<8x1xf32>
    %574 = vector.shape_cast %570 : vector<8x1xf32> to vector<1x8x1xf32>
    tpu.vector_store %arg16[%571, %c0_212, %c4_213], %574 {strides = array<i32>} : memref<8x8x8xf32, #tpu.memory_space<vmem>>, vector<1x8x1xf32>,
    %c4_i32 = arith.constant 4 : i32
    %575 = arith.index_cast %c4_i32 : i32 to index
    %c0_214 = arith.constant 0 : index
    %c0_215 = arith.constant 0 : index
    %576 = vector.load %arg3[%575, %c0_214, %c0_215] : memref<8x8x64xbf16, #tpu.memory_space<vmem>>, vector<1x8x64xbf16>
    %577 = vector.shape_cast %576 : vector<1x8x64xbf16> to vector<8x64xbf16>
    %578 = arith.extf %577 : vector<8x64xbf16> to vector<8x64xf32>
    %579 = arith.index_cast %c4_i32 : i32 to index
    %c0_216 = arith.constant 0 : index
    %c0_217 = arith.constant 0 : index
    %580 = vector.load %arg4[%579, %c0_216, %c0_217] : memref<8x8x32xbf16, #tpu.memory_space<vmem>>, vector<1x8x32xbf16>
    %581 = vector.shape_cast %580 : vector<1x8x32xbf16> to vector<8x32xbf16>
    %582 = arith.extf %581 : vector<8x32xbf16> to vector<8x32xf32>
    %583 = arith.index_cast %c4_i32 : i32 to index
    %c0_218 = arith.constant 0 : index
    %c0_219 = arith.constant 0 : index
    %584 = vector.load %arg17[%583, %c0_218, %c0_219] : memref<8x8x256xf32, #tpu.memory_space<vmem>>, vector<1x8x256xf32>
    %585 = vector.shape_cast %584 : vector<1x8x256xf32> to vector<8x256xf32>
    %c0_220 = arith.constant 0 : index
    %c0_221 = arith.constant 0 : index
    %586 = vector.load %arg9[%c0_220, %c0_221] : memref<32x512xf32, #tpu.memory_space<vmem>>, vector<32x512xf32>
    %cst_222 = arith.constant dense<0.000000e+00> : vector<8x512xf32>
    %587 = tpu.matmul %503, %586, %cst_222 {dimension_numbers = #tpu.dot_dimension_numbers<[1], [0], [0], [1], [0, 0, 1, 1], [], []>} : vector<8x32xf32>, vector<32x512xf32>, vector<8x512xf32> -> vector<8x512xf32>
    %588 = vector.extract_strided_slice %587 {offsets = [0, 0], sizes = [8, 64], strides = [1, 1]} : vector<8x512xf32> to vector<8x64xf32>
    %589 = arith.addf %588, %23 : vector<8x64xf32>
    %cst_223 = arith.constant 0.000000e+00 : f32
    %590 = vector.broadcast %cst_223 : f32 to vector<8x64xf32>
    %591 = arith.maximumf %589, %590 : vector<8x64xf32>
    %592 = vector.extract_strided_slice %591 {offsets = [0, 0], sizes = [8, 32], strides = [1, 1]} : vector<8x64xf32> to vector<8x32xf32>
    %593 = vector.extract_strided_slice %591 {offsets = [0, 32], sizes = [8, 32], strides = [1, 1]} : vector<8x64xf32> to vector<8x32xf32>
    %594 = vector.extract_strided_slice %587 {offsets = [0, 128], sizes = [8, 64], strides = [1, 1]} : vector<8x512xf32> to vector<8x64xf32>
    %595 = vector.extract_strided_slice %585 {offsets = [0, 0], sizes = [8, 64], strides = [1, 1]} : vector<8x256xf32> to vector<8x64xf32>
    %596 = arith.addf %594, %595 : vector<8x64xf32>
    %cst_224 = arith.constant 0.000000e+00 : f32
    %597 = vector.broadcast %cst_224 : f32 to vector<8x64xf32>
    %598 = arith.maximumf %596, %597 : vector<8x64xf32>
    %599 = vector.extract_strided_slice %598 {offsets = [0, 0], sizes = [8, 32], strides = [1, 1]} : vector<8x64xf32> to vector<8x32xf32>
    %600 = arith.addf %599, %592 : vector<8x32xf32>
    %601 = vector.extract_strided_slice %598 {offsets = [0, 32], sizes = [8, 32], strides = [1, 1]} : vector<8x64xf32> to vector<8x32xf32>
    %602 = math.exp %601 : vector<8x32xf32>
    %603 = arith.mulf %602, %582 : vector<8x32xf32>
    %604 = arith.addf %600, %603 : vector<8x32xf32>
    %c0_225 = arith.constant 0 : index
    %c0_226 = arith.constant 0 : index
    %605 = vector.load %arg11[%c0_225, %c0_226] : memref<32x32xf32, #tpu.memory_space<vmem>>, vector<32x32xf32>
    %cst_227 = arith.constant dense<0.000000e+00> : vector<8x32xf32>
    %606 = tpu.matmul %604, %605, %cst_227 {dimension_numbers = #tpu.dot_dimension_numbers<[1], [0], [0], [1], [0, 0, 1, 1], [], []>} : vector<8x32xf32>, vector<32x32xf32>, vector<8x32xf32> -> vector<8x32xf32>
    %607 = arith.addf %606, %32 : vector<8x32xf32>
    %cst_228 = arith.constant 0.000000e+00 : f32
    %608 = vector.broadcast %cst_228 : f32 to vector<8x32xf32>
    %609 = arith.maximumf %607, %608 : vector<8x32xf32>
    %c0_229 = arith.constant 0 : index
    %c0_230 = arith.constant 0 : index
    %610 = vector.load %arg10[%c0_229, %c0_230] : memref<32x256xf32, #tpu.memory_space<vmem>>, vector<32x256xf32>
    %cst_231 = arith.constant dense<0.000000e+00> : vector<8x256xf32>
    %611 = tpu.matmul %609, %610, %cst_231 {dimension_numbers = #tpu.dot_dimension_numbers<[1], [0], [0], [1], [0, 0, 1, 1], [], []>} : vector<8x32xf32>, vector<32x256xf32>, vector<8x256xf32> -> vector<8x256xf32>
    %612 = vector.extract_strided_slice %587 {offsets = [0, 256], sizes = [8, 64], strides = [1, 1]} : vector<8x512xf32> to vector<8x64xf32>
    %613 = vector.extract_strided_slice %611 {offsets = [0, 0], sizes = [8, 64], strides = [1, 1]} : vector<8x256xf32> to vector<8x64xf32>
    %614 = arith.addf %612, %613 : vector<8x64xf32>
    %615 = arith.addf %614, %26 : vector<8x64xf32>
    %cst_232 = arith.constant 0.000000e+00 : f32
    %616 = vector.broadcast %cst_232 : f32 to vector<8x64xf32>
    %617 = arith.maximumf %615, %616 : vector<8x64xf32>
    %618 = arith.addf %617, %29 : vector<8x64xf32>
    %619 = vector.extract_strided_slice %587 {offsets = [0, 384], sizes = [8, 128], strides = [1, 1]} : vector<8x512xf32> to vector<8x128xf32>
    %620 = vector.extract_strided_slice %585 {offsets = [0, 128], sizes = [8, 128], strides = [1, 1]} : vector<8x256xf32> to vector<8x128xf32>
    %621 = arith.addf %619, %620 : vector<8x128xf32>
    %622 = vector.extract_strided_slice %611 {offsets = [0, 128], sizes = [8, 128], strides = [1, 1]} : vector<8x256xf32> to vector<8x128xf32>
    %623 = arith.addf %621, %622 : vector<8x128xf32>
    %624 = arith.negf %623 : vector<8x128xf32>
    %625 = math.exp %624 : vector<8x128xf32>
    %cst_233 = arith.constant 1.000000e+00 : f32
    %626 = vector.broadcast %cst_233 : f32 to vector<8x128xf32>
    %627 = arith.addf %626, %625 : vector<8x128xf32>
    %628 = arith.divf %626, %627 : vector<8x128xf32>
    %629 = math.tanh %623 : vector<8x128xf32>
    %630 = vector.extract_strided_slice %628 {offsets = [0, 0], sizes = [8, 32], strides = [1, 1]} : vector<8x128xf32> to vector<8x32xf32>
    %631 = vector.extract_strided_slice %628 {offsets = [0, 32], sizes = [8, 32], strides = [1, 1]} : vector<8x128xf32> to vector<8x32xf32>
    %632 = vector.extract_strided_slice %629 {offsets = [0, 64], sizes = [8, 32], strides = [1, 1]} : vector<8x128xf32> to vector<8x32xf32>
    %633 = vector.extract_strided_slice %628 {offsets = [0, 96], sizes = [8, 32], strides = [1, 1]} : vector<8x128xf32> to vector<8x32xf32>
    %634 = arith.mulf %631, %501 : vector<8x32xf32>
    %635 = arith.mulf %630, %632 : vector<8x32xf32>
    %636 = arith.addf %634, %635 : vector<8x32xf32>
    %637 = math.tanh %636 : vector<8x32xf32>
    %638 = arith.mulf %633, %637 : vector<8x32xf32>
    %639 = arith.mulf %578, %618 : vector<8x64xf32>
    %cst_234 = arith.constant 0.000000e+00 : f32
    %640 = vector.broadcast %cst_234 : f32 to vector<8x64xf32>
    %641 = arith.maximumf %618, %640 : vector<8x64xf32>
    %642 = math.absf %618 : vector<8x64xf32>
    %cst_235 = arith.constant 0.000000e+00 : f32
    %643 = vector.broadcast %cst_235 : f32 to vector<8x64xf32>
    %644 = arith.subf %643, %642 : vector<8x64xf32>
    %645 = math.exp %644 : vector<8x64xf32>
    %cst_236 = arith.constant 1.000000e+00 : f32
    %646 = vector.broadcast %cst_236 : f32 to vector<8x64xf32>
    %647 = arith.addf %646, %645 : vector<8x64xf32>
    %648 = math.log %647 : vector<8x64xf32>
    %649 = arith.addf %641, %648 : vector<8x64xf32>
    %650 = arith.subf %639, %649 : vector<8x64xf32>
    %cst_237 = arith.constant dense<0.000000e+00> : vector<8xf32>
    %651 = vector.multi_reduction <add>, %650, %cst_237 [1] : vector<8x64xf32> to vector<8xf32>
    %652 = vector.shape_cast %651 : vector<8xf32> to vector<8x1xf32>
    %cst_238 = arith.constant dense<0.000000e+00> : vector<8xf32>
    %653 = vector.multi_reduction <add>, %601, %cst_238 [1] : vector<8x32xf32> to vector<8xf32>
    %654 = vector.shape_cast %653 : vector<8xf32> to vector<8x1xf32>
    %cst_239 = arith.constant 0.000000e+00 : f32
    %655 = vector.broadcast %cst_239 : f32 to vector<8x1xf32>
    %656 = arith.subf %655, %654 : vector<8x1xf32>
    %cst_240 = arith.constant 29.4060326 : f32
    %657 = vector.broadcast %cst_240 : f32 to vector<8x1xf32>
    %658 = arith.subf %656, %657 : vector<8x1xf32>
    %659 = arith.mulf %582, %582 : vector<8x32xf32>
    %cst_241 = arith.constant dense<0.000000e+00> : vector<8xf32>
    %660 = vector.multi_reduction <add>, %659, %cst_241 [1] : vector<8x32xf32> to vector<8xf32>
    %661 = vector.shape_cast %660 : vector<8xf32> to vector<8x1xf32>
    %cst_242 = arith.constant 5.000000e-01 : f32
    %662 = vector.broadcast %cst_242 : f32 to vector<8x1xf32>
    %663 = arith.mulf %662, %661 : vector<8x1xf32>
    %664 = arith.subf %658, %663 : vector<8x1xf32>
    %665 = arith.subf %604, %592 : vector<8x32xf32>
    %cst_243 = arith.constant 0.000000e+00 : f32
    %666 = vector.broadcast %cst_243 : f32 to vector<8x32xf32>
    %667 = arith.subf %666, %593 : vector<8x32xf32>
    %668 = math.exp %667 : vector<8x32xf32>
    %669 = arith.mulf %665, %668 : vector<8x32xf32>
    %cst_244 = arith.constant dense<0.000000e+00> : vector<8xf32>
    %670 = vector.multi_reduction <add>, %593, %cst_244 [1] : vector<8x32xf32> to vector<8xf32>
    %671 = vector.shape_cast %670 : vector<8xf32> to vector<8x1xf32>
    %cst_245 = arith.constant 0.000000e+00 : f32
    %672 = vector.broadcast %cst_245 : f32 to vector<8x1xf32>
    %673 = arith.subf %672, %671 : vector<8x1xf32>
    %cst_246 = arith.constant 29.4060326 : f32
    %674 = vector.broadcast %cst_246 : f32 to vector<8x1xf32>
    %675 = arith.subf %673, %674 : vector<8x1xf32>
    %676 = arith.mulf %669, %669 : vector<8x32xf32>
    %cst_247 = arith.constant dense<0.000000e+00> : vector<8xf32>
    %677 = vector.multi_reduction <add>, %676, %cst_247 [1] : vector<8x32xf32> to vector<8xf32>
    %678 = vector.shape_cast %677 : vector<8xf32> to vector<8x1xf32>
    %cst_248 = arith.constant 5.000000e-01 : f32
    %679 = vector.broadcast %cst_248 : f32 to vector<8x1xf32>
    %680 = arith.mulf %679, %678 : vector<8x1xf32>
    %681 = arith.subf %675, %680 : vector<8x1xf32>
    %682 = arith.subf %664, %681 : vector<8x1xf32>
    %683 = vector.broadcast %3 : f32 to vector<8x1xf32>
    %684 = arith.mulf %683, %682 : vector<8x1xf32>
    %685 = arith.subf %684, %652 : vector<8x1xf32>
    %686 = arith.index_cast %c4_i32 : i32 to index
    %c0_249 = arith.constant 0 : index
    %c0_250 = arith.constant 0 : index
    %687 = vector.load %arg16[%686, %c0_249, %c0_250] : memref<8x8x8xf32, #tpu.memory_space<vmem>>, vector<1x8x1xf32>
    %688 = vector.shape_cast %687 : vector<1x8x1xf32> to vector<8x1xf32>
    %689 = vector.shape_cast %685 : vector<8x1xf32> to vector<1x8x1xf32>
    tpu.vector_store %arg16[%686, %c0_249, %c0_250], %689 {strides = array<i32>} : memref<8x8x8xf32, #tpu.memory_space<vmem>>, vector<1x8x1xf32>,
    %690 = arith.index_cast %c4_i32 : i32 to index
    %c0_251 = arith.constant 0 : index
    %c1_252 = arith.constant 1 : index
    %691 = vector.load %arg16[%690, %c0_251, %c1_252] : memref<8x8x8xf32, #tpu.memory_space<vmem>>, vector<1x8x1xf32>
    %692 = vector.shape_cast %691 : vector<1x8x1xf32> to vector<8x1xf32>
    %693 = vector.shape_cast %682 : vector<8x1xf32> to vector<1x8x1xf32>
    tpu.vector_store %arg16[%690, %c0_251, %c1_252], %693 {strides = array<i32>} : memref<8x8x8xf32, #tpu.memory_space<vmem>>, vector<1x8x1xf32>,
    %694 = arith.index_cast %c4_i32 : i32 to index
    %c0_253 = arith.constant 0 : index
    %c2_254 = arith.constant 2 : index
    %695 = vector.load %arg16[%694, %c0_253, %c2_254] : memref<8x8x8xf32, #tpu.memory_space<vmem>>, vector<1x8x1xf32>
    %696 = vector.shape_cast %695 : vector<1x8x1xf32> to vector<8x1xf32>
    %697 = vector.shape_cast %652 : vector<8x1xf32> to vector<1x8x1xf32>
    tpu.vector_store %arg16[%694, %c0_253, %c2_254], %697 {strides = array<i32>} : memref<8x8x8xf32, #tpu.memory_space<vmem>>, vector<1x8x1xf32>,
    %cst_255 = arith.constant dense<0.000000e+00> : vector<8xf32>
    %698 = vector.multi_reduction <add>, %592, %cst_255 [1] : vector<8x32xf32> to vector<8xf32>
    %699 = vector.shape_cast %698 : vector<8xf32> to vector<8x1xf32>
    %700 = arith.index_cast %c4_i32 : i32 to index
    %c0_256 = arith.constant 0 : index
    %c3_257 = arith.constant 3 : index
    %701 = vector.load %arg16[%700, %c0_256, %c3_257] : memref<8x8x8xf32, #tpu.memory_space<vmem>>, vector<1x8x1xf32>
    %702 = vector.shape_cast %701 : vector<1x8x1xf32> to vector<8x1xf32>
    %703 = vector.shape_cast %699 : vector<8x1xf32> to vector<1x8x1xf32>
    tpu.vector_store %arg16[%700, %c0_256, %c3_257], %703 {strides = array<i32>} : memref<8x8x8xf32, #tpu.memory_space<vmem>>, vector<1x8x1xf32>,
    %cst_258 = arith.constant dense<0.000000e+00> : vector<8xf32>
    %704 = vector.multi_reduction <add>, %600, %cst_258 [1] : vector<8x32xf32> to vector<8xf32>
    %705 = vector.shape_cast %704 : vector<8xf32> to vector<8x1xf32>
    %706 = arith.index_cast %c4_i32 : i32 to index
    %c0_259 = arith.constant 0 : index
    %c4_260 = arith.constant 4 : index
    %707 = vector.load %arg16[%706, %c0_259, %c4_260] : memref<8x8x8xf32, #tpu.memory_space<vmem>>, vector<1x8x1xf32>
    %708 = vector.shape_cast %707 : vector<1x8x1xf32> to vector<8x1xf32>
    %709 = vector.shape_cast %705 : vector<8x1xf32> to vector<1x8x1xf32>
    tpu.vector_store %arg16[%706, %c0_259, %c4_260], %709 {strides = array<i32>} : memref<8x8x8xf32, #tpu.memory_space<vmem>>, vector<1x8x1xf32>,
    %c5_i32 = arith.constant 5 : i32
    %710 = arith.index_cast %c5_i32 : i32 to index
    %c0_261 = arith.constant 0 : index
    %c0_262 = arith.constant 0 : index
    %711 = vector.load %arg3[%710, %c0_261, %c0_262] : memref<8x8x64xbf16, #tpu.memory_space<vmem>>, vector<1x8x64xbf16>
    %712 = vector.shape_cast %711 : vector<1x8x64xbf16> to vector<8x64xbf16>
    %713 = arith.extf %712 : vector<8x64xbf16> to vector<8x64xf32>
    %714 = arith.index_cast %c5_i32 : i32 to index
    %c0_263 = arith.constant 0 : index
    %c0_264 = arith.constant 0 : index
    %715 = vector.load %arg4[%714, %c0_263, %c0_264] : memref<8x8x32xbf16, #tpu.memory_space<vmem>>, vector<1x8x32xbf16>
    %716 = vector.shape_cast %715 : vector<1x8x32xbf16> to vector<8x32xbf16>
    %717 = arith.extf %716 : vector<8x32xbf16> to vector<8x32xf32>
    %718 = arith.index_cast %c5_i32 : i32 to index
    %c0_265 = arith.constant 0 : index
    %c0_266 = arith.constant 0 : index
    %719 = vector.load %arg17[%718, %c0_265, %c0_266] : memref<8x8x256xf32, #tpu.memory_space<vmem>>, vector<1x8x256xf32>
    %720 = vector.shape_cast %719 : vector<1x8x256xf32> to vector<8x256xf32>
    %c0_267 = arith.constant 0 : index
    %c0_268 = arith.constant 0 : index
    %721 = vector.load %arg9[%c0_267, %c0_268] : memref<32x512xf32, #tpu.memory_space<vmem>>, vector<32x512xf32>
    %cst_269 = arith.constant dense<0.000000e+00> : vector<8x512xf32>
    %722 = tpu.matmul %638, %721, %cst_269 {dimension_numbers = #tpu.dot_dimension_numbers<[1], [0], [0], [1], [0, 0, 1, 1], [], []>} : vector<8x32xf32>, vector<32x512xf32>, vector<8x512xf32> -> vector<8x512xf32>
    %723 = vector.extract_strided_slice %722 {offsets = [0, 0], sizes = [8, 64], strides = [1, 1]} : vector<8x512xf32> to vector<8x64xf32>
    %724 = arith.addf %723, %23 : vector<8x64xf32>
    %cst_270 = arith.constant 0.000000e+00 : f32
    %725 = vector.broadcast %cst_270 : f32 to vector<8x64xf32>
    %726 = arith.maximumf %724, %725 : vector<8x64xf32>
    %727 = vector.extract_strided_slice %726 {offsets = [0, 0], sizes = [8, 32], strides = [1, 1]} : vector<8x64xf32> to vector<8x32xf32>
    %728 = vector.extract_strided_slice %726 {offsets = [0, 32], sizes = [8, 32], strides = [1, 1]} : vector<8x64xf32> to vector<8x32xf32>
    %729 = vector.extract_strided_slice %722 {offsets = [0, 128], sizes = [8, 64], strides = [1, 1]} : vector<8x512xf32> to vector<8x64xf32>
    %730 = vector.extract_strided_slice %720 {offsets = [0, 0], sizes = [8, 64], strides = [1, 1]} : vector<8x256xf32> to vector<8x64xf32>
    %731 = arith.addf %729, %730 : vector<8x64xf32>
    %cst_271 = arith.constant 0.000000e+00 : f32
    %732 = vector.broadcast %cst_271 : f32 to vector<8x64xf32>
    %733 = arith.maximumf %731, %732 : vector<8x64xf32>
    %734 = vector.extract_strided_slice %733 {offsets = [0, 0], sizes = [8, 32], strides = [1, 1]} : vector<8x64xf32> to vector<8x32xf32>
    %735 = arith.addf %734, %727 : vector<8x32xf32>
    %736 = vector.extract_strided_slice %733 {offsets = [0, 32], sizes = [8, 32], strides = [1, 1]} : vector<8x64xf32> to vector<8x32xf32>
    %737 = math.exp %736 : vector<8x32xf32>
    %738 = arith.mulf %737, %717 : vector<8x32xf32>
    %739 = arith.addf %735, %738 : vector<8x32xf32>
    %c0_272 = arith.constant 0 : index
    %c0_273 = arith.constant 0 : index
    %740 = vector.load %arg11[%c0_272, %c0_273] : memref<32x32xf32, #tpu.memory_space<vmem>>, vector<32x32xf32>
    %cst_274 = arith.constant dense<0.000000e+00> : vector<8x32xf32>
    %741 = tpu.matmul %739, %740, %cst_274 {dimension_numbers = #tpu.dot_dimension_numbers<[1], [0], [0], [1], [0, 0, 1, 1], [], []>} : vector<8x32xf32>, vector<32x32xf32>, vector<8x32xf32> -> vector<8x32xf32>
    %742 = arith.addf %741, %32 : vector<8x32xf32>
    %cst_275 = arith.constant 0.000000e+00 : f32
    %743 = vector.broadcast %cst_275 : f32 to vector<8x32xf32>
    %744 = arith.maximumf %742, %743 : vector<8x32xf32>
    %c0_276 = arith.constant 0 : index
    %c0_277 = arith.constant 0 : index
    %745 = vector.load %arg10[%c0_276, %c0_277] : memref<32x256xf32, #tpu.memory_space<vmem>>, vector<32x256xf32>
    %cst_278 = arith.constant dense<0.000000e+00> : vector<8x256xf32>
    %746 = tpu.matmul %744, %745, %cst_278 {dimension_numbers = #tpu.dot_dimension_numbers<[1], [0], [0], [1], [0, 0, 1, 1], [], []>} : vector<8x32xf32>, vector<32x256xf32>, vector<8x256xf32> -> vector<8x256xf32>
    %747 = vector.extract_strided_slice %722 {offsets = [0, 256], sizes = [8, 64], strides = [1, 1]} : vector<8x512xf32> to vector<8x64xf32>
    %748 = vector.extract_strided_slice %746 {offsets = [0, 0], sizes = [8, 64], strides = [1, 1]} : vector<8x256xf32> to vector<8x64xf32>
    %749 = arith.addf %747, %748 : vector<8x64xf32>
    %750 = arith.addf %749, %26 : vector<8x64xf32>
    %cst_279 = arith.constant 0.000000e+00 : f32
    %751 = vector.broadcast %cst_279 : f32 to vector<8x64xf32>
    %752 = arith.maximumf %750, %751 : vector<8x64xf32>
    %753 = arith.addf %752, %29 : vector<8x64xf32>
    %754 = vector.extract_strided_slice %722 {offsets = [0, 384], sizes = [8, 128], strides = [1, 1]} : vector<8x512xf32> to vector<8x128xf32>
    %755 = vector.extract_strided_slice %720 {offsets = [0, 128], sizes = [8, 128], strides = [1, 1]} : vector<8x256xf32> to vector<8x128xf32>
    %756 = arith.addf %754, %755 : vector<8x128xf32>
    %757 = vector.extract_strided_slice %746 {offsets = [0, 128], sizes = [8, 128], strides = [1, 1]} : vector<8x256xf32> to vector<8x128xf32>
    %758 = arith.addf %756, %757 : vector<8x128xf32>
    %759 = arith.negf %758 : vector<8x128xf32>
    %760 = math.exp %759 : vector<8x128xf32>
    %cst_280 = arith.constant 1.000000e+00 : f32
    %761 = vector.broadcast %cst_280 : f32 to vector<8x128xf32>
    %762 = arith.addf %761, %760 : vector<8x128xf32>
    %763 = arith.divf %761, %762 : vector<8x128xf32>
    %764 = math.tanh %758 : vector<8x128xf32>
    %765 = vector.extract_strided_slice %763 {offsets = [0, 0], sizes = [8, 32], strides = [1, 1]} : vector<8x128xf32> to vector<8x32xf32>
    %766 = vector.extract_strided_slice %763 {offsets = [0, 32], sizes = [8, 32], strides = [1, 1]} : vector<8x128xf32> to vector<8x32xf32>
    %767 = vector.extract_strided_slice %764 {offsets = [0, 64], sizes = [8, 32], strides = [1, 1]} : vector<8x128xf32> to vector<8x32xf32>
    %768 = vector.extract_strided_slice %763 {offsets = [0, 96], sizes = [8, 32], strides = [1, 1]} : vector<8x128xf32> to vector<8x32xf32>
    %769 = arith.mulf %766, %636 : vector<8x32xf32>
    %770 = arith.mulf %765, %767 : vector<8x32xf32>
    %771 = arith.addf %769, %770 : vector<8x32xf32>
    %772 = math.tanh %771 : vector<8x32xf32>
    %773 = arith.mulf %768, %772 : vector<8x32xf32>
    %774 = arith.mulf %713, %753 : vector<8x64xf32>
    %cst_281 = arith.constant 0.000000e+00 : f32
    %775 = vector.broadcast %cst_281 : f32 to vector<8x64xf32>
    %776 = arith.maximumf %753, %775 : vector<8x64xf32>
    %777 = math.absf %753 : vector<8x64xf32>
    %cst_282 = arith.constant 0.000000e+00 : f32
    %778 = vector.broadcast %cst_282 : f32 to vector<8x64xf32>
    %779 = arith.subf %778, %777 : vector<8x64xf32>
    %780 = math.exp %779 : vector<8x64xf32>
    %cst_283 = arith.constant 1.000000e+00 : f32
    %781 = vector.broadcast %cst_283 : f32 to vector<8x64xf32>
    %782 = arith.addf %781, %780 : vector<8x64xf32>
    %783 = math.log %782 : vector<8x64xf32>
    %784 = arith.addf %776, %783 : vector<8x64xf32>
    %785 = arith.subf %774, %784 : vector<8x64xf32>
    %cst_284 = arith.constant dense<0.000000e+00> : vector<8xf32>
    %786 = vector.multi_reduction <add>, %785, %cst_284 [1] : vector<8x64xf32> to vector<8xf32>
    %787 = vector.shape_cast %786 : vector<8xf32> to vector<8x1xf32>
    %cst_285 = arith.constant dense<0.000000e+00> : vector<8xf32>
    %788 = vector.multi_reduction <add>, %736, %cst_285 [1] : vector<8x32xf32> to vector<8xf32>
    %789 = vector.shape_cast %788 : vector<8xf32> to vector<8x1xf32>
    %cst_286 = arith.constant 0.000000e+00 : f32
    %790 = vector.broadcast %cst_286 : f32 to vector<8x1xf32>
    %791 = arith.subf %790, %789 : vector<8x1xf32>
    %cst_287 = arith.constant 29.4060326 : f32
    %792 = vector.broadcast %cst_287 : f32 to vector<8x1xf32>
    %793 = arith.subf %791, %792 : vector<8x1xf32>
    %794 = arith.mulf %717, %717 : vector<8x32xf32>
    %cst_288 = arith.constant dense<0.000000e+00> : vector<8xf32>
    %795 = vector.multi_reduction <add>, %794, %cst_288 [1] : vector<8x32xf32> to vector<8xf32>
    %796 = vector.shape_cast %795 : vector<8xf32> to vector<8x1xf32>
    %cst_289 = arith.constant 5.000000e-01 : f32
    %797 = vector.broadcast %cst_289 : f32 to vector<8x1xf32>
    %798 = arith.mulf %797, %796 : vector<8x1xf32>
    %799 = arith.subf %793, %798 : vector<8x1xf32>
    %800 = arith.subf %739, %727 : vector<8x32xf32>
    %cst_290 = arith.constant 0.000000e+00 : f32
    %801 = vector.broadcast %cst_290 : f32 to vector<8x32xf32>
    %802 = arith.subf %801, %728 : vector<8x32xf32>
    %803 = math.exp %802 : vector<8x32xf32>
    %804 = arith.mulf %800, %803 : vector<8x32xf32>
    %cst_291 = arith.constant dense<0.000000e+00> : vector<8xf32>
    %805 = vector.multi_reduction <add>, %728, %cst_291 [1] : vector<8x32xf32> to vector<8xf32>
    %806 = vector.shape_cast %805 : vector<8xf32> to vector<8x1xf32>
    %cst_292 = arith.constant 0.000000e+00 : f32
    %807 = vector.broadcast %cst_292 : f32 to vector<8x1xf32>
    %808 = arith.subf %807, %806 : vector<8x1xf32>
    %cst_293 = arith.constant 29.4060326 : f32
    %809 = vector.broadcast %cst_293 : f32 to vector<8x1xf32>
    %810 = arith.subf %808, %809 : vector<8x1xf32>
    %811 = arith.mulf %804, %804 : vector<8x32xf32>
    %cst_294 = arith.constant dense<0.000000e+00> : vector<8xf32>
    %812 = vector.multi_reduction <add>, %811, %cst_294 [1] : vector<8x32xf32> to vector<8xf32>
    %813 = vector.shape_cast %812 : vector<8xf32> to vector<8x1xf32>
    %cst_295 = arith.constant 5.000000e-01 : f32
    %814 = vector.broadcast %cst_295 : f32 to vector<8x1xf32>
    %815 = arith.mulf %814, %813 : vector<8x1xf32>
    %816 = arith.subf %810, %815 : vector<8x1xf32>
    %817 = arith.subf %799, %816 : vector<8x1xf32>
    %818 = vector.broadcast %3 : f32 to vector<8x1xf32>
    %819 = arith.mulf %818, %817 : vector<8x1xf32>
    %820 = arith.subf %819, %787 : vector<8x1xf32>
    %821 = arith.index_cast %c5_i32 : i32 to index
    %c0_296 = arith.constant 0 : index
    %c0_297 = arith.constant 0 : index
    %822 = vector.load %arg16[%821, %c0_296, %c0_297] : memref<8x8x8xf32, #tpu.memory_space<vmem>>, vector<1x8x1xf32>
    %823 = vector.shape_cast %822 : vector<1x8x1xf32> to vector<8x1xf32>
    %824 = vector.shape_cast %820 : vector<8x1xf32> to vector<1x8x1xf32>
    tpu.vector_store %arg16[%821, %c0_296, %c0_297], %824 {strides = array<i32>} : memref<8x8x8xf32, #tpu.memory_space<vmem>>, vector<1x8x1xf32>,
    %825 = arith.index_cast %c5_i32 : i32 to index
    %c0_298 = arith.constant 0 : index
    %c1_299 = arith.constant 1 : index
    %826 = vector.load %arg16[%825, %c0_298, %c1_299] : memref<8x8x8xf32, #tpu.memory_space<vmem>>, vector<1x8x1xf32>
    %827 = vector.shape_cast %826 : vector<1x8x1xf32> to vector<8x1xf32>
    %828 = vector.shape_cast %817 : vector<8x1xf32> to vector<1x8x1xf32>
    tpu.vector_store %arg16[%825, %c0_298, %c1_299], %828 {strides = array<i32>} : memref<8x8x8xf32, #tpu.memory_space<vmem>>, vector<1x8x1xf32>,
    %829 = arith.index_cast %c5_i32 : i32 to index
    %c0_300 = arith.constant 0 : index
    %c2_301 = arith.constant 2 : index
    %830 = vector.load %arg16[%829, %c0_300, %c2_301] : memref<8x8x8xf32, #tpu.memory_space<vmem>>, vector<1x8x1xf32>
    %831 = vector.shape_cast %830 : vector<1x8x1xf32> to vector<8x1xf32>
    %832 = vector.shape_cast %787 : vector<8x1xf32> to vector<1x8x1xf32>
    tpu.vector_store %arg16[%829, %c0_300, %c2_301], %832 {strides = array<i32>} : memref<8x8x8xf32, #tpu.memory_space<vmem>>, vector<1x8x1xf32>,
    %cst_302 = arith.constant dense<0.000000e+00> : vector<8xf32>
    %833 = vector.multi_reduction <add>, %727, %cst_302 [1] : vector<8x32xf32> to vector<8xf32>
    %834 = vector.shape_cast %833 : vector<8xf32> to vector<8x1xf32>
    %835 = arith.index_cast %c5_i32 : i32 to index
    %c0_303 = arith.constant 0 : index
    %c3_304 = arith.constant 3 : index
    %836 = vector.load %arg16[%835, %c0_303, %c3_304] : memref<8x8x8xf32, #tpu.memory_space<vmem>>, vector<1x8x1xf32>
    %837 = vector.shape_cast %836 : vector<1x8x1xf32> to vector<8x1xf32>
    %838 = vector.shape_cast %834 : vector<8x1xf32> to vector<1x8x1xf32>
    tpu.vector_store %arg16[%835, %c0_303, %c3_304], %838 {strides = array<i32>} : memref<8x8x8xf32, #tpu.memory_space<vmem>>, vector<1x8x1xf32>,
    %cst_305 = arith.constant dense<0.000000e+00> : vector<8xf32>
    %839 = vector.multi_reduction <add>, %735, %cst_305 [1] : vector<8x32xf32> to vector<8xf32>
    %840 = vector.shape_cast %839 : vector<8xf32> to vector<8x1xf32>
    %841 = arith.index_cast %c5_i32 : i32 to index
    %c0_306 = arith.constant 0 : index
    %c4_307 = arith.constant 4 : index
    %842 = vector.load %arg16[%841, %c0_306, %c4_307] : memref<8x8x8xf32, #tpu.memory_space<vmem>>, vector<1x8x1xf32>
    %843 = vector.shape_cast %842 : vector<1x8x1xf32> to vector<8x1xf32>
    %844 = vector.shape_cast %840 : vector<8x1xf32> to vector<1x8x1xf32>
    tpu.vector_store %arg16[%841, %c0_306, %c4_307], %844 {strides = array<i32>} : memref<8x8x8xf32, #tpu.memory_space<vmem>>, vector<1x8x1xf32>,
    %c6_i32 = arith.constant 6 : i32
    %845 = arith.index_cast %c6_i32 : i32 to index
    %c0_308 = arith.constant 0 : index
    %c0_309 = arith.constant 0 : index
    %846 = vector.load %arg3[%845, %c0_308, %c0_309] : memref<8x8x64xbf16, #tpu.memory_space<vmem>>, vector<1x8x64xbf16>
    %847 = vector.shape_cast %846 : vector<1x8x64xbf16> to vector<8x64xbf16>
    %848 = arith.extf %847 : vector<8x64xbf16> to vector<8x64xf32>
    %849 = arith.index_cast %c6_i32 : i32 to index
    %c0_310 = arith.constant 0 : index
    %c0_311 = arith.constant 0 : index
    %850 = vector.load %arg4[%849, %c0_310, %c0_311] : memref<8x8x32xbf16, #tpu.memory_space<vmem>>, vector<1x8x32xbf16>
    %851 = vector.shape_cast %850 : vector<1x8x32xbf16> to vector<8x32xbf16>
    %852 = arith.extf %851 : vector<8x32xbf16> to vector<8x32xf32>
    %853 = arith.index_cast %c6_i32 : i32 to index
    %c0_312 = arith.constant 0 : index
    %c0_313 = arith.constant 0 : index
    %854 = vector.load %arg17[%853, %c0_312, %c0_313] : memref<8x8x256xf32, #tpu.memory_space<vmem>>, vector<1x8x256xf32>
    %855 = vector.shape_cast %854 : vector<1x8x256xf32> to vector<8x256xf32>
    %c0_314 = arith.constant 0 : index
    %c0_315 = arith.constant 0 : index
    %856 = vector.load %arg9[%c0_314, %c0_315] : memref<32x512xf32, #tpu.memory_space<vmem>>, vector<32x512xf32>
    %cst_316 = arith.constant dense<0.000000e+00> : vector<8x512xf32>
    %857 = tpu.matmul %773, %856, %cst_316 {dimension_numbers = #tpu.dot_dimension_numbers<[1], [0], [0], [1], [0, 0, 1, 1], [], []>} : vector<8x32xf32>, vector<32x512xf32>, vector<8x512xf32> -> vector<8x512xf32>
    %858 = vector.extract_strided_slice %857 {offsets = [0, 0], sizes = [8, 64], strides = [1, 1]} : vector<8x512xf32> to vector<8x64xf32>
    %859 = arith.addf %858, %23 : vector<8x64xf32>
    %cst_317 = arith.constant 0.000000e+00 : f32
    %860 = vector.broadcast %cst_317 : f32 to vector<8x64xf32>
    %861 = arith.maximumf %859, %860 : vector<8x64xf32>
    %862 = vector.extract_strided_slice %861 {offsets = [0, 0], sizes = [8, 32], strides = [1, 1]} : vector<8x64xf32> to vector<8x32xf32>
    %863 = vector.extract_strided_slice %861 {offsets = [0, 32], sizes = [8, 32], strides = [1, 1]} : vector<8x64xf32> to vector<8x32xf32>
    %864 = vector.extract_strided_slice %857 {offsets = [0, 128], sizes = [8, 64], strides = [1, 1]} : vector<8x512xf32> to vector<8x64xf32>
    %865 = vector.extract_strided_slice %855 {offsets = [0, 0], sizes = [8, 64], strides = [1, 1]} : vector<8x256xf32> to vector<8x64xf32>
    %866 = arith.addf %864, %865 : vector<8x64xf32>
    %cst_318 = arith.constant 0.000000e+00 : f32
    %867 = vector.broadcast %cst_318 : f32 to vector<8x64xf32>
    %868 = arith.maximumf %866, %867 : vector<8x64xf32>
    %869 = vector.extract_strided_slice %868 {offsets = [0, 0], sizes = [8, 32], strides = [1, 1]} : vector<8x64xf32> to vector<8x32xf32>
    %870 = arith.addf %869, %862 : vector<8x32xf32>
    %871 = vector.extract_strided_slice %868 {offsets = [0, 32], sizes = [8, 32], strides = [1, 1]} : vector<8x64xf32> to vector<8x32xf32>
    %872 = math.exp %871 : vector<8x32xf32>
    %873 = arith.mulf %872, %852 : vector<8x32xf32>
    %874 = arith.addf %870, %873 : vector<8x32xf32>
    %c0_319 = arith.constant 0 : index
    %c0_320 = arith.constant 0 : index
    %875 = vector.load %arg11[%c0_319, %c0_320] : memref<32x32xf32, #tpu.memory_space<vmem>>, vector<32x32xf32>
    %cst_321 = arith.constant dense<0.000000e+00> : vector<8x32xf32>
    %876 = tpu.matmul %874, %875, %cst_321 {dimension_numbers = #tpu.dot_dimension_numbers<[1], [0], [0], [1], [0, 0, 1, 1], [], []>} : vector<8x32xf32>, vector<32x32xf32>, vector<8x32xf32> -> vector<8x32xf32>
    %877 = arith.addf %876, %32 : vector<8x32xf32>
    %cst_322 = arith.constant 0.000000e+00 : f32
    %878 = vector.broadcast %cst_322 : f32 to vector<8x32xf32>
    %879 = arith.maximumf %877, %878 : vector<8x32xf32>
    %c0_323 = arith.constant 0 : index
    %c0_324 = arith.constant 0 : index
    %880 = vector.load %arg10[%c0_323, %c0_324] : memref<32x256xf32, #tpu.memory_space<vmem>>, vector<32x256xf32>
    %cst_325 = arith.constant dense<0.000000e+00> : vector<8x256xf32>
    %881 = tpu.matmul %879, %880, %cst_325 {dimension_numbers = #tpu.dot_dimension_numbers<[1], [0], [0], [1], [0, 0, 1, 1], [], []>} : vector<8x32xf32>, vector<32x256xf32>, vector<8x256xf32> -> vector<8x256xf32>
    %882 = vector.extract_strided_slice %857 {offsets = [0, 256], sizes = [8, 64], strides = [1, 1]} : vector<8x512xf32> to vector<8x64xf32>
    %883 = vector.extract_strided_slice %881 {offsets = [0, 0], sizes = [8, 64], strides = [1, 1]} : vector<8x256xf32> to vector<8x64xf32>
    %884 = arith.addf %882, %883 : vector<8x64xf32>
    %885 = arith.addf %884, %26 : vector<8x64xf32>
    %cst_326 = arith.constant 0.000000e+00 : f32
    %886 = vector.broadcast %cst_326 : f32 to vector<8x64xf32>
    %887 = arith.maximumf %885, %886 : vector<8x64xf32>
    %888 = arith.addf %887, %29 : vector<8x64xf32>
    %889 = vector.extract_strided_slice %857 {offsets = [0, 384], sizes = [8, 128], strides = [1, 1]} : vector<8x512xf32> to vector<8x128xf32>
    %890 = vector.extract_strided_slice %855 {offsets = [0, 128], sizes = [8, 128], strides = [1, 1]} : vector<8x256xf32> to vector<8x128xf32>
    %891 = arith.addf %889, %890 : vector<8x128xf32>
    %892 = vector.extract_strided_slice %881 {offsets = [0, 128], sizes = [8, 128], strides = [1, 1]} : vector<8x256xf32> to vector<8x128xf32>
    %893 = arith.addf %891, %892 : vector<8x128xf32>
    %894 = arith.negf %893 : vector<8x128xf32>
    %895 = math.exp %894 : vector<8x128xf32>
    %cst_327 = arith.constant 1.000000e+00 : f32
    %896 = vector.broadcast %cst_327 : f32 to vector<8x128xf32>
    %897 = arith.addf %896, %895 : vector<8x128xf32>
    %898 = arith.divf %896, %897 : vector<8x128xf32>
    %899 = math.tanh %893 : vector<8x128xf32>
    %900 = vector.extract_strided_slice %898 {offsets = [0, 0], sizes = [8, 32], strides = [1, 1]} : vector<8x128xf32> to vector<8x32xf32>
    %901 = vector.extract_strided_slice %898 {offsets = [0, 32], sizes = [8, 32], strides = [1, 1]} : vector<8x128xf32> to vector<8x32xf32>
    %902 = vector.extract_strided_slice %899 {offsets = [0, 64], sizes = [8, 32], strides = [1, 1]} : vector<8x128xf32> to vector<8x32xf32>
    %903 = vector.extract_strided_slice %898 {offsets = [0, 96], sizes = [8, 32], strides = [1, 1]} : vector<8x128xf32> to vector<8x32xf32>
    %904 = arith.mulf %901, %771 : vector<8x32xf32>
    %905 = arith.mulf %900, %902 : vector<8x32xf32>
    %906 = arith.addf %904, %905 : vector<8x32xf32>
    %907 = math.tanh %906 : vector<8x32xf32>
    %908 = arith.mulf %903, %907 : vector<8x32xf32>
    %909 = arith.mulf %848, %888 : vector<8x64xf32>
    %cst_328 = arith.constant 0.000000e+00 : f32
    %910 = vector.broadcast %cst_328 : f32 to vector<8x64xf32>
    %911 = arith.maximumf %888, %910 : vector<8x64xf32>
    %912 = math.absf %888 : vector<8x64xf32>
    %cst_329 = arith.constant 0.000000e+00 : f32
    %913 = vector.broadcast %cst_329 : f32 to vector<8x64xf32>
    %914 = arith.subf %913, %912 : vector<8x64xf32>
    %915 = math.exp %914 : vector<8x64xf32>
    %cst_330 = arith.constant 1.000000e+00 : f32
    %916 = vector.broadcast %cst_330 : f32 to vector<8x64xf32>
    %917 = arith.addf %916, %915 : vector<8x64xf32>
    %918 = math.log %917 : vector<8x64xf32>
    %919 = arith.addf %911, %918 : vector<8x64xf32>
    %920 = arith.subf %909, %919 : vector<8x64xf32>
    %cst_331 = arith.constant dense<0.000000e+00> : vector<8xf32>
    %921 = vector.multi_reduction <add>, %920, %cst_331 [1] : vector<8x64xf32> to vector<8xf32>
    %922 = vector.shape_cast %921 : vector<8xf32> to vector<8x1xf32>
    %cst_332 = arith.constant dense<0.000000e+00> : vector<8xf32>
    %923 = vector.multi_reduction <add>, %871, %cst_332 [1] : vector<8x32xf32> to vector<8xf32>
    %924 = vector.shape_cast %923 : vector<8xf32> to vector<8x1xf32>
    %cst_333 = arith.constant 0.000000e+00 : f32
    %925 = vector.broadcast %cst_333 : f32 to vector<8x1xf32>
    %926 = arith.subf %925, %924 : vector<8x1xf32>
    %cst_334 = arith.constant 29.4060326 : f32
    %927 = vector.broadcast %cst_334 : f32 to vector<8x1xf32>
    %928 = arith.subf %926, %927 : vector<8x1xf32>
    %929 = arith.mulf %852, %852 : vector<8x32xf32>
    %cst_335 = arith.constant dense<0.000000e+00> : vector<8xf32>
    %930 = vector.multi_reduction <add>, %929, %cst_335 [1] : vector<8x32xf32> to vector<8xf32>
    %931 = vector.shape_cast %930 : vector<8xf32> to vector<8x1xf32>
    %cst_336 = arith.constant 5.000000e-01 : f32
    %932 = vector.broadcast %cst_336 : f32 to vector<8x1xf32>
    %933 = arith.mulf %932, %931 : vector<8x1xf32>
    %934 = arith.subf %928, %933 : vector<8x1xf32>
    %935 = arith.subf %874, %862 : vector<8x32xf32>
    %cst_337 = arith.constant 0.000000e+00 : f32
    %936 = vector.broadcast %cst_337 : f32 to vector<8x32xf32>
    %937 = arith.subf %936, %863 : vector<8x32xf32>
    %938 = math.exp %937 : vector<8x32xf32>
    %939 = arith.mulf %935, %938 : vector<8x32xf32>
    %cst_338 = arith.constant dense<0.000000e+00> : vector<8xf32>
    %940 = vector.multi_reduction <add>, %863, %cst_338 [1] : vector<8x32xf32> to vector<8xf32>
    %941 = vector.shape_cast %940 : vector<8xf32> to vector<8x1xf32>
    %cst_339 = arith.constant 0.000000e+00 : f32
    %942 = vector.broadcast %cst_339 : f32 to vector<8x1xf32>
    %943 = arith.subf %942, %941 : vector<8x1xf32>
    %cst_340 = arith.constant 29.4060326 : f32
    %944 = vector.broadcast %cst_340 : f32 to vector<8x1xf32>
    %945 = arith.subf %943, %944 : vector<8x1xf32>
    %946 = arith.mulf %939, %939 : vector<8x32xf32>
    %cst_341 = arith.constant dense<0.000000e+00> : vector<8xf32>
    %947 = vector.multi_reduction <add>, %946, %cst_341 [1] : vector<8x32xf32> to vector<8xf32>
    %948 = vector.shape_cast %947 : vector<8xf32> to vector<8x1xf32>
    %cst_342 = arith.constant 5.000000e-01 : f32
    %949 = vector.broadcast %cst_342 : f32 to vector<8x1xf32>
    %950 = arith.mulf %949, %948 : vector<8x1xf32>
    %951 = arith.subf %945, %950 : vector<8x1xf32>
    %952 = arith.subf %934, %951 : vector<8x1xf32>
    %953 = vector.broadcast %3 : f32 to vector<8x1xf32>
    %954 = arith.mulf %953, %952 : vector<8x1xf32>
    %955 = arith.subf %954, %922 : vector<8x1xf32>
    %956 = arith.index_cast %c6_i32 : i32 to index
    %c0_343 = arith.constant 0 : index
    %c0_344 = arith.constant 0 : index
    %957 = vector.load %arg16[%956, %c0_343, %c0_344] : memref<8x8x8xf32, #tpu.memory_space<vmem>>, vector<1x8x1xf32>
    %958 = vector.shape_cast %957 : vector<1x8x1xf32> to vector<8x1xf32>
    %959 = vector.shape_cast %955 : vector<8x1xf32> to vector<1x8x1xf32>
    tpu.vector_store %arg16[%956, %c0_343, %c0_344], %959 {strides = array<i32>} : memref<8x8x8xf32, #tpu.memory_space<vmem>>, vector<1x8x1xf32>,
    %960 = arith.index_cast %c6_i32 : i32 to index
    %c0_345 = arith.constant 0 : index
    %c1_346 = arith.constant 1 : index
    %961 = vector.load %arg16[%960, %c0_345, %c1_346] : memref<8x8x8xf32, #tpu.memory_space<vmem>>, vector<1x8x1xf32>
    %962 = vector.shape_cast %961 : vector<1x8x1xf32> to vector<8x1xf32>
    %963 = vector.shape_cast %952 : vector<8x1xf32> to vector<1x8x1xf32>
    tpu.vector_store %arg16[%960, %c0_345, %c1_346], %963 {strides = array<i32>} : memref<8x8x8xf32, #tpu.memory_space<vmem>>, vector<1x8x1xf32>,
    %964 = arith.index_cast %c6_i32 : i32 to index
    %c0_347 = arith.constant 0 : index
    %c2_348 = arith.constant 2 : index
    %965 = vector.load %arg16[%964, %c0_347, %c2_348] : memref<8x8x8xf32, #tpu.memory_space<vmem>>, vector<1x8x1xf32>
    %966 = vector.shape_cast %965 : vector<1x8x1xf32> to vector<8x1xf32>
    %967 = vector.shape_cast %922 : vector<8x1xf32> to vector<1x8x1xf32>
    tpu.vector_store %arg16[%964, %c0_347, %c2_348], %967 {strides = array<i32>} : memref<8x8x8xf32, #tpu.memory_space<vmem>>, vector<1x8x1xf32>,
    %cst_349 = arith.constant dense<0.000000e+00> : vector<8xf32>
    %968 = vector.multi_reduction <add>, %862, %cst_349 [1] : vector<8x32xf32> to vector<8xf32>
    %969 = vector.shape_cast %968 : vector<8xf32> to vector<8x1xf32>
    %970 = arith.index_cast %c6_i32 : i32 to index
    %c0_350 = arith.constant 0 : index
    %c3_351 = arith.constant 3 : index
    %971 = vector.load %arg16[%970, %c0_350, %c3_351] : memref<8x8x8xf32, #tpu.memory_space<vmem>>, vector<1x8x1xf32>
    %972 = vector.shape_cast %971 : vector<1x8x1xf32> to vector<8x1xf32>
    %973 = vector.shape_cast %969 : vector<8x1xf32> to vector<1x8x1xf32>
    tpu.vector_store %arg16[%970, %c0_350, %c3_351], %973 {strides = array<i32>} : memref<8x8x8xf32, #tpu.memory_space<vmem>>, vector<1x8x1xf32>,
    %cst_352 = arith.constant dense<0.000000e+00> : vector<8xf32>
    %974 = vector.multi_reduction <add>, %870, %cst_352 [1] : vector<8x32xf32> to vector<8xf32>
    %975 = vector.shape_cast %974 : vector<8xf32> to vector<8x1xf32>
    %976 = arith.index_cast %c6_i32 : i32 to index
    %c0_353 = arith.constant 0 : index
    %c4_354 = arith.constant 4 : index
    %977 = vector.load %arg16[%976, %c0_353, %c4_354] : memref<8x8x8xf32, #tpu.memory_space<vmem>>, vector<1x8x1xf32>
    %978 = vector.shape_cast %977 : vector<1x8x1xf32> to vector<8x1xf32>
    %979 = vector.shape_cast %975 : vector<8x1xf32> to vector<1x8x1xf32>
    tpu.vector_store %arg16[%976, %c0_353, %c4_354], %979 {strides = array<i32>} : memref<8x8x8xf32, #tpu.memory_space<vmem>>, vector<1x8x1xf32>,
    %c7_i32 = arith.constant 7 : i32
    %980 = arith.index_cast %c7_i32 : i32 to index
    %c0_355 = arith.constant 0 : index
    %c0_356 = arith.constant 0 : index
    %981 = vector.load %arg3[%980, %c0_355, %c0_356] : memref<8x8x64xbf16, #tpu.memory_space<vmem>>, vector<1x8x64xbf16>
    %982 = vector.shape_cast %981 : vector<1x8x64xbf16> to vector<8x64xbf16>
    %983 = arith.extf %982 : vector<8x64xbf16> to vector<8x64xf32>
    %984 = arith.index_cast %c7_i32 : i32 to index
    %c0_357 = arith.constant 0 : index
    %c0_358 = arith.constant 0 : index
    %985 = vector.load %arg4[%984, %c0_357, %c0_358] : memref<8x8x32xbf16, #tpu.memory_space<vmem>>, vector<1x8x32xbf16>
    %986 = vector.shape_cast %985 : vector<1x8x32xbf16> to vector<8x32xbf16>
    %987 = arith.extf %986 : vector<8x32xbf16> to vector<8x32xf32>
    %988 = arith.index_cast %c7_i32 : i32 to index
    %c0_359 = arith.constant 0 : index
    %c0_360 = arith.constant 0 : index
    %989 = vector.load %arg17[%988, %c0_359, %c0_360] : memref<8x8x256xf32, #tpu.memory_space<vmem>>, vector<1x8x256xf32>
    %990 = vector.shape_cast %989 : vector<1x8x256xf32> to vector<8x256xf32>
    %c0_361 = arith.constant 0 : index
    %c0_362 = arith.constant 0 : index
    %991 = vector.load %arg9[%c0_361, %c0_362] : memref<32x512xf32, #tpu.memory_space<vmem>>, vector<32x512xf32>
    %cst_363 = arith.constant dense<0.000000e+00> : vector<8x512xf32>
    %992 = tpu.matmul %908, %991, %cst_363 {dimension_numbers = #tpu.dot_dimension_numbers<[1], [0], [0], [1], [0, 0, 1, 1], [], []>} : vector<8x32xf32>, vector<32x512xf32>, vector<8x512xf32> -> vector<8x512xf32>
    %993 = vector.extract_strided_slice %992 {offsets = [0, 0], sizes = [8, 64], strides = [1, 1]} : vector<8x512xf32> to vector<8x64xf32>
    %994 = arith.addf %993, %23 : vector<8x64xf32>
    %cst_364 = arith.constant 0.000000e+00 : f32
    %995 = vector.broadcast %cst_364 : f32 to vector<8x64xf32>
    %996 = arith.maximumf %994, %995 : vector<8x64xf32>
    %997 = vector.extract_strided_slice %996 {offsets = [0, 0], sizes = [8, 32], strides = [1, 1]} : vector<8x64xf32> to vector<8x32xf32>
    %998 = vector.extract_strided_slice %996 {offsets = [0, 32], sizes = [8, 32], strides = [1, 1]} : vector<8x64xf32> to vector<8x32xf32>
    %999 = vector.extract_strided_slice %992 {offsets = [0, 128], sizes = [8, 64], strides = [1, 1]} : vector<8x512xf32> to vector<8x64xf32>
    %1000 = vector.extract_strided_slice %990 {offsets = [0, 0], sizes = [8, 64], strides = [1, 1]} : vector<8x256xf32> to vector<8x64xf32>
    %1001 = arith.addf %999, %1000 : vector<8x64xf32>
    %cst_365 = arith.constant 0.000000e+00 : f32
    %1002 = vector.broadcast %cst_365 : f32 to vector<8x64xf32>
    %1003 = arith.maximumf %1001, %1002 : vector<8x64xf32>
    %1004 = vector.extract_strided_slice %1003 {offsets = [0, 0], sizes = [8, 32], strides = [1, 1]} : vector<8x64xf32> to vector<8x32xf32>
    %1005 = arith.addf %1004, %997 : vector<8x32xf32>
    %1006 = vector.extract_strided_slice %1003 {offsets = [0, 32], sizes = [8, 32], strides = [1, 1]} : vector<8x64xf32> to vector<8x32xf32>
    %1007 = math.exp %1006 : vector<8x32xf32>
    %1008 = arith.mulf %1007, %987 : vector<8x32xf32>
    %1009 = arith.addf %1005, %1008 : vector<8x32xf32>
    %c0_366 = arith.constant 0 : index
    %c0_367 = arith.constant 0 : index
    %1010 = vector.load %arg11[%c0_366, %c0_367] : memref<32x32xf32, #tpu.memory_space<vmem>>, vector<32x32xf32>
    %cst_368 = arith.constant dense<0.000000e+00> : vector<8x32xf32>
    %1011 = tpu.matmul %1009, %1010, %cst_368 {dimension_numbers = #tpu.dot_dimension_numbers<[1], [0], [0], [1], [0, 0, 1, 1], [], []>} : vector<8x32xf32>, vector<32x32xf32>, vector<8x32xf32> -> vector<8x32xf32>
    %1012 = arith.addf %1011, %32 : vector<8x32xf32>
    %cst_369 = arith.constant 0.000000e+00 : f32
    %1013 = vector.broadcast %cst_369 : f32 to vector<8x32xf32>
    %1014 = arith.maximumf %1012, %1013 : vector<8x32xf32>
    %c0_370 = arith.constant 0 : index
    %c0_371 = arith.constant 0 : index
    %1015 = vector.load %arg10[%c0_370, %c0_371] : memref<32x256xf32, #tpu.memory_space<vmem>>, vector<32x256xf32>
    %cst_372 = arith.constant dense<0.000000e+00> : vector<8x256xf32>
    %1016 = tpu.matmul %1014, %1015, %cst_372 {dimension_numbers = #tpu.dot_dimension_numbers<[1], [0], [0], [1], [0, 0, 1, 1], [], []>} : vector<8x32xf32>, vector<32x256xf32>, vector<8x256xf32> -> vector<8x256xf32>
    %1017 = vector.extract_strided_slice %992 {offsets = [0, 256], sizes = [8, 64], strides = [1, 1]} : vector<8x512xf32> to vector<8x64xf32>
    %1018 = vector.extract_strided_slice %1016 {offsets = [0, 0], sizes = [8, 64], strides = [1, 1]} : vector<8x256xf32> to vector<8x64xf32>
    %1019 = arith.addf %1017, %1018 : vector<8x64xf32>
    %1020 = arith.addf %1019, %26 : vector<8x64xf32>
    %cst_373 = arith.constant 0.000000e+00 : f32
    %1021 = vector.broadcast %cst_373 : f32 to vector<8x64xf32>
    %1022 = arith.maximumf %1020, %1021 : vector<8x64xf32>
    %1023 = arith.addf %1022, %29 : vector<8x64xf32>
    %1024 = vector.extract_strided_slice %992 {offsets = [0, 384], sizes = [8, 128], strides = [1, 1]} : vector<8x512xf32> to vector<8x128xf32>
    %1025 = vector.extract_strided_slice %990 {offsets = [0, 128], sizes = [8, 128], strides = [1, 1]} : vector<8x256xf32> to vector<8x128xf32>
    %1026 = arith.addf %1024, %1025 : vector<8x128xf32>
    %1027 = vector.extract_strided_slice %1016 {offsets = [0, 128], sizes = [8, 128], strides = [1, 1]} : vector<8x256xf32> to vector<8x128xf32>
    %1028 = arith.addf %1026, %1027 : vector<8x128xf32>
    %1029 = arith.negf %1028 : vector<8x128xf32>
    %1030 = math.exp %1029 : vector<8x128xf32>
    %cst_374 = arith.constant 1.000000e+00 : f32
    %1031 = vector.broadcast %cst_374 : f32 to vector<8x128xf32>
    %1032 = arith.addf %1031, %1030 : vector<8x128xf32>
    %1033 = arith.divf %1031, %1032 : vector<8x128xf32>
    %1034 = math.tanh %1028 : vector<8x128xf32>
    %1035 = vector.extract_strided_slice %1033 {offsets = [0, 0], sizes = [8, 32], strides = [1, 1]} : vector<8x128xf32> to vector<8x32xf32>
    %1036 = vector.extract_strided_slice %1033 {offsets = [0, 32], sizes = [8, 32], strides = [1, 1]} : vector<8x128xf32> to vector<8x32xf32>
    %1037 = vector.extract_strided_slice %1034 {offsets = [0, 64], sizes = [8, 32], strides = [1, 1]} : vector<8x128xf32> to vector<8x32xf32>
    %1038 = vector.extract_strided_slice %1033 {offsets = [0, 96], sizes = [8, 32], strides = [1, 1]} : vector<8x128xf32> to vector<8x32xf32>
    %1039 = arith.mulf %1036, %906 : vector<8x32xf32>
    %1040 = arith.mulf %1035, %1037 : vector<8x32xf32>
    %1041 = arith.addf %1039, %1040 : vector<8x32xf32>
    %1042 = math.tanh %1041 : vector<8x32xf32>
    %1043 = arith.mulf %1038, %1042 : vector<8x32xf32>
    %1044 = arith.mulf %983, %1023 : vector<8x64xf32>
    %cst_375 = arith.constant 0.000000e+00 : f32
    %1045 = vector.broadcast %cst_375 : f32 to vector<8x64xf32>
    %1046 = arith.maximumf %1023, %1045 : vector<8x64xf32>
    %1047 = math.absf %1023 : vector<8x64xf32>
    %cst_376 = arith.constant 0.000000e+00 : f32
    %1048 = vector.broadcast %cst_376 : f32 to vector<8x64xf32>
    %1049 = arith.subf %1048, %1047 : vector<8x64xf32>
    %1050 = math.exp %1049 : vector<8x64xf32>
    %cst_377 = arith.constant 1.000000e+00 : f32
    %1051 = vector.broadcast %cst_377 : f32 to vector<8x64xf32>
    %1052 = arith.addf %1051, %1050 : vector<8x64xf32>
    %1053 = math.log %1052 : vector<8x64xf32>
    %1054 = arith.addf %1046, %1053 : vector<8x64xf32>
    %1055 = arith.subf %1044, %1054 : vector<8x64xf32>
    %cst_378 = arith.constant dense<0.000000e+00> : vector<8xf32>
    %1056 = vector.multi_reduction <add>, %1055, %cst_378 [1] : vector<8x64xf32> to vector<8xf32>
    %1057 = vector.shape_cast %1056 : vector<8xf32> to vector<8x1xf32>
    %cst_379 = arith.constant dense<0.000000e+00> : vector<8xf32>
    %1058 = vector.multi_reduction <add>, %1006, %cst_379 [1] : vector<8x32xf32> to vector<8xf32>
    %1059 = vector.shape_cast %1058 : vector<8xf32> to vector<8x1xf32>
    %cst_380 = arith.constant 0.000000e+00 : f32
    %1060 = vector.broadcast %cst_380 : f32 to vector<8x1xf32>
    %1061 = arith.subf %1060, %1059 : vector<8x1xf32>
    %cst_381 = arith.constant 29.4060326 : f32
    %1062 = vector.broadcast %cst_381 : f32 to vector<8x1xf32>
    %1063 = arith.subf %1061, %1062 : vector<8x1xf32>
    %1064 = arith.mulf %987, %987 : vector<8x32xf32>
    %cst_382 = arith.constant dense<0.000000e+00> : vector<8xf32>
    %1065 = vector.multi_reduction <add>, %1064, %cst_382 [1] : vector<8x32xf32> to vector<8xf32>
    %1066 = vector.shape_cast %1065 : vector<8xf32> to vector<8x1xf32>
    %cst_383 = arith.constant 5.000000e-01 : f32
    %1067 = vector.broadcast %cst_383 : f32 to vector<8x1xf32>
    %1068 = arith.mulf %1067, %1066 : vector<8x1xf32>
    %1069 = arith.subf %1063, %1068 : vector<8x1xf32>
    %1070 = arith.subf %1009, %997 : vector<8x32xf32>
    %cst_384 = arith.constant 0.000000e+00 : f32
    %1071 = vector.broadcast %cst_384 : f32 to vector<8x32xf32>
    %1072 = arith.subf %1071, %998 : vector<8x32xf32>
    %1073 = math.exp %1072 : vector<8x32xf32>
    %1074 = arith.mulf %1070, %1073 : vector<8x32xf32>
    %cst_385 = arith.constant dense<0.000000e+00> : vector<8xf32>
    %1075 = vector.multi_reduction <add>, %998, %cst_385 [1] : vector<8x32xf32> to vector<8xf32>
    %1076 = vector.shape_cast %1075 : vector<8xf32> to vector<8x1xf32>
    %cst_386 = arith.constant 0.000000e+00 : f32
    %1077 = vector.broadcast %cst_386 : f32 to vector<8x1xf32>
    %1078 = arith.subf %1077, %1076 : vector<8x1xf32>
    %cst_387 = arith.constant 29.4060326 : f32
    %1079 = vector.broadcast %cst_387 : f32 to vector<8x1xf32>
    %1080 = arith.subf %1078, %1079 : vector<8x1xf32>
    %1081 = arith.mulf %1074, %1074 : vector<8x32xf32>
    %cst_388 = arith.constant dense<0.000000e+00> : vector<8xf32>
    %1082 = vector.multi_reduction <add>, %1081, %cst_388 [1] : vector<8x32xf32> to vector<8xf32>
    %1083 = vector.shape_cast %1082 : vector<8xf32> to vector<8x1xf32>
    %cst_389 = arith.constant 5.000000e-01 : f32
    %1084 = vector.broadcast %cst_389 : f32 to vector<8x1xf32>
    %1085 = arith.mulf %1084, %1083 : vector<8x1xf32>
    %1086 = arith.subf %1080, %1085 : vector<8x1xf32>
    %1087 = arith.subf %1069, %1086 : vector<8x1xf32>
    %1088 = vector.broadcast %3 : f32 to vector<8x1xf32>
    %1089 = arith.mulf %1088, %1087 : vector<8x1xf32>
    %1090 = arith.subf %1089, %1057 : vector<8x1xf32>
    %1091 = arith.index_cast %c7_i32 : i32 to index
    %c0_390 = arith.constant 0 : index
    %c0_391 = arith.constant 0 : index
    %1092 = vector.load %arg16[%1091, %c0_390, %c0_391] : memref<8x8x8xf32, #tpu.memory_space<vmem>>, vector<1x8x1xf32>
    %1093 = vector.shape_cast %1092 : vector<1x8x1xf32> to vector<8x1xf32>
    %1094 = vector.shape_cast %1090 : vector<8x1xf32> to vector<1x8x1xf32>
    tpu.vector_store %arg16[%1091, %c0_390, %c0_391], %1094 {strides = array<i32>} : memref<8x8x8xf32, #tpu.memory_space<vmem>>, vector<1x8x1xf32>,
    %1095 = arith.index_cast %c7_i32 : i32 to index
    %c0_392 = arith.constant 0 : index
    %c1_393 = arith.constant 1 : index
    %1096 = vector.load %arg16[%1095, %c0_392, %c1_393] : memref<8x8x8xf32, #tpu.memory_space<vmem>>, vector<1x8x1xf32>
    %1097 = vector.shape_cast %1096 : vector<1x8x1xf32> to vector<8x1xf32>
    %1098 = vector.shape_cast %1087 : vector<8x1xf32> to vector<1x8x1xf32>
    tpu.vector_store %arg16[%1095, %c0_392, %c1_393], %1098 {strides = array<i32>} : memref<8x8x8xf32, #tpu.memory_space<vmem>>, vector<1x8x1xf32>,
    %1099 = arith.index_cast %c7_i32 : i32 to index
    %c0_394 = arith.constant 0 : index
    %c2_395 = arith.constant 2 : index
    %1100 = vector.load %arg16[%1099, %c0_394, %c2_395] : memref<8x8x8xf32, #tpu.memory_space<vmem>>, vector<1x8x1xf32>
    %1101 = vector.shape_cast %1100 : vector<1x8x1xf32> to vector<8x1xf32>
    %1102 = vector.shape_cast %1057 : vector<8x1xf32> to vector<1x8x1xf32>
    tpu.vector_store %arg16[%1099, %c0_394, %c2_395], %1102 {strides = array<i32>} : memref<8x8x8xf32, #tpu.memory_space<vmem>>, vector<1x8x1xf32>,
    %cst_396 = arith.constant dense<0.000000e+00> : vector<8xf32>
    %1103 = vector.multi_reduction <add>, %997, %cst_396 [1] : vector<8x32xf32> to vector<8xf32>
    %1104 = vector.shape_cast %1103 : vector<8xf32> to vector<8x1xf32>
    %1105 = arith.index_cast %c7_i32 : i32 to index
    %c0_397 = arith.constant 0 : index
    %c3_398 = arith.constant 3 : index
    %1106 = vector.load %arg16[%1105, %c0_397, %c3_398] : memref<8x8x8xf32, #tpu.memory_space<vmem>>, vector<1x8x1xf32>
    %1107 = vector.shape_cast %1106 : vector<1x8x1xf32> to vector<8x1xf32>
    %1108 = vector.shape_cast %1104 : vector<8x1xf32> to vector<1x8x1xf32>
    tpu.vector_store %arg16[%1105, %c0_397, %c3_398], %1108 {strides = array<i32>} : memref<8x8x8xf32, #tpu.memory_space<vmem>>, vector<1x8x1xf32>,
    %cst_399 = arith.constant dense<0.000000e+00> : vector<8xf32>
    %1109 = vector.multi_reduction <add>, %1005, %cst_399 [1] : vector<8x32xf32> to vector<8xf32>
    %1110 = vector.shape_cast %1109 : vector<8xf32> to vector<8x1xf32>
    %1111 = arith.index_cast %c7_i32 : i32 to index
    %c0_400 = arith.constant 0 : index
    %c4_401 = arith.constant 4 : index
    %1112 = vector.load %arg16[%1111, %c0_400, %c4_401] : memref<8x8x8xf32, #tpu.memory_space<vmem>>, vector<1x8x1xf32>
    %1113 = vector.shape_cast %1112 : vector<1x8x1xf32> to vector<8x1xf32>
    %1114 = vector.shape_cast %1110 : vector<8x1xf32> to vector<1x8x1xf32>
    tpu.vector_store %arg16[%1111, %c0_400, %c4_401], %1114 {strides = array<i32>} : memref<8x8x8xf32, #tpu.memory_space<vmem>>, vector<1x8x1xf32>,
    %c8_i32 = arith.constant 8 : i32
    %c0_402 = arith.constant 0 : index
    %c0_403 = arith.constant 0 : index
    %1115 = vector.load %arg18[%c0_402, %c0_403] : memref<8x32xf32, #tpu.memory_space<vmem>>, vector<8x32xf32>
    tpu.vector_store %arg18[%c0_402, %c0_403], %1043 {strides = array<i32>} : memref<8x32xf32, #tpu.memory_space<vmem>>, vector<8x32xf32>,
    %c0_404 = arith.constant 0 : index
    %c0_405 = arith.constant 0 : index
    %1116 = vector.load %arg19[%c0_404, %c0_405] : memref<8x32xf32, #tpu.memory_space<vmem>>, vector<8x32xf32>
    tpu.vector_store %arg19[%c0_404, %c0_405], %1041 {strides = array<i32>} : memref<8x32xf32, #tpu.memory_space<vmem>>, vector<8x32xf32>,
    return
  }
  func.func @transform_0(%arg0: i32, %arg1: i32) -> i32 {
    %c0_i32 = arith.constant 0 : i32
    %c0_i32_0 = arith.constant 0 : i32
    return %c0_i32 : i32
  }
  func.func @transform_1(%arg0: i32, %arg1: i32) -> (i32, i32, i32) {
    %c0_i32 = arith.constant 0 : i32
    %c0_i32_0 = arith.constant 0 : i32
    return %arg1, %arg0, %c0_i32 : i32, i32, i32
  }
  func.func @transform_2(%arg0: i32, %arg1: i32) -> (i32, i32, i32) {
    %c0_i32 = arith.constant 0 : i32
    %c0_i32_0 = arith.constant 0 : i32
    return %arg1, %arg0, %c0_i32 : i32, i32, i32
  }
  func.func @transform_3(%arg0: i32, %arg1: i32) -> (i32, i32) {
    %c0_i32 = arith.constant 0 : i32
    %c0_i32_0 = arith.constant 0 : i32
    %c0_i32_1 = arith.constant 0 : i32
    return %c0_i32, %c0_i32_0 : i32, i32
  }
  func.func @transform_4(%arg0: i32, %arg1: i32) -> (i32, i32) {
    %c0_i32 = arith.constant 0 : i32
    %c0_i32_0 = arith.constant 0 : i32
    %c0_i32_1 = arith.constant 0 : i32
    return %c0_i32, %c0_i32_0 : i32, i32
  }
  func.func @transform_5(%arg0: i32, %arg1: i32) -> (i32, i32) {
    %c0_i32 = arith.constant 0 : i32
    %c0_i32_0 = arith.constant 0 : i32
    %c0_i32_1 = arith.constant 0 : i32
    return %c0_i32, %c0_i32_0 : i32, i32
  }
  func.func @transform_6(%arg0: i32, %arg1: i32) -> (i32, i32) {
    %c0_i32 = arith.constant 0 : i32
    %c0_i32_0 = arith.constant 0 : i32
    %c0_i32_1 = arith.constant 0 : i32
    return %c0_i32, %c0_i32_0 : i32, i32
  }
  func.func @transform_7(%arg0: i32, %arg1: i32) -> (i32, i32) {
    %c0_i32 = arith.constant 0 : i32
    %c0_i32_0 = arith.constant 0 : i32
    %c0_i32_1 = arith.constant 0 : i32
    return %c0_i32, %c0_i32_0 : i32, i32
  }
  func.func @transform_8(%arg0: i32, %arg1: i32) -> (i32, i32) {
    %c0_i32 = arith.constant 0 : i32
    %c0_i32_0 = arith.constant 0 : i32
    %c0_i32_1 = arith.constant 0 : i32
    return %c0_i32, %c0_i32_0 : i32, i32
  }
  func.func @transform_9(%arg0: i32, %arg1: i32) -> (i32, i32) {
    %c0_i32 = arith.constant 0 : i32
    %c0_i32_0 = arith.constant 0 : i32
    %c0_i32_1 = arith.constant 0 : i32
    return %c0_i32, %c0_i32_0 : i32, i32
  }
  func.func @transform_10(%arg0: i32, %arg1: i32) -> (i32, i32) {
    %c0_i32 = arith.constant 0 : i32
    %c0_i32_0 = arith.constant 0 : i32
    %c0_i32_1 = arith.constant 0 : i32
    return %c0_i32, %c0_i32_0 : i32, i32
  }
  func.func @transform_11(%arg0: i32, %arg1: i32) -> (i32, i32) {
    %c0_i32 = arith.constant 0 : i32
    %c0_i32_0 = arith.constant 0 : i32
    %c0_i32_1 = arith.constant 0 : i32
    return %c0_i32, %c0_i32_0 : i32, i32
  }
  func.func @transform_12(%arg0: i32, %arg1: i32) -> (i32, i32) {
    %c0_i32 = arith.constant 0 : i32
    %c0_i32_0 = arith.constant 0 : i32
    %c0_i32_1 = arith.constant 0 : i32
    return %c0_i32, %c0_i32_0 : i32, i32
  }
  func.func @transform_13(%arg0: i32, %arg1: i32) -> (i32, i32) {
    %c0_i32 = arith.constant 0 : i32
    %c0_i32_0 = arith.constant 0 : i32
    %c0_i32_1 = arith.constant 0 : i32
    return %c0_i32, %c0_i32_0 : i32, i32
  }
  func.func @transform_14(%arg0: i32, %arg1: i32) -> (i32, i32, i32) {
    %c0_i32 = arith.constant 0 : i32
    %c0_i32_0 = arith.constant 0 : i32
    return %arg1, %arg0, %c0_i32 : i32, i32, i32
  }
}

</mosaic_0001>

<bundles_post_ra>
// kernel: tpu_custom_call.1
= control target key start
LH: loop header
LB: loop body
LE: loop exit
PB: predicated region body
PF: predicated region fallthrough
CT: control target
= control target key end

     0   :  { %20 = vsyncpa [#allocation7], 0  ;;  %s4610_s0 = inlined_call_operand.<no memory space> [shape: f32[1], index: 0, kind: input, shape index: {}]   ;;  %s4611_s1 = inlined_call_operand.vmem [shape: bf16[8,8,64], index: 1, kind: input, shape index: {}]   ;;  %s4612_s2 = inlined_call_operand.hbm [shape: bf16[8,8,32], index: 2, kind: input, shape index: {}]   ;;  %s4613_s3 = inlined_call_operand.vmem [shape: f32[64,32], index: 3, kind: input, shape index: {}]   ;;  %s4614_s4 = inlined_call_operand.vmem [shape: f32[1,32], index: 4, kind: input, shape index: {}]   ;;  %s4615_s5 = inlined_call_operand.vmem [shape: f32[32,256], index: 5, kind: input, shape index: {}]   ;;  %s4616_s6 = inlined_call_operand.vmem [shape: f32[1,256], index: 6, kind: input, shape index: {}]   ;;  %s4617_s7 = inlined_call_operand.hbm [shape: f32[32,512], index: 7, kind: input, shape index: {}]   ;;  %s4618_s8 = inlined_call_operand.hbm [shape: f32[32,256], index: 8, kind: input, shape index: {}]   ;;  %s4619_s9 = inlined_call_operand.hbm [shape: f32[32,32], index: 9, kind: input, shape index: {}]   ;;  %s4620_s10 = inlined_call_operand.vmem [shape: f32[1,64], index: 10, kind: input, shape index: {}]   ;;  %s4621_s11 = inlined_call_operand.vmem [shape: f32[1,64], index: 11, kind: input, shape index: {}]   ;;  %s4622_s12 = inlined_call_operand.vmem [shape: f32[1,64], index: 12, kind: input, shape index: {}]   ;;  %s4623_s13 = inlined_call_operand.vmem [shape: f32[1,32], index: 13, kind: input, shape index: {}]   ;;  %s4624_s14 = inlined_call_operand.hbm [shape: f32[8,8,8], index: 14, kind: output, shape index: {}]  }
   0x1   :  { %21 = vsyncpa [#allocation10], 0 }
   0x2   :  { %22 = vsyncpa [#allocation13], 0  ;;  %s53_s15 = sshll.u32 %s4617_s7, 4  ;;  %s54_s15 = int_to_ptr.hbm [resolvable:$true] %s53_s15 }
   0x3   :  { %23 = vsyncpa [#allocation8], 0  ;;  %s3358_s16 = smov [#allocation9]   ;;  %s32_s20 = sshll.u32 %s4612_s2, 4  ;;  %s33_s20 = int_to_ptr.hbm [resolvable:$true] %s32_s20 }
   0x4   :  { %s55_s17 = sshll.u32 %s3358_s16, 4  ;;  %s3359_s21 = smov 512   ;;  %s56_s17 = int_to_ptr.vmem [resolvable:$true] %s55_s17 }
   0x5   :  { %s3360_s22 = smov 32   ;;  %s3361_s23 = smov [#allocation6]  }
   0x6   :  { %61 = dma.hbm_to_vmem [thread:$0]  %s54_s15, 2048, %s56_s17, [#allocation10], %s3359_s21, %s3359_s21, %s3360_s22  }
   0x7   :  { %s34_s24 = sshll.u32 %s3361_s23, 4  ;;  %s3362_s25 = smov 64   ;;  %s35_s24 = int_to_ptr.vmem [resolvable:$true] %s34_s24 }
   0x8   :  { %s3363_s26 = smov 4   ;;  %s66_s28 = sshll.u32 %s4618_s8, 4  ;;  %s67_s28 = int_to_ptr.hbm [resolvable:$true] %s66_s28 }
   0x9   :  { %40 = dma.hbm_to_vmem [thread:$0]  %s33_s20, 512, %s35_s24, [#allocation7], %s3362_s25, %s3362_s25, %s3363_s26  }
   0xa   :  { %s3364_s29 = smov [#allocation11]   ;;  %s79_s15 = sshll.u32 %s4619_s9, 4  ;;  %s80_s15 = int_to_ptr.hbm [resolvable:$true] %s79_s15 }
   0xb   :  { %s68_s2 = sshll.u32 %s3364_s29, 4  ;;  %s3365_s17 = smov 256   ;;  %s69_s2 = int_to_ptr.vmem [resolvable:$true] %s68_s2 }
   0xc   :  { %s3366_s18 = smov 16   ;;  %s3367_s19 = smov [#allocation12]  }
   0xd   :  { %74 = dma.hbm_to_vmem [thread:$0]  %s67_s28, 1024, %s69_s2, [#allocation10], %s3365_s17, %s3365_s17, %s3366_s18  }
   0xe   :  { %s81_s21 = sshll.u32 %s3367_s19, 4  ;;  %s3368_s20 = smov 128   ;;  %s82_s21 = int_to_ptr.vmem [resolvable:$true] %s81_s21 }
   0xf   :  { %s3369_s23 = smov 8  }
  0x10   :  { %87 = dma.hbm_to_vmem [thread:$0]  %s80_s15, 512, %s82_s21, [#allocation13], %s3368_s20, %s3368_s20, %s3369_s23  }
  0x11   :  { %3350 = dma.done.wait [#allocation7], 512  }
  0x12   :  { %3351 = vsyncadd [#allocation7], 4294966784 }
  0x13   :  { %3352 = dma.done.wait [#allocation10], 3072  }
  0x14   :  { %3353 = vsyncadd [#allocation10], 4294964224 }
  0x15   :  { %3354 = dma.done.wait [#allocation13], 512  }
  0x16   :  { %3355 = vsyncadd [#allocation13], 4294966784  ;;  %vm116_vm0 = vcmask 261120   ;;  %v3370_v0 = vmov 0.0   ;;  %v143_v1 = vld [vmem:[%s4613_s3 + $0x38] sm:$0xff]  ;;  %v142_v2 = vld [vmem:[%s4613_s3 + $0x30] sm:$0xff] }
  0x17   :  { %117 = vst.msk [vmem:[#allocation3] sm:$0xff] %vm116_vm0, %v3370_v0  ;;  %181 = vmatpush.msra.mxu0 %v143_v1  ;;  %v141_v3 = vld [vmem:[%s4613_s3 + $0x28] sm:$0xff]  ;;  %v3477_v4 = vld [vmem:[#allocation9 + $0x60] sm:$0xff]  ;;  %v140_v6 = vld [vmem:[%s4613_s3 + $0x20] sm:$0xff]  ;;  %vm148_vm1 = vcmask 523264   ;;  %s3371_s26 = smov 96  }
  0x18   :  { %118 = vst.msk [vmem:[#allocation4] sm:$0xff] %vm116_vm0, %v3370_v0  ;;  %v3479_v5 = vld [vmem:[#allocation9 + $0x40] sm:$0xff]  ;;  %414 = vmatpush.msra.mxu3 %v3477_v4  ;;  %v139_v8 = vld [vmem:[%s4613_s3 + $0x18] sm:$0xff]  ;;  %v3499_v11 = vld [vmem:[%s4611_s1] sm:$0xff]   ;;  %s2933_s15 = sshll.u32 %s4624_s14, 4  ;;  %s2934_s15 = int_to_ptr.hbm [resolvable:$true] %s2933_s15 }
  0x19   :  { %182 = vmatpush.msra.mxu0 %v142_v2  ;;  %v3485_v7 = vld [vmem:[#allocation9 + $0x20] sm:$0xff]  ;;  %v229_v14 = vld [vmem:[%s4615_s5 + $0x38] sm:$0xff]  ;;  %v137_v16 = vld [vmem:[%s4613_s3 + $0x8] sm:$0xff]  ;;  %v3061_v19 = vunpack.c.l.bf16 %v3499_v11 }
  0x1a   :  { %v138_v9 = vld [vmem:[%s4613_s3 + $0x10] sm:$0xff]  ;;  %415 = vmatpush.msra.mxu3 %v3479_v5  ;;  %v3508_v15 = vld [vmem:[#allocation9 + $0x68] sm:$0xff]  ;;  %314 = vmatpush.msra.mxu2 %v229_v14  ;;  %v136_v18 = vld [vmem:[%s4613_s3] sm:$0xff] }
  0x1b   :  { %183 = vmatpush.msra.mxu0 %v141_v3  ;;  %v3494_v10 = vld [vmem:[#allocation9] sm:$0xff]  ;;  %v3515_v17 = vld [vmem:[#allocation9 + $0x48] sm:$0xff]  ;;  %v3529_v22 = vld [vmem:[#allocation9 + $0x70] sm:$0xff] }
  0x1c   :  { %v228_v13 = vld [vmem:[%s4615_s5 + $0x30] sm:$0xff]  ;;  %416 = vmatpush.msra.mxu3 %v3485_v7  ;;  %v3522_v20 = vld [vmem:[#allocation9 + $0x28] sm:$0xff]  ;;  %v3533_v23 = vld [vmem:[#allocation9 + $0x50] sm:$0xff] }
  0x1d   :  { %184 = vmatpush.msra.mxu0 %v140_v6  ;;  %273 = vmatpush.msra.mxu1 %v228_v13  ;;  %v3525_v21 = vld [vmem:[#allocation9 + $0x8] sm:$0xff]  ;;  %v3536_v24 = vld [vmem:[#allocation9 + $0x30] sm:$0xff]  ;;  %v227_v27 = vld [vmem:[%s4615_s5 + $0x28] sm:$0xff] }
  0x1e   :  { %v375_v12 = vld [vmem:[#allocation3] sm:$0xff]  ;;  %417 = vmatpush.msra.mxu3 %v3494_v10  ;;  %v3550_v28 = vld [vmem:[#allocation9 + $0x78] sm:$0xff]  ;;  %315 = vmatpush.msra.mxu2 %v227_v27  ;;  %v224_v29 = vld [vmem:[%s4615_s5 + $0x10] sm:$0xff] }
  0x1f   :  { %185 = vmatpush.msra.mxu0 %v139_v8  ;;  %2972 = vmatmul.msk.f32.vlgmr.msra.gmra.mxu3 %vm116_vm0, %v375_v12  ;;  %v3539_v25 = vld [vmem:[#allocation9 + $0x10] sm:$0xff]  ;;  %v225_v30 = vld [vmem:[%s4615_s5 + $0x18] sm:$0xff]  ;;  %v3559_v31 = vld [vmem:[#allocation9 + $0x58] sm:$0xff] }
  0x20   :  { %434 = vmatpush.msrb.mxu3 %v3508_v15  ;;  %v226_v26 = vld [vmem:[%s4615_s5 + $0x20] sm:$0xff]  ;;  %316 = vmatpush.msra.mxu2 %v225_v30  ;;  %v223_v33 = vld [vmem:[%s4615_s5 + $0x8] sm:$0xff]  ;;  %v3573_v36 = vld [vmem:[#allocation6] sm:$0xff]  }
  0x21   :  { %186 = vmatpush.msra.mxu0 %v138_v9  ;;  %274 = vmatpush.msra.mxu1 %v226_v26  ;;  %v222_v32 = vld [vmem:[%s4615_s5] sm:$0xff]  ;;  %v3568_v34 = vld [vmem:[#allocation9 + $0x38] sm:$0xff]  ;;  %v3577_v37 = vunpack.c.l.bf16 %v3573_v36  ;;  %v3604_v44 = vld [vmem:[#allocation12 + $0x8] sm:$0xff] }
  0x22   :  { %435 = vmatpush.msrb.mxu3 %v3515_v17  ;;  %317 = vmatpush.msra.mxu2 %v223_v33  ;;  %v3571_v35 = vld [vmem:[#allocation9 + $0x18] sm:$0xff]  ;;  %v3593_v38 = vld [vmem:[%s4614_s4] ss:$0 sm:$0xff]  ;;  %v3623_v57 = vld [vmem:[#allocation12] sm:$0xff] }
  0x23   :  { %187 = vmatpush.msra.mxu0 %v137_v16  ;;  %275 = vmatpush.msra.mxu1 %v224_v29  ;;  %v3598_v42 = vld [vmem:[#allocation12 + $0x18] sm:$0xff]  ;;  %v3600_v43 = vld [vmem:[#allocation12 + $0x10] sm:$0xff]  ;;  %v3629_v59 = vld [vmem:[#allocation11 + $0x20] sm:$0xff] }
  0x24   :  { %436 = vmatpush.msrb.mxu3 %v3522_v20  ;;  %780 = vmatpush.msrb.mxu2 %v3529_v22  ;;  %v3613_v46 = vld [vmem:[%s4616_s6] sm:$0x3]  ;;  %v3660_v3 = vld [vmem:[#allocation11] sm:$0xff]  ;;  %v3664_v6 = vld [vmem:[#allocation11 + $0x38] sm:$0xff] }
  0x25   :  { %188 = vmatpush.msra.mxu0 %v136_v18  ;;  %276 = vmatpush.msra.mxu1 %v222_v32  ;;  %v3616_v47 = vperm.slane %v3613_v46, 0  ;;  %v3627_v58 = vld [vmem:[#allocation11 + $0x30] sm:$0xff]  ;;  %v3666_v8 = vld [vmem:[#allocation11 + $0x28] sm:$0xff]  ;;  %v3670_v9 = vld [vmem:[#allocation11 + $0x18] sm:$0xff] }
  0x26   :  { %2948 = vmatmul.msk.f32.vlgmr.msra.gmra.mxu0 %vm148_vm1, %v3061_v19  ;;  %437 = vmatpush.msrb.mxu3 %v3525_v21  ;;  %v3642_v60 = vld [vmem:[%s4620_s10] ss:$0 sm:$0xff] }
  0x27   :  { %2973 = vmatmul.msk.f32.vlgmr.msrb.gmra.mxu3 %vm116_vm0, %v375_v12  ;;  %760 = vmatpush.msrb.mxu1 %v3508_v15  ;;  %v3656_v2 = vld [vmem:[#allocation11 + $0x10] sm:$0xff] }
  0x28   :  { %454 = vmatpush.msra.mxu3 %v3529_v22  ;;  %490 = vrot.lane.b32.xlu0 %v3577_v37, %s3360_s22  ;;  %v3685_v16 = vld [vmem:[%s4623_s13] ss:$0 sm:$0xff] }
  0x29   :  { %761 = vmatpush.msrb.mxu1 %v3515_v17  ;;  %781 = vmatpush.msrb.mxu2 %v3533_v23 }
  0x2a   :  { %455 = vmatpush.msra.mxu3 %v3533_v23  ;;  %844 = vmatpush.msrb.mxu0 %v3598_v42 }
  0x2b   :  { %762 = vmatpush.msrb.mxu1 %v3522_v20  ;;  %782 = vmatpush.msrb.mxu2 %v3536_v24 }
  0x2c   :  { %456 = vmatpush.msra.mxu3 %v3536_v24  ;;  %845 = vmatpush.msrb.mxu0 %v3600_v43 }
  0x2d   :  { %763 = vmatpush.msrb.mxu1 %v3525_v21  ;;  %783 = vmatpush.msrb.mxu2 %v3539_v25 }
  0x2e   :  { %457 = vmatpush.msra.mxu3 %v3539_v25  ;;  %846 = vmatpush.msrb.mxu0 %v3604_v44 }
  0x2f   :  { %2974 = vmatmul.msk.f32.vlgmr.msra.gmra.mxu3 %vm116_vm0, %v375_v12 }
  0x30   :  { %474 = vmatpush.msrb.mxu3 %v3550_v28  ;;  %847 = vmatpush.msrb.mxu0 %v3623_v57 }
  0x32   :  { %475 = vmatpush.msrb.mxu3 %v3559_v31  ;;  %1077 = vmatpush.msra.mxu0 %v3508_v15 }
  0x34   :  { %476 = vmatpush.msrb.mxu3 %v3568_v34  ;;  %1078 = vmatpush.msra.mxu0 %v3515_v17 }
  0x36   :  { %477 = vmatpush.msrb.mxu3 %v3571_v35  ;;  %1079 = vmatpush.msra.mxu0 %v3522_v20 }
  0x37   :  { %2975 = vmatmul.msk.f32.vlgmr.msrb.gmra.mxu3 %vm116_vm0, %v375_v12  ;;  %v3674_v12 = vld [vmem:[#allocation11 + $0x8] sm:$0xff] }
  0x38   :  { %518 = vmatpush.msra.mxu3 %v3598_v42  ;;  %1080 = vmatpush.msra.mxu0 %v3525_v21  ;;  %v3699_v21 = vperm.slane %v3613_v46, 1 }
  0x3a   :  { %519 = vmatpush.msra.mxu3 %v3600_v43 }
  0x3c   :  { %520 = vmatpush.msra.mxu3 %v3604_v44 }
  0x3e   :  { %521 = vmatpush.msra.mxu3 %v3623_v57 }
  0x40   :  { %550 = vmatpush.msrb.mxu3 %v3627_v58 }
  0x42   :  { %551 = vmatpush.msrb.mxu3 %v3629_v59 }
  0x44   :  { %552 = vmatpush.msrb.mxu3 %v3656_v2 }
  0x46   :  { %553 = vmatpush.msrb.mxu3 %v3660_v3 }
  0x9a   :  { %v491_v54 = vpop.permute.xlu0 %490 }
  0xa2   :  { %v419_v45 = vpop.f32.mrf.mxu3 }
  0xa3   :  { %v190_v39 = vpop.f32.mrf.mxu0  ;;  %v482_v61 = vadd.f32 %v3642_v60, %v419_v45 }
  0xa4   :  { %v191_v40 = vadd.f32 %v3593_v38, %v190_v39 }
  0xa5   :  { %v3645_v62 = vmax.f32 %v482_v61, 0.0 }
  0xa6   :  { %v214_v41 = vmax.f32 %v191_v40, 0.0  ;;  %v376_v40 = vld [vmem:[#allocation4] sm:$0xff] }
  0xa8   :  { %2956 = vmatmul.msk.f32.vlgmr.msra.gmra.mxu1 %vm116_vm0, %v214_v41  ;;  %2964 = vmatmul.msk.f32.vlgmr.msra.gmra.mxu2 %vm116_vm0, %v214_v41 }
  0xa9   :  { %876 = vmatpush.msra.mxu1 %v3627_v58  ;;  %896 = vmatpush.msra.mxu2 %v3664_v6 }
  0xaa   :  { %v439_v50 = vpop.f32.mrf.mxu3 }
  0xab   :  { %877 = vmatpush.msra.mxu1 %v3629_v59  ;;  %897 = vmatpush.msra.mxu2 %v3666_v8 }
  0xad   :  { %878 = vmatpush.msra.mxu1 %v3656_v2  ;;  %898 = vmatpush.msra.mxu2 %v3670_v9 }
  0xaf   :  { %879 = vmatpush.msra.mxu1 %v3660_v3  ;;  %899 = vmatpush.msra.mxu2 %v3674_v12 }
  0xb2   :  { %v3680_v13 = vpop.f32.mrf.mxu3 }
  0xba   :  { %v479_v14 = vpop.f32.mrf.mxu3 }
 0x125   :  { %v278_v48 = vpop.f32.mrf.mxu1 }
 0x126   :  { %v279_v49 = vadd.f32 %v278_v48, %v3616_v47 }
 0x128   :  { %v484_v51 = vadd.f32 %v439_v50, %v279_v49 }
 0x12a   :  { %v3619_v52 = vmax.f32 %v484_v51, 0.0 }
 0x12b   :  { %v319_v26 = vpop.f32.mrf.mxu2 }
 0x12c   :  { %v487_v53 = vmul.f32 1.442695, %v3619_v52  ;;  %v3649_v63 = vadd.f32 %v3619_v52, %v3645_v62  ;;  %v320_v29 = vadd.f32 %v319_v26, %v3699_v21 }
 0x12e   :  { %3098 = vpow2.f32 %v487_v53  ;;  %v582_v30 = vadd.f32 %v479_v14, %v320_v29 }
 0x134   :  { %v3099_v55 = vpop.eup %3098 }
 0x135   :  { %v493_v56 = vmul.f32 %v3099_v55, %v491_v54 }
 0x137   :  { %495 = vrot.lane.b32.xlu0 %v493_v56, %s3371_s26 }
 0x1a9   :  { %v496_v0 = vpop.permute.xlu0 %495 }
 0x1aa   :  { %v3652_v1 = vadd.f32 %v496_v0, %v3649_v63 }
 0x1ac   :  { %2976 = vmatmul.msk.f32.vlgmr.msra.gmra.mxu3 %vm116_vm0, %v3652_v1 }
 0x1ad   :  { %570 = vmatpush.msra.mxu3 %v3664_v6 }
 0x1af   :  { %571 = vmatpush.msra.mxu3 %v3666_v8 }
 0x1b1   :  { %572 = vmatpush.msra.mxu3 %v3670_v9 }
 0x1b3   :  { %573 = vmatpush.msra.mxu3 %v3674_v12 }
 0x22f   :  { %v523_v18 = vpop.f32.mrf.mxu3 }
 0x230   :  { %v524_v19 = vadd.f32 %v3685_v16, %v523_v18 }
 0x232   :  { %v526_v20 = vmax.f32 %v524_v19, 0.0  ;;  %v3062_v19 = vunpack.c.h.bf16 %v3499_v11 }
 0x234   :  { %2977 = vmatmul.msk.f32.vlgmr.msrb.gmra.mxu3 %vm116_vm0, %v526_v20  ;;  %2949 = vmatmul.msk.f32.gmra.mxu0 %vm148_vm1, %v3062_v19 }
 0x235   :  { %740 = vmatpush.msrb.mxu3 %v3477_v4 }
 0x237   :  { %741 = vmatpush.msrb.mxu3 %v3479_v5 }
 0x239   :  { %742 = vmatpush.msrb.mxu3 %v3485_v7 }
 0x23b   :  { %743 = vmatpush.msrb.mxu3 %v3494_v10 }
 0x23c   :  { %2978 = vmatmul.msk.f32.vlgmr.msra.gmra.mxu3 %vm116_vm0, %v526_v20  ;;  %v3075_v20 = vld [vmem:[%s4611_s1 + $0x8] sm:$0xff]  }
 0x23d   :  { %800 = vmatpush.msra.mxu3 %v3550_v28  ;;  %v3065_v26 = vunpack.c.l.bf16 %v3075_v20  ;;  %v3066_v29 = vunpack.c.h.bf16 %v3075_v20 }
 0x23f   :  { %801 = vmatpush.msra.mxu3 %v3559_v31  ;;  %2950 = vmatmul.msk.f32.gmra.mxu0 %vm148_vm1, %v3065_v26 }
 0x241   :  { %802 = vmatpush.msra.mxu3 %v3568_v34 }
 0x243   :  { %803 = vmatpush.msra.mxu3 %v3571_v35 }
 0x247   :  { %2951 = vmatmul.msk.f32.gmra.mxu0 %vm148_vm1, %v3066_v29 }
 0x2b7   :  { %v3701_v27 = vpop.f32.mrf.mxu3 }
 0x2bf   :  { %v575_v32 = vpop.f32.mrf.mxu3 }
 0x2c0   :  { %v583_v33 = vadd.f32 %v582_v30, %v575_v32  ;;  %v3076_v32 = vld [vmem:[%s4611_s1 + $0x10] sm:$0xff]  }
 0x2c1   :  { %v3069_v11 = vunpack.c.l.bf16 %v3076_v32 }
 0x2c2   :  { %3100 = vtanh.f32 %v583_v33  ;;  %v2979_v41 = vmul.f32 -1.442695, %v583_v33 }
 0x2c3   :  { %2952 = vmatmul.msk.f32.gmra.mxu0 %vm148_vm1, %v3069_v11 }
 0x2c4   :  { %3102 = vpow2.f32 %v2979_v41  ;;  %v3070_v41 = vunpack.c.h.bf16 %v3076_v32 }
 0x2c8   :  { %v3101_v39 = vpop.eup %3100 }
 0x2c9   :  { %610 = vrot.lane.b32.xlu1 %v3101_v39, %s3362_s25 }
 0x2ca   :  { %v3103_v45 = vpop.eup %3102 }
 0x2cb   :  { %v587_v46 = vadd.f32 1.0, %v3103_v45  ;;  %2953 = vmatmul.msk.f32.gmra.mxu0 %vm148_vm1, %v3070_v41 }
 0x2cd   :  { %3104 = vrcp.f32 %v587_v46  ;;  %v599_v54 = vand.u32 2147483648, %v587_v46  ;;  %vm593_vm3 = vweird.f32 %v587_v46  ;;  %v597_v55 = vand.u32 2147483647, %v587_v46 }
 0x2cf   :  { %v600_v61 = vor.u32 1.1754944e-38, %v599_v54  ;;  %vm598_vm5 = vcmp.eq.f32.partialorder %v597_v55, 8.507059e+37 }
 0x2d1   :  { %605 = vrot.lane.b32.xlu1 %v376_v40, %s3360_s22 }
 0x2d3   :  { %v3105_v48 = vpop.eup %3104 }
 0x2d4   :  { %v589_v49 = vmul.f32 %v3105_v48, %v587_v46  ;;  %vm594_vm2 = vweird.f32 %v3105_v48  ;;  %v3077_v46 = vld [vmem:[%s4611_s1 + $0x18] sm:$0xff]  }
 0x2d5   :  { %vm595_vm4 = vmor %vm593_vm3, %vm594_vm2 }
 0x2d6   :  { %v590_v50 = vsub.f32 1.0, %v589_v49  ;;  %v3074_v49 = vunpack.c.h.bf16 %v3077_v46 }
 0x2d8   :  { %v591_v51 = vmul.f32 %v3105_v48, %v590_v50 }
 0x2da   :  { %v592_v53 = vadd.f32 %v3105_v48, %v591_v51 }
 0x2dc   :  { %v596_v56 = vsel %vm595_vm4, %v3105_v48, %v592_v53  ;;  %v3073_v48 = vunpack.c.l.bf16 %v3077_v46  ;;  %v193_v53 = vpop.f32.mrf.mxu0 }
 0x2dd   :  { %v601_v14 = vsel %vm598_vm5, %v600_v61, %v596_v56  ;;  %v194_v54 = vadd.f32 %v3593_v38, %v193_v53 }
 0x2de   :  { %2954 = vmatmul.msk.f32.gmra.mxu0 %vm148_vm1, %v3073_v48 }
 0x2df   :  { %v215_v55 = vmax.f32 %v194_v54, 0.0 }
 0x2e1   :  { %2957 = vmatmul.msk.f32.gmra.mxu1 %vm116_vm0, %v215_v55  ;;  %2965 = vmatmul.msk.f32.gmra.mxu2 %vm116_vm0, %v215_v55 }
 0x2e4   :  { %v196_v56 = vpop.f32.mrf.mxu0 }
 0x2e5   :  { %v197_v61 = vadd.f32 %v3593_v38, %v196_v56 }
 0x2e6   :  { %2955 = vmatmul.msk.f32.gmra.mxu0 %vm148_vm1, %v3074_v49  ;;  %v3751_v49 = vunpack.c.h.bf16 %v3573_v36 }
 0x2e8   :  { %816 = vrot.lane.b32.xlu1 %v3751_v49, %s3360_s22 }
 0x33b   :  { %v611_v0 = vpop.permute.xlu1 %610 }
 0x33c   :  { %v613_v18 = vmul.f32 %v611_v0, %v601_v14  ;;  %v216_v0 = vmax.f32 %v197_v61, 0.0 }
 0x33e   :  { %615 = vrot.lane.b32.xlu2 %v613_v18, %s3360_s22  ;;  %2958 = vmatmul.msk.f32.gmra.mxu1 %vm116_vm0, %v216_v0  ;;  %v199_v18 = vpop.f32.mrf.mxu0 }
 0x33f   :  { %2966 = vmatmul.msk.f32.gmra.mxu2 %vm116_vm0, %v216_v0 }
 0x343   :  { %v606_v30 = vpop.permute.xlu1 %605 }
 0x344   :  { %v608_v33 = vmul.f32 %v606_v30, %v601_v14 }
 0x346   :  { %v202_v20 = vpop.f32.mrf.mxu0 }
 0x347   :  { %v203_v26 = vadd.f32 %v3593_v38, %v202_v20 }
 0x349   :  { %v218_v29 = vmax.f32 %v203_v26, 0.0 }
 0x34e   :  { %v205_v30 = vpop.f32.mrf.mxu0 }
 0x34f   :  { %v206_v32 = vadd.f32 %v3593_v38, %v205_v30 }
 0x35a   :  { %v817_v0 = vpop.permute.xlu1 %816 }
 0x398   :  { %v616_v39 = vpop.permute.xlu2 %615 }
 0x399   :  { %v3717_v40 = vadd.f32 %v616_v39, %v608_v33  ;;  %v219_v33 = vmax.f32 %v206_v32, 0.0  ;;  %v208_v39 = vpop.f32.mrf.mxu0 }
 0x39a   :  { %v209_v11 = vadd.f32 %v3593_v38, %v208_v39 }
 0x39b   :  { %3106 = vtanh.f32 %v3717_v40 }
 0x39c   :  { %v220_v41 = vmax.f32 %v209_v11, 0.0 }
 0x3a1   :  { %v3107_v45 = vpop.eup %3106 }
 0x3a2   :  { %621 = vrot.lane.b32.xlu2 %v3107_v45, %s3362_s25  ;;  %v211_v45 = vpop.f32.mrf.mxu0 }
 0x3a3   :  { %v212_v46 = vadd.f32 %v3593_v38, %v211_v45 }
 0x3a5   :  { %v221_v48 = vmax.f32 %v212_v46, 0.0 }
 0x3fc   :  { %v622_v50 = vpop.permute.xlu2 %621 }
 0x3fd   :  { %v624_v51 = vmul.f32 %v622_v50, %v601_v14  ;;  %v200_v14 = vadd.f32 %v3593_v38, %v199_v18 }
 0x3ff   :  { %724 = vrot.lane.b32.xlu0 %v624_v51, %s3360_s22  ;;  %v217_v19 = vmax.f32 %v200_v14, 0.0 }
 0x401   :  { %2959 = vmatmul.msk.f32.gmra.mxu1 %vm116_vm0, %v217_v19  ;;  %2967 = vmatmul.msk.f32.gmra.mxu2 %vm116_vm0, %v217_v19 }
 0x409   :  { %2960 = vmatmul.msk.f32.gmra.mxu1 %vm116_vm0, %v218_v29  ;;  %2968 = vmatmul.msk.f32.gmra.mxu2 %vm116_vm0, %v218_v29 }
 0x411   :  { %2961 = vmatmul.msk.f32.gmra.mxu1 %vm116_vm0, %v219_v33  ;;  %2969 = vmatmul.msk.f32.gmra.mxu2 %vm116_vm0, %v219_v33 }
 0x419   :  { %2962 = vmatmul.msk.f32.gmra.mxu1 %vm116_vm0, %v220_v41  ;;  %2970 = vmatmul.msk.f32.gmra.mxu2 %vm116_vm0, %v220_v41  ;;  %v322_v41 = vpop.f32.mrf.mxu2 }
 0x421   :  { %2963 = vmatmul.msk.f32.gmra.mxu1 %vm116_vm0, %v221_v48  ;;  %2971 = vmatmul.msk.f32.gmra.mxu2 %vm116_vm0, %v221_v48  ;;  %v3815_v45 = vpop.f32.mrf.mxu2 }
 0x471   :  { %v725_v50 = vpop.permute.xlu0 %724 }
 0x472   :  { %2983 = vmatmul.msk.f32.vlgmr.msrb.gmra.mxu3 %vm116_vm0, %v725_v50  ;;  %2984 = vmatmul.msk.f32.vlgmr.msrb.gmra.mxu1 %vm116_vm0, %v725_v50 }
 0x473   :  { %2985 = vmatmul.msk.f32.vlgmr.msrb.gmra.mxu2 %vm116_vm0, %v725_v50  ;;  %1057 = vmatpush.msrb.mxu3 %v3477_v4  ;;  %v281_v4 = vpop.f32.mrf.mxu1 }
 0x474   :  { %1097 = vmatpush.msrb.mxu1 %v3529_v22  ;;  %1117 = vmatpush.msrb.mxu2 %v3550_v28  ;;  %v282_v53 = vadd.f32 %v281_v4, %v3616_v47 }
 0x475   :  { %1058 = vmatpush.msrb.mxu3 %v3479_v5 }
 0x476   :  { %1098 = vmatpush.msrb.mxu1 %v3533_v23  ;;  %1118 = vmatpush.msrb.mxu2 %v3559_v31 }
 0x477   :  { %1059 = vmatpush.msrb.mxu3 %v3485_v7 }
 0x478   :  { %1099 = vmatpush.msrb.mxu1 %v3536_v24  ;;  %1119 = vmatpush.msrb.mxu2 %v3568_v34 }
 0x479   :  { %1060 = vmatpush.msrb.mxu3 %v3494_v10 }
 0x47a   :  { %2986 = vmatmul.msk.f32.vlgmr.msra.gmra.mxu3 %vm116_vm0, %v725_v50  ;;  %1100 = vmatpush.msrb.mxu1 %v3539_v25 }
 0x47b   :  { %1120 = vmatpush.msrb.mxu2 %v3571_v35  ;;  %1161 = vmatpush.msra.mxu3 %v3598_v42  ;;  %v3775_v5 = vpop.f32.mrf.mxu1 }
 0x47d   :  { %1162 = vmatpush.msra.mxu3 %v3600_v43 }
 0x47f   :  { %1163 = vmatpush.msra.mxu3 %v3604_v44 }
 0x481   :  { %1164 = vmatpush.msra.mxu3 %v3623_v57 }
 0x483   :  { %v3777_v7 = vpop.f32.mrf.mxu1 }
 0x484   :  { %v3817_v46 = vpop.f32.mrf.mxu2 }
 0x48b   :  { %v3779_v10 = vpop.f32.mrf.mxu1 }
 0x48c   :  { %v3819_v48 = vpop.f32.mrf.mxu2 }
 0x493   :  { %v3781_v36 = vpop.f32.mrf.mxu1 }
 0x494   :  { %v3821_v50 = vpop.f32.mrf.mxu2 }
 0x49b   :  { %v3783_v38 = vpop.f32.mrf.mxu1 }
 0x49c   :  { %v3823_v4 = vpop.f32.mrf.mxu2 }
 0x4a3   :  { %v3785_v51 = vpop.f32.mrf.mxu1 }
 0x4a4   :  { %4642 = vst [vmem:[#allocation19_spill] sm:$0xff] %v3785_v51 }
 0x4ef   :  { %v765_v54 = vpop.f32.mrf.mxu1 }
 0x4f0   :  { %v810_v55 = vadd.f32 %v765_v54, %v282_v53  ;;  %v3825_v53 = vpop.f32.mrf.mxu2 }
 0x4f1   :  { %4645 = vst [vmem:[#allocation22_spill] sm:$0xff] %v3825_v53 }
 0x4f2   :  { %v3788_v56 = vmax.f32 %v810_v55, 0.0 }
 0x4f4   :  { %v813_v61 = vmul.f32 1.442695, %v3788_v56 }
 0x4f5   :  { %v745_v19 = vpop.f32.mrf.mxu3 }
 0x4f6   :  { %3108 = vpow2.f32 %v813_v61  ;;  %v808_v20 = vadd.f32 %v3642_v60, %v745_v19  ;;  %v323_v61 = vadd.f32 %v322_v41, %v3699_v21 }
 0x4f8   :  { %v3793_v26 = vmax.f32 %v808_v20, 0.0  ;;  %v3827_v54 = vpop.f32.mrf.mxu2 }
 0x4fa   :  { %v3797_v29 = vadd.f32 %v3788_v56, %v3793_v26 }
 0x4fc   :  { %v3109_v18 = vpop.eup %3108  ;;  %4643 = vst [vmem:[#allocation20_spill] sm:$0xff] %v3797_v29 }
 0x4fd   :  { %v819_v14 = vmul.f32 %v3109_v18, %v817_v0  ;;  %v805_v55 = vpop.f32.mrf.mxu3 }
 0x4fe   :  { %v908_v0 = vadd.f32 %v805_v55, %v323_v61 }
 0x4ff   :  { %821 = vrot.lane.b32.xlu2 %v819_v14, %s3371_s26 }
 0x559   :  { %v822_v30 = vpop.permute.xlu2 %821 }
 0x55a   :  { %v3800_v32 = vadd.f32 %v822_v30, %v3797_v29 }
 0x55c   :  { %4644 = vst [vmem:[#allocation21_spill] sm:$0xff] %v3800_v32  ;;  %2987 = vmatmul.msk.f32.vlgmr.msrb.gmra.mxu0 %vm116_vm0, %v3800_v32 }
 0x55d   :  { %1193 = vmatpush.msrb.mxu0 %v3627_v58 }
 0x55f   :  { %1194 = vmatpush.msrb.mxu0 %v3629_v59 }
 0x561   :  { %1195 = vmatpush.msrb.mxu0 %v3656_v2 }
 0x563   :  { %1196 = vmatpush.msrb.mxu0 %v3660_v3 }
 0x5d9   :  { %v849_v33 = vpop.f32.mrf.mxu0 }
 0x5da   :  { %v850_v39 = vadd.f32 %v3685_v16, %v849_v33 }
 0x5dc   :  { %v852_v11 = vmax.f32 %v850_v39, 0.0 }
 0x5de   :  { %2988 = vmatmul.msk.f32.vlgmr.msra.gmra.mxu1 %vm116_vm0, %v852_v11  ;;  %2989 = vmatmul.msk.f32.vlgmr.msra.gmra.mxu2 %vm116_vm0, %v852_v11 }
 0x5df   :  { %1213 = vmatpush.msra.mxu1 %v3664_v6 }
 0x5e1   :  { %1214 = vmatpush.msra.mxu1 %v3666_v8 }
 0x5e3   :  { %1215 = vmatpush.msra.mxu1 %v3670_v9 }
 0x5e5   :  { %1216 = vmatpush.msra.mxu1 %v3674_v12 }
 0x661   :  { %v901_v18 = vpop.f32.mrf.mxu2 }
 0x662   :  { %v909_v14 = vadd.f32 %v908_v0, %v901_v18 }
 0x664   :  { %3110 = vtanh.f32 %v909_v14  ;;  %v2990_v20 = vmul.f32 -1.442695, %v909_v14 }
 0x666   :  { %3112 = vpow2.f32 %v2990_v20 }
 0x66a   :  { %v3111_v19 = vpop.eup %3110 }
 0x66b   :  { %932 = vrot.lane.b32.xlu0 %v3111_v19, %s3362_s25 }
 0x66c   :  { %v3113_v30 = vpop.eup %3112 }
 0x66d   :  { %v913_v33 = vadd.f32 1.0, %v3113_v30 }
 0x66f   :  { %3114 = vrcp.f32 %v913_v33  ;;  %v925_v32 = vand.u32 2147483648, %v913_v33  ;;  %vm919_vm7 = vweird.f32 %v913_v33  ;;  %v923_v41 = vand.u32 2147483647, %v913_v33 }
 0x671   :  { %v926_v61 = vor.u32 1.1754944e-38, %v925_v32  ;;  %vm924_vm9 = vcmp.eq.f32.partialorder %v923_v41, 8.507059e+37 }
 0x675   :  { %v3115_v39 = vpop.eup %3114 }
 0x676   :  { %v915_v11 = vmul.f32 %v3115_v39, %v913_v33  ;;  %vm920_vm6 = vweird.f32 %v3115_v39 }
 0x677   :  { %vm921_vm8 = vmor %vm919_vm7, %vm920_vm6 }
 0x678   :  { %v916_v53 = vsub.f32 1.0, %v915_v11 }
 0x67a   :  { %v917_v51 = vmul.f32 %v3115_v39, %v916_v53 }
 0x67c   :  { %v918_v29 = vadd.f32 %v3115_v39, %v917_v51 }
 0x67e   :  { %v922_v55 = vsel %vm921_vm8, %v3115_v39, %v918_v29  ;;  %v3838_v29 = vld [vmem:[#allocation6 + $0x8] sm:$0xff]  }
 0x67f   :  { %v927_v18 = vsel %vm924_vm9, %v926_v61, %v922_v55  ;;  %v3841_v32 = vunpack.c.l.bf16 %v3838_v29 }
 0x680   :  { %v930_v19 = vmul.f32 %v927_v18, %v3717_v40 }
 0x681   :  { %4646 = vst [vmem:[#allocation23_spill] sm:$0xff] %v3841_v32 }
 0x6dd   :  { %v933_v0 = vpop.permute.xlu0 %932 }
 0x6de   :  { %v935_v14 = vmul.f32 %v933_v0, %v927_v18 }
 0x6e0   :  { %937 = vrot.lane.b32.xlu1 %v935_v14, %s3360_s22 }
 0x6e8   :  { %1133 = vrot.lane.b32.xlu1 %v3841_v32, %s3360_s22 }
 0x752   :  { %v938_v20 = vpop.permute.xlu1 %937 }
 0x753   :  { %v3833_v30 = vadd.f32 %v938_v20, %v930_v19  ;;  %v326_v20 = vadd.f32 %v3815_v45, %v3699_v21 }
 0x755   :  { %3116 = vtanh.f32 %v3833_v30 }
 0x75b   :  { %v3117_v51 = vpop.eup %3116 }
 0x75c   :  { %943 = vrot.lane.b32.xlu2 %v3117_v51, %s3362_s25 }
 0x7b6   :  { %v944_v53 = vpop.permute.xlu2 %943 }
 0x7b7   :  { %v946_v33 = vmul.f32 %v944_v53, %v927_v18  ;;  %v3884_v18 = vpop.f32.mrf.mxu1 }
 0x7b9   :  { %1041 = vrot.lane.b32.xlu0 %v946_v33, %s3360_s22 }
 0x82b   :  { %v1042_v40 = vpop.permute.xlu0 %1041 }
 0x82c   :  { %2994 = vmatmul.msk.f32.vlgmr.msrb.gmra.mxu3 %vm116_vm0, %v1042_v40  ;;  %2995 = vmatmul.msk.f32.vlgmr.msra.gmra.mxu0 %vm116_vm0, %v1042_v40 }
 0x82d   :  { %2996 = vmatmul.msk.f32.vlgmr.msrb.gmra.mxu1 %vm116_vm0, %v1042_v40  ;;  %2997 = vmatmul.msk.f32.vlgmr.msrb.gmra.mxu2 %vm116_vm0, %v1042_v40 }
 0x82e   :  { %1394 = vmatpush.msrb.mxu3 %v3508_v15  ;;  %1414 = vmatpush.msra.mxu0 %v3529_v22  ;;  %v285_v15 = vadd.f32 %v3775_v5, %v3616_v47 }
 0x82f   :  { %1434 = vmatpush.msrb.mxu1 %v3550_v28 }
 0x830   :  { %1395 = vmatpush.msrb.mxu3 %v3515_v17  ;;  %1415 = vmatpush.msra.mxu0 %v3533_v23  ;;  %v1134_v23 = vpop.permute.xlu1 %1133 }
 0x831   :  { %1435 = vmatpush.msrb.mxu1 %v3559_v31 }
 0x832   :  { %1416 = vmatpush.msra.mxu0 %v3536_v24 }
 0x833   :  { %1436 = vmatpush.msrb.mxu1 %v3568_v34 }
 0x834   :  { %1417 = vmatpush.msra.mxu0 %v3539_v25 }
 0x835   :  { %1437 = vmatpush.msrb.mxu1 %v3571_v35 }
 0x8a9   :  { %v1082_v22 = vpop.f32.mrf.mxu0 }
 0x8aa   :  { %v1127_v39 = vadd.f32 %v1082_v22, %v285_v15  ;;  %v3886_v14 = vpop.f32.mrf.mxu1 }
 0x8ac   :  { %v3861_v28 = vmax.f32 %v1127_v39, 0.0 }
 0x8ae   :  { %v1130_v17 = vmul.f32 1.442695, %v3861_v28 }
 0x8af   :  { %v1062_v24 = vpop.f32.mrf.mxu3 }
 0x8b0   :  { %3118 = vpow2.f32 %v1130_v17  ;;  %v1125_v25 = vadd.f32 %v3642_v60, %v1062_v24  ;;  %v1122_v19 = vpop.f32.mrf.mxu2 }
 0x8b1   :  { %v1225_v51 = vadd.f32 %v1122_v19, %v326_v20  ;;  %v3897_v20 = vld [vmem:[#allocation9 + $0x60] sm:$0xff] }
 0x8b2   :  { %v3866_v34 = vmax.f32 %v1125_v25, 0.0  ;;  %1374 = vmatpush.msra.mxu2 %v3897_v20 }
 0x8b4   :  { %v3870_v35 = vadd.f32 %v3861_v28, %v3866_v34 }
 0x8b6   :  { %v3119_v31 = vpop.eup %3118  ;;  %4647 = vst [vmem:[#allocation24_spill] sm:$0xff] %v3870_v35 }
 0x8b7   :  { %v1136_v11 = vmul.f32 %v3119_v31, %v1134_v23 }
 0x8b9   :  { %1138 = vrot.lane.b32.xlu2 %v1136_v11, %s3371_s26 }
 0x913   :  { %v1139_v5 = vpop.permute.xlu2 %1138 }
 0x914   :  { %v3873_v41 = vadd.f32 %v1139_v5, %v3870_v35 }
 0x916   :  { %4648 = vst [vmem:[#allocation25_spill] sm:$0xff] %v3873_v41  ;;  %2998 = vmatmul.msk.f32.vlgmr.msra.gmra.mxu3 %vm116_vm0, %v3873_v41 }
 0x999   :  { %v1166_v55 = vpop.f32.mrf.mxu3 }
 0x99a   :  { %v1167_v61 = vadd.f32 %v3685_v16, %v1166_v55 }
 0x99c   :  { %v1169_v0 = vmax.f32 %v1167_v61, 0.0 }
 0x99e   :  { %2999 = vmatmul.msk.f32.vlgmr.msrb.gmra.mxu0 %vm116_vm0, %v1169_v0  ;;  %3000 = vmatmul.msk.f32.vlgmr.msra.gmra.mxu1 %vm116_vm0, %v1169_v0 }
 0x99f   :  { %1530 = vmatpush.msrb.mxu0 %v3664_v6  ;;  %1691 = vmatpush.msra.mxu1 %v3897_v20 }
 0x9a1   :  { %1531 = vmatpush.msrb.mxu0 %v3666_v8 }
 0x9a3   :  { %1532 = vmatpush.msrb.mxu0 %v3670_v9 }
 0x9a5   :  { %1533 = vmatpush.msrb.mxu0 %v3674_v12 }
 0xa1b   :  { %v1218_v53 = vpop.f32.mrf.mxu1 }
 0xa1c   :  { %v1226_v33 = vadd.f32 %v1225_v51, %v1218_v53  ;;  %v3899_v51 = vld [vmem:[#allocation9 + $0x40] sm:$0xff]  ;;  %v3901_v53 = vld [vmem:[#allocation9 + $0x28] sm:$0xff] }
 0xa1d   :  { %1396 = vmatpush.msrb.mxu3 %v3901_v53  ;;  %1375 = vmatpush.msra.mxu2 %v3899_v51 }
 0xa1e   :  { %3120 = vtanh.f32 %v1226_v33  ;;  %v3001_v6 = vmul.f32 -1.442695, %v1226_v33  ;;  %v3905_v33 = vld [vmem:[#allocation9 + $0x8] sm:$0xff]  ;;  %1692 = vmatpush.msra.mxu1 %v3899_v51 }
 0xa1f   :  { %1397 = vmatpush.msrb.mxu3 %v3905_v33 }
 0xa20   :  { %3122 = vpow2.f32 %v3001_v6  ;;  %v3929_v6 = vunpack.c.h.bf16 %v3838_v29 }
 0xa21   :  { %1510 = vmatpush.msra.mxu3 %v3627_v58 }
 0xa22   :  { %4649 = vst [vmem:[#allocation26_spill] sm:$0xff] %v3929_v6 }
 0xa23   :  { %1511 = vmatpush.msra.mxu3 %v3629_v59 }
 0xa24   :  { %v3121_v40 = vpop.eup %3120 }
 0xa25   :  { %1249 = vrot.lane.b32.xlu0 %v3121_v40, %s3362_s25  ;;  %v3912_v40 = vld [vmem:[#allocation9] sm:$0xff]  ;;  %1512 = vmatpush.msra.mxu3 %v3656_v2 }
 0xa26   :  { %v3123_v8 = vpop.eup %3122 }
 0xa27   :  { %v1230_v9 = vadd.f32 1.0, %v3123_v8  ;;  %1513 = vmatpush.msra.mxu3 %v3660_v3 }
 0xa29   :  { %3124 = vrcp.f32 %v1230_v9  ;;  %v1242_v23 = vand.u32 2147483648, %v1230_v9  ;;  %vm1236_vm11 = vweird.f32 %v1230_v9  ;;  %v1240_v45 = vand.u32 2147483647, %v1230_v9 }
 0xa2b   :  { %v1243_v11 = vor.u32 1.1754944e-38, %v1242_v23  ;;  %vm1241_vm13 = vcmp.eq.f32.partialorder %v1240_v45, 8.507059e+37 }
 0xa2f   :  { %v3125_v12 = vpop.eup %3124 }
 0xa30   :  { %v1232_v15 = vmul.f32 %v3125_v12, %v1230_v9  ;;  %vm1237_vm10 = vweird.f32 %v3125_v12 }
 0xa31   :  { %vm1238_vm12 = vmor %vm1236_vm11, %vm1237_vm10 }
 0xa32   :  { %v1233_v22 = vsub.f32 1.0, %v1232_v15 }
 0xa34   :  { %v1234_v39 = vmul.f32 %v3125_v12, %v1233_v22 }
 0xa36   :  { %v1235_v17 = vadd.f32 %v3125_v12, %v1234_v39 }
 0xa38   :  { %v1239_v31 = vsel %vm1238_vm12, %v3125_v12, %v1235_v17 }
 0xa39   :  { %v1244_v25 = vsel %vm1241_vm13, %v1243_v11, %v1239_v31  ;;  %v3958_v11 = vpop.f32.mrf.mxu0 }
 0xa3a   :  { %v1247_v55 = vmul.f32 %v1244_v25, %v3833_v30  ;;  %v3907_v30 = vld [vmem:[#allocation9 + $0x20] sm:$0xff] }
 0xa3b   :  { %1376 = vmatpush.msra.mxu2 %v3907_v30  ;;  %1693 = vmatpush.msra.mxu1 %v3907_v30 }
 0xa3d   :  { %1377 = vmatpush.msra.mxu2 %v3912_v40  ;;  %1694 = vmatpush.msra.mxu1 %v3912_v40 }
 0xa3f   :  { %1478 = vmatpush.msrb.mxu2 %v3598_v42 }
 0xa41   :  { %1479 = vmatpush.msrb.mxu2 %v3600_v43  ;;  %v288_v43 = vadd.f32 %v3777_v7, %v3616_v47 }
 0xa43   :  { %1480 = vmatpush.msrb.mxu2 %v3604_v44 }
 0xa45   :  { %1481 = vmatpush.msrb.mxu2 %v3623_v57 }
 0xa97   :  { %v1250_v24 = vpop.permute.xlu0 %1249 }
 0xa98   :  { %v1252_v5 = vmul.f32 %v1250_v24, %v1244_v25 }
 0xa9a   :  { %1254 = vrot.lane.b32.xlu1 %v1252_v5, %s3360_s22  ;;  %v329_v5 = vadd.f32 %v3817_v46, %v3699_v21 }
 0xaa2   :  { %1450 = vrot.lane.b32.xlu1 %v3929_v6, %s3360_s22 }
 0xb0c   :  { %v1255_v61 = vpop.permute.xlu1 %1254 }
 0xb0d   :  { %v3893_v0 = vadd.f32 %v1255_v61, %v1247_v55 }
 0xb0f   :  { %3126 = vtanh.f32 %v3893_v0 }
 0xb14   :  { %v1451_v29 = vpop.permute.xlu1 %1450 }
 0xb15   :  { %v3127_v19 = vpop.eup %3126 }
 0xb16   :  { %1260 = vrot.lane.b32.xlu2 %v3127_v19, %s3362_s25 }
 0xb70   :  { %v1261_v58 = vpop.permute.xlu2 %1260 }
 0xb71   :  { %v1263_v59 = vmul.f32 %v1261_v58, %v1244_v25 }
 0xb73   :  { %1358 = vrot.lane.b32.xlu0 %v1263_v59, %s3360_s22 }
 0xbe5   :  { %v1359_v42 = vpop.permute.xlu0 %1358 }
 0xbe6   :  { %3005 = vmatmul.msk.f32.vlgmr.msra.gmra.mxu2 %vm116_vm0, %v1359_v42  ;;  %3006 = vmatmul.msk.f32.vlgmr.msrb.gmra.mxu3 %vm116_vm0, %v1359_v42 }
 0xbe7   :  { %3007 = vmatmul.msk.f32.vlgmr.msra.gmra.mxu0 %vm116_vm0, %v1359_v42  ;;  %3008 = vmatmul.msk.f32.vlgmr.msrb.gmra.mxu1 %vm116_vm0, %v1359_v42 }
 0xc64   :  { %v3960_v24 = vpop.f32.mrf.mxu0  ;;  %v1439_v25 = vpop.f32.mrf.mxu1 }
 0xc65   :  { %4654 = vst [vmem:[#allocation31_spill] sm:$0xff] %v3960_v24  ;;  %v1542_v55 = vadd.f32 %v1439_v25, %v329_v5 }
 0xc69   :  { %v1399_v44 = vpop.f32.mrf.mxu3  ;;  %v1379_v12 = vpop.f32.mrf.mxu2 }
 0xc6a   :  { %v1444_v57 = vadd.f32 %v1399_v44, %v288_v43  ;;  %v1442_v15 = vadd.f32 %v3642_v60, %v1379_v12 }
 0xc6c   :  { %v3939_v2 = vmax.f32 %v1444_v57, 0.0  ;;  %v3944_v22 = vmax.f32 %v1442_v15, 0.0 }
 0xc6e   :  { %4650 = vst [vmem:[#allocation27_spill] sm:$0xff] %v3939_v2  ;;  %v1447_v3 = vmul.f32 1.442695, %v3939_v2  ;;  %v3948_v7 = vadd.f32 %v3939_v2, %v3944_v22  ;;  %v4067_v2 = vld [vmem:[#allocation11 + $0x20] sm:$0xff] }
 0xc6f   :  { %4651 = vst [vmem:[#allocation28_spill] sm:$0xff] %v3944_v22 }
 0xc70   :  { %3128 = vpow2.f32 %v1447_v3  ;;  %4652 = vst [vmem:[#allocation29_spill] sm:$0xff] %v3948_v7 }
 0xc76   :  { %v3129_v8 = vpop.eup %3128 }
 0xc77   :  { %v1453_v9 = vmul.f32 %v3129_v8, %v1451_v29 }
 0xc79   :  { %1455 = vrot.lane.b32.xlu2 %v1453_v9, %s3371_s26 }
 0xcd3   :  { %v1456_v39 = vpop.permute.xlu2 %1455 }
 0xcd4   :  { %v3951_v17 = vadd.f32 %v1456_v39, %v3948_v7  ;;  %v4041_v7 = vld [vmem:[#allocation11 + $0x38] sm:$0xff] }
 0xcd6   :  { %4653 = vst [vmem:[#allocation30_spill] sm:$0xff] %v3951_v17  ;;  %3009 = vmatmul.msk.f32.vlgmr.msrb.gmra.mxu2 %vm116_vm0, %v3951_v17  ;;  %v4037_v17 = vld [vmem:[#allocation12] sm:$0xff] }
 0xd59   :  { %v1483_v23 = vpop.f32.mrf.mxu2 }
 0xd5a   :  { %v1484_v45 = vadd.f32 %v3685_v16, %v1483_v23 }
 0xd5c   :  { %v1486_v31 = vmax.f32 %v1484_v45, 0.0 }
 0xd5e   :  { %3010 = vmatmul.msk.f32.vlgmr.msra.gmra.mxu3 %vm116_vm0, %v1486_v31  ;;  %3011 = vmatmul.msk.f32.vlgmr.msrb.gmra.mxu0 %vm116_vm0, %v1486_v31 }
 0xddb   :  { %v1535_v61 = vpop.f32.mrf.mxu0 }
 0xddc   :  { %v1543_v19 = vadd.f32 %v1542_v55, %v1535_v61  ;;  %v3971_v61 = vld [vmem:[#allocation9 + $0x68] sm:$0xff] }
 0xddd   :  { %1711 = vmatpush.msra.mxu2 %v3971_v61 }
 0xdde   :  { %3130 = vtanh.f32 %v1543_v19  ;;  %v3012_v59 = vmul.f32 -1.442695, %v1543_v19  ;;  %v3973_v19 = vld [vmem:[#allocation9 + $0x70] sm:$0xff] }
 0xddf   :  { %1731 = vmatpush.msrb.mxu3 %v3973_v19 }
 0xde0   :  { %3132 = vpow2.f32 %v3012_v59  ;;  %v3979_v59 = vld [vmem:[#allocation9 + $0x48] sm:$0xff] }
 0xde1   :  { %1712 = vmatpush.msra.mxu2 %v3979_v59 }
 0xde3   :  { %1713 = vmatpush.msra.mxu2 %v3901_v53 }
 0xde4   :  { %v3131_v58 = vpop.eup %3130 }
 0xde5   :  { %1566 = vrot.lane.b32.xlu0 %v3131_v58, %s3362_s25  ;;  %v3975_v58 = vld [vmem:[#allocation9 + $0x78] sm:$0xff]  ;;  %1714 = vmatpush.msra.mxu2 %v3905_v33 }
 0xde6   :  { %v3133_v42 = vpop.eup %3132  ;;  %1751 = vmatpush.msra.mxu0 %v3975_v58 }
 0xde7   :  { %v1547_v43 = vadd.f32 1.0, %v3133_v42  ;;  %v3983_v42 = vld [vmem:[#allocation9 + $0x58] sm:$0xff] }
 0xde8   :  { %1752 = vmatpush.msra.mxu0 %v3983_v42 }
 0xde9   :  { %3134 = vrcp.f32 %v1547_v43  ;;  %v1559_v9 = vand.u32 2147483648, %v1547_v43  ;;  %vm1553_vm15 = vweird.f32 %v1547_v43  ;;  %v1557_v46 = vand.u32 2147483647, %v1547_v43 }
 0xdeb   :  { %v1560_v15 = vor.u32 1.1754944e-38, %v1559_v9  ;;  %vm1558_vm3 = vcmp.eq.f32.partialorder %v1557_v46, 8.507059e+37  ;;  %v4008_v9 = vld [vmem:[#allocation6 + $0x10] sm:$0xff]  }
 0xdec   :  { %v4011_v46 = vunpack.c.l.bf16 %v4008_v9 }
 0xdee   :  { %4655 = vst [vmem:[#allocation32_spill] sm:$0xff] %v4011_v46 }
 0xdef   :  { %v3135_v44 = vpop.eup %3134 }
 0xdf0   :  { %v1549_v57 = vmul.f32 %v3135_v44, %v1547_v43  ;;  %vm1554_vm14 = vweird.f32 %v3135_v44  ;;  %v3986_v43 = vld [vmem:[#allocation9 + $0x30] sm:$0xff] }
 0xdf1   :  { %vm1555_vm2 = vmor %vm1553_vm15, %vm1554_vm14 }
 0xdf2   :  { %v1550_v3 = vsub.f32 1.0, %v1549_v57  ;;  %v3993_v57 = vld [vmem:[#allocation9 + $0x10] sm:$0xff] }
 0xdf4   :  { %v1551_v29 = vmul.f32 %v3135_v44, %v1550_v3  ;;  %v3997_v3 = vld [vmem:[#allocation9 + $0x18] sm:$0xff] }
 0xdf6   :  { %v1552_v8 = vadd.f32 %v3135_v44, %v1551_v29 }
 0xdf8   :  { %v1556_v12 = vsel %vm1555_vm2, %v3135_v44, %v1552_v8  ;;  %v3990_v44 = vld [vmem:[#allocation9 + $0x38] sm:$0xff]  ;;  %vm682_vm2 = vcmask 7168  }
 0xdf9   :  { %v1561_v23 = vsel %vm1558_vm3, %v1560_v15, %v1556_v12  ;;  %1753 = vmatpush.msra.mxu0 %v3990_v44  ;;  %v4019_v15 = vld [vmem:[#allocation12 + $0x18] sm:$0xff]  ;;  %vm684_vm3 = vcmask 15368  }
 0xdfa   :  { %v1564_v31 = vmul.f32 %v1561_v23, %v3893_v0  ;;  %v3981_v0 = vld [vmem:[#allocation9 + $0x50] sm:$0xff]  ;;  %1795 = vmatpush.msrb.mxu1 %v4019_v15 }
 0xdfb   :  { %1732 = vmatpush.msrb.mxu3 %v3981_v0  ;;  %1754 = vmatpush.msra.mxu0 %v3997_v3 }
 0xdfd   :  { %1733 = vmatpush.msrb.mxu3 %v3986_v43  ;;  %2008 = vmatpush.msrb.mxu0 %v3897_v20 }
 0xdff   :  { %1734 = vmatpush.msrb.mxu3 %v3993_v57  ;;  %2009 = vmatpush.msrb.mxu0 %v3899_v51 }
 0xe01   :  { %2010 = vmatpush.msrb.mxu0 %v3907_v30  ;;  %1847 = vmatpush.msra.mxu3 %v4041_v7 }
 0xe03   :  { %2011 = vmatpush.msrb.mxu0 %v3912_v40 }
 0xe57   :  { %v1567_v39 = vpop.permute.xlu0 %1566 }
 0xe58   :  { %v1569_v45 = vmul.f32 %v1567_v39, %v1561_v23  ;;  %v4021_v39 = vld [vmem:[#allocation12 + $0x10] sm:$0xff] }
 0xe59   :  { %1796 = vmatpush.msrb.mxu1 %v4021_v39 }
 0xe5a   :  { %1571 = vrot.lane.b32.xlu1 %v1569_v45, %s3360_s22  ;;  %v291_v45 = vadd.f32 %v3779_v10, %v3616_v47  ;;  %v4043_v10 = vld [vmem:[#allocation11 + $0x30] sm:$0xff] }
 0xe5b   :  { %1827 = vmatpush.msrb.mxu2 %v4043_v10 }
 0xe5d   :  { %1828 = vmatpush.msrb.mxu2 %v4067_v2 }
 0xe62   :  { %1767 = vrot.lane.b32.xlu1 %v4011_v46, %s3360_s22 }
 0xecc   :  { %v1572_v25 = vpop.permute.xlu1 %1571 }
 0xecd   :  { %v3967_v5 = vadd.f32 %v1572_v25, %v1564_v31 }
 0xecf   :  { %3136 = vtanh.f32 %v3967_v5 }
 0xed5   :  { %v3137_v55 = vpop.eup %3136 }
 0xed6   :  { %1577 = vrot.lane.b32.xlu2 %v3137_v55, %s3362_s25 }
 0xf30   :  { %v1578_v29 = vpop.permute.xlu2 %1577 }
 0xf31   :  { %v1580_v8 = vmul.f32 %v1578_v29, %v1561_v23  ;;  %v4025_v23 = vld [vmem:[#allocation12 + $0x8] sm:$0xff] }
 0xf32   :  { %1797 = vmatpush.msrb.mxu1 %v4025_v23 }
 0xf33   :  { %1675 = vrot.lane.b32.xlu0 %v1580_v8, %s3360_s22  ;;  %v1768_v8 = vpop.permute.xlu1 %1767 }
 0xf34   :  { %1798 = vmatpush.msrb.mxu1 %v4037_v17 }
 0xfa5   :  { %v1676_v12 = vpop.permute.xlu0 %1675 }
 0xfa6   :  { %3016 = vmatmul.msk.f32.vlgmr.msra.gmra.mxu1 %vm116_vm0, %v1676_v12  ;;  %3017 = vmatmul.msk.f32.vlgmr.msra.gmra.mxu2 %vm116_vm0, %v1676_v12 }
 0xfa7   :  { %3018 = vmatmul.msk.f32.vlgmr.msrb.gmra.mxu3 %vm116_vm0, %v1676_v12  ;;  %3019 = vmatmul.msk.f32.vlgmr.msra.gmra.mxu0 %vm116_vm0, %v1676_v12 }
 0xfa8   :  { %2112 = vmatpush.msra.mxu0 %v4019_v15  ;;  %2028 = vmatpush.msra.mxu1 %v3971_v61 }
 0xfaa   :  { %2113 = vmatpush.msra.mxu0 %v4021_v39  ;;  %2029 = vmatpush.msra.mxu1 %v3979_v59 }
 0xfac   :  { %2114 = vmatpush.msra.mxu0 %v4025_v23  ;;  %2030 = vmatpush.msra.mxu1 %v3901_v53 }
 0xfae   :  { %2115 = vmatpush.msra.mxu0 %v4037_v17  ;;  %2031 = vmatpush.msra.mxu1 %v3905_v33 }
0x1029   :  { %v1716_v31 = vpop.f32.mrf.mxu2 }
0x102a   :  { %v1761_v25 = vadd.f32 %v1716_v31, %v291_v45  ;;  %v4045_v45 = vld [vmem:[#allocation11 + $0x28] sm:$0xff] }
0x102b   :  { %1848 = vmatpush.msra.mxu3 %v4045_v45 }
0x102c   :  { %v4033_v55 = vmax.f32 %v1761_v25, 0.0 }
0x102e   :  { %4656 = vst [vmem:[#allocation33_spill] sm:$0xff] %v4033_v55  ;;  %v1764_v29 = vmul.f32 1.442695, %v4033_v55 }
0x1030   :  { %3138 = vpow2.f32 %v1764_v29 }
0x1036   :  { %v3139_v12 = vpop.eup %3138 }
0x1037   :  { %v1770_v46 = vmul.f32 %v3139_v12, %v1768_v8 }
0x1039   :  { %1772 = vrot.lane.b32.xlu2 %v1770_v46, %s3371_s26  ;;  %v1696_v46 = vpop.f32.mrf.mxu1 }
0x103a   :  { %v1759_v31 = vadd.f32 %v3642_v60, %v1696_v46  ;;  %v4071_v60 = vld [vmem:[#allocation11 + $0x18] sm:$0xff]  ;;  %v4073_v46 = vld [vmem:[#allocation11 + $0x10] sm:$0xff] }
0x103b   :  { %1849 = vmatpush.msra.mxu3 %v4071_v60  ;;  %1829 = vmatpush.msrb.mxu2 %v4073_v46 }
0x103c   :  { %v4055_v25 = vmax.f32 %v1759_v31, 0.0  ;;  %v4077_v31 = vld [vmem:[#allocation11 + $0x8] sm:$0xff] }
0x103d   :  { %1850 = vmatpush.msra.mxu3 %v4077_v31 }
0x103e   :  { %4657 = vst [vmem:[#allocation34_spill] sm:$0xff] %v4055_v25  ;;  %v4059_v29 = vadd.f32 %v4033_v55, %v4055_v25 }
0x103f   :  { %2068 = vmatpush.msrb.mxu3 %v3975_v58 }
0x1040   :  { %4658 = vst [vmem:[#allocation35_spill] sm:$0xff] %v4059_v29 }
0x1041   :  { %2069 = vmatpush.msrb.mxu3 %v3983_v42 }
0x1043   :  { %2070 = vmatpush.msrb.mxu3 %v3990_v44 }
0x1045   :  { %2071 = vmatpush.msrb.mxu3 %v3997_v3 }
0x1093   :  { %v1773_v8 = vpop.permute.xlu2 %1772 }
0x1094   :  { %v4062_v12 = vadd.f32 %v1773_v8, %v4059_v29  ;;  %v4079_v8 = vld [vmem:[#allocation11] sm:$0xff] }
0x1095   :  { %1830 = vmatpush.msrb.mxu2 %v4079_v8 }
0x1096   :  { %4659 = vst [vmem:[#allocation36_spill] sm:$0xff] %v4062_v12  ;;  %3020 = vmatmul.msk.f32.vlgmr.msrb.gmra.mxu1 %vm116_vm0, %v4062_v12 }
0x1097   :  { %2144 = vmatpush.msrb.mxu1 %v4043_v10  ;;  %2048 = vmatpush.msra.mxu2 %v3973_v19 }
0x1099   :  { %2145 = vmatpush.msrb.mxu1 %v4067_v2  ;;  %2049 = vmatpush.msra.mxu2 %v3981_v0 }
0x109b   :  { %2146 = vmatpush.msrb.mxu1 %v4073_v46  ;;  %2050 = vmatpush.msra.mxu2 %v3986_v43 }
0x109d   :  { %2147 = vmatpush.msrb.mxu1 %v4079_v8  ;;  %2051 = vmatpush.msra.mxu2 %v3993_v57 }
0x1113   :  { %v1800_v29 = vpop.f32.mrf.mxu1 }
0x1114   :  { %v1801_v12 = vadd.f32 %v3685_v16, %v1800_v29  ;;  %v4104_v16 = vpop.f32.mrf.mxu3 }
0x1115   :  { %4660 = vst [vmem:[#allocation37_spill] sm:$0xff] %v4104_v16 }
0x1116   :  { %v1803_v25 = vmax.f32 %v1801_v12, 0.0 }
0x1118   :  { %3021 = vmatmul.msk.f32.vlgmr.msrb.gmra.mxu2 %vm116_vm0, %v1803_v25  ;;  %3022 = vmatmul.msk.f32.vlgmr.msra.gmra.mxu3 %vm116_vm0, %v1803_v25  ;;  %v1756_v25 = vpop.f32.mrf.mxu0 }
0x1119   :  { %2164 = vmatpush.msrb.mxu2 %v4041_v7  ;;  %2325 = vmatpush.msra.mxu3 %v3897_v20  ;;  %v332_v20 = vadd.f32 %v3819_v48, %v3699_v21 }
0x111b   :  { %2165 = vmatpush.msrb.mxu2 %v4045_v45  ;;  %2326 = vmatpush.msra.mxu3 %v3899_v51  ;;  %v1859_v12 = vadd.f32 %v1756_v25, %v332_v20 }
0x111c   :  { %v4106_v29 = vpop.f32.mrf.mxu3 }
0x111d   :  { %2166 = vmatpush.msrb.mxu2 %v4071_v60  ;;  %2327 = vmatpush.msra.mxu3 %v3907_v30  ;;  %4661 = vst [vmem:[#allocation38_spill] sm:$0xff] %v4106_v29 }
0x111f   :  { %2167 = vmatpush.msrb.mxu2 %v4077_v31  ;;  %2328 = vmatpush.msra.mxu3 %v3912_v40 }
0x119b   :  { %v1852_v55 = vpop.f32.mrf.mxu3 }
0x119c   :  { %v1860_v35 = vadd.f32 %v1859_v12, %v1852_v55 }
0x119e   :  { %3140 = vtanh.f32 %v1860_v35  ;;  %v3023_v30 = vmul.f32 -1.442695, %v1860_v35 }
0x11a0   :  { %3142 = vpow2.f32 %v3023_v30 }
0x11a4   :  { %v3141_v51 = vpop.eup %3140 }
0x11a5   :  { %1883 = vrot.lane.b32.xlu0 %v3141_v51, %s3362_s25 }
0x11a6   :  { %v3143_v22 = vpop.eup %3142 }
0x11a7   :  { %v1864_v6 = vadd.f32 1.0, %v3143_v22 }
0x11a9   :  { %3144 = vrcp.f32 %v1864_v6  ;;  %v1876_v24 = vand.u32 2147483648, %v1864_v6  ;;  %vm1870_vm5 = vweird.f32 %v1864_v6  ;;  %v1874_v48 = vand.u32 2147483647, %v1864_v6 }
0x11ab   :  { %v1877_v25 = vor.u32 1.1754944e-38, %v1876_v24  ;;  %vm1875_vm7 = vcmp.eq.f32.partialorder %v1874_v48, 8.507059e+37  ;;  %v4119_v24 = vunpack.c.h.bf16 %v4008_v9 }
0x11af   :  { %v3145_v40 = vpop.eup %3144 }
0x11b0   :  { %v1866_v41 = vmul.f32 %v3145_v40, %v1864_v6  ;;  %vm1871_vm4 = vweird.f32 %v3145_v40 }
0x11b1   :  { %vm1872_vm6 = vmor %vm1870_vm5, %vm1871_vm4  ;;  %vm686_vm4 = vcmask 23568   ;;  %vm691_vm5 = vcmask 31768  }
0x11b2   :  { %v1867_v32 = vsub.f32 1.0, %v1866_v41 }
0x11b4   :  { %v1868_v29 = vmul.f32 %v3145_v40, %v1867_v32 }
0x11b6   :  { %v1869_v16 = vadd.f32 %v3145_v40, %v1868_v29 }
0x11b8   :  { %v1873_v55 = vsel %vm1872_vm6, %v3145_v40, %v1869_v16  ;;  %vm696_vm6 = vcmask 39968  }
0x11b9   :  { %v1878_v12 = vsel %vm1875_vm7, %v1877_v25, %v1873_v55 }
0x11ba   :  { %v1881_v22 = vmul.f32 %v1878_v12, %v3967_v5  ;;  %v294_v5 = vadd.f32 %v3781_v36, %v3616_v47 }
0x1217   :  { %v1884_v20 = vpop.permute.xlu0 %1883 }
0x1218   :  { %v1886_v35 = vmul.f32 %v1884_v20, %v1878_v12 }
0x121a   :  { %1888 = vrot.lane.b32.xlu1 %v1886_v35, %s3360_s22  ;;  %v4173_v35 = vld [vmem:[%s4623_s13] ss:$0 sm:$0xff] }
0x1222   :  { %2084 = vrot.lane.b32.xlu1 %v4119_v24, %s3360_s22 }
0x128c   :  { %v1889_v51 = vpop.permute.xlu1 %1888 }
0x128d   :  { %v4113_v30 = vadd.f32 %v1889_v51, %v1881_v22 }
0x128f   :  { %3146 = vtanh.f32 %v4113_v30 }
0x1294   :  { %v2085_v29 = vpop.permute.xlu1 %2084 }
0x1295   :  { %v3147_v32 = vpop.eup %3146 }
0x1296   :  { %1894 = vrot.lane.b32.xlu2 %v3147_v32, %s3362_s25 }
0x12f0   :  { %v1895_v41 = vpop.permute.xlu2 %1894 }
0x12f1   :  { %v1897_v6 = vmul.f32 %v1895_v41, %v1878_v12 }
0x12f3   :  { %1992 = vrot.lane.b32.xlu0 %v1897_v6, %s3360_s22 }
0x1365   :  { %v1993_v16 = vpop.permute.xlu0 %1992 }
0x1366   :  { %3027 = vmatmul.msk.f32.vlgmr.msrb.gmra.mxu0 %vm116_vm0, %v1993_v16  ;;  %3028 = vmatmul.msk.f32.vlgmr.msra.gmra.mxu1 %vm116_vm0, %v1993_v16 }
0x1367   :  { %3029 = vmatmul.msk.f32.vlgmr.msra.gmra.mxu2 %vm116_vm0, %v1993_v16  ;;  %3030 = vmatmul.msk.f32.vlgmr.msrb.gmra.mxu3 %vm116_vm0, %v1993_v16 }
0x1368   :  { %2345 = vmatpush.msrb.mxu0 %v3971_v61  ;;  %2365 = vmatpush.msra.mxu1 %v3973_v19 }
0x1369   :  { %2385 = vmatpush.msra.mxu2 %v3975_v58  ;;  %2429 = vmatpush.msrb.mxu3 %v4019_v15 }
0x136a   :  { %2346 = vmatpush.msrb.mxu0 %v3979_v59  ;;  %2366 = vmatpush.msra.mxu1 %v3981_v0 }
0x136b   :  { %2386 = vmatpush.msra.mxu2 %v3983_v42  ;;  %2430 = vmatpush.msrb.mxu3 %v4021_v39 }
0x136c   :  { %2347 = vmatpush.msrb.mxu0 %v3901_v53  ;;  %2367 = vmatpush.msra.mxu1 %v3986_v43 }
0x136d   :  { %2387 = vmatpush.msra.mxu2 %v3990_v44  ;;  %2431 = vmatpush.msrb.mxu3 %v4025_v23 }
0x136e   :  { %2348 = vmatpush.msrb.mxu0 %v3905_v33  ;;  %2368 = vmatpush.msra.mxu1 %v3993_v57 }
0x136f   :  { %2388 = vmatpush.msra.mxu2 %v3997_v3  ;;  %2432 = vmatpush.msrb.mxu3 %v4037_v17  ;;  %v4152_v17 = vld [vmem:[%s4620_s10] ss:$0 sm:$0xff] }
0x13e3   :  { %v2033_v9 = vpop.f32.mrf.mxu1  ;;  %v2013_v33 = vpop.f32.mrf.mxu0 }
0x13e4   :  { %v2078_v15 = vadd.f32 %v2033_v9, %v294_v5  ;;  %v2076_v36 = vadd.f32 %v4152_v17, %v2013_v33 }
0x13e6   :  { %v4145_v53 = vmax.f32 %v2078_v15, 0.0  ;;  %v4155_v48 = vmax.f32 %v2076_v36, 0.0 }
0x13e8   :  { %v2081_v39 = vmul.f32 1.442695, %v4145_v53  ;;  %v4159_v55 = vadd.f32 %v4145_v53, %v4155_v48 }
0x13ea   :  { %3148 = vpow2.f32 %v2081_v39 }
0x13f0   :  { %v3149_v23 = vpop.eup %3148 }
0x13f1   :  { %v2087_v40 = vmul.f32 %v3149_v23, %v2085_v29 }
0x13f3   :  { %2089 = vrot.lane.b32.xlu2 %v2087_v40, %s3371_s26 }
0x144d   :  { %v2090_v25 = vpop.permute.xlu2 %2089 }
0x144e   :  { %v4162_v20 = vadd.f32 %v2090_v25, %v4159_v55 }
0x1450   :  { %3031 = vmatmul.msk.f32.vlgmr.msra.gmra.mxu0 %vm116_vm0, %v4162_v20 }
0x1451   :  { %2461 = vmatpush.msra.mxu0 %v4043_v10 }
0x1453   :  { %2462 = vmatpush.msra.mxu0 %v4067_v2  ;;  %v4182_v2 = vpop.f32.mrf.mxu2 }
0x1455   :  { %2463 = vmatpush.msra.mxu0 %v4073_v46  ;;  %v2073_v46 = vpop.f32.mrf.mxu3 }
0x1457   :  { %2464 = vmatpush.msra.mxu0 %v4079_v8  ;;  %v335_v8 = vadd.f32 %v3821_v50, %v3699_v21 }
0x1459   :  { %v2176_v32 = vadd.f32 %v2073_v46, %v335_v8 }
0x145b   :  { %v4184_v10 = vpop.f32.mrf.mxu2 }
0x14cd   :  { %v2117_v12 = vpop.f32.mrf.mxu0 }
0x14ce   :  { %v2118_v22 = vadd.f32 %v4173_v35, %v2117_v12 }
0x14d0   :  { %v2120_v51 = vmax.f32 %v2118_v22, 0.0 }
0x14d2   :  { %3032 = vmatmul.msk.f32.vlgmr.msrb.gmra.mxu1 %vm116_vm0, %v2120_v51  ;;  %3033 = vmatmul.msk.f32.vlgmr.msrb.gmra.mxu2 %vm116_vm0, %v2120_v51 }
0x14d3   :  { %2481 = vmatpush.msrb.mxu1 %v4041_v7 }
0x14d5   :  { %2482 = vmatpush.msrb.mxu1 %v4045_v45 }
0x14d7   :  { %2483 = vmatpush.msrb.mxu1 %v4071_v60 }
0x14d9   :  { %2484 = vmatpush.msrb.mxu1 %v4077_v31 }
0x1555   :  { %v2169_v41 = vpop.f32.mrf.mxu2 }
0x1556   :  { %v2177_v6 = vadd.f32 %v2176_v32, %v2169_v41  ;;  %v4196_v41 = vld [vmem:[#allocation6 + $0x18] sm:$0xff]  }
0x1558   :  { %3150 = vtanh.f32 %v2177_v6  ;;  %v3034_v7 = vmul.f32 -1.442695, %v2177_v6  ;;  %v4199_v6 = vunpack.c.l.bf16 %v4196_v41 }
0x155a   :  { %3152 = vpow2.f32 %v3034_v7 }
0x155e   :  { %v3151_v16 = vpop.eup %3150 }
0x155f   :  { %2200 = vrot.lane.b32.xlu0 %v3151_v16, %s3362_s25 }
0x1560   :  { %v3153_v45 = vpop.eup %3152 }
0x1561   :  { %v2181_v60 = vadd.f32 1.0, %v3153_v45 }
0x1563   :  { %3154 = vrcp.f32 %v2181_v60  ;;  %v2193_v29 = vand.u32 2147483648, %v2181_v60  ;;  %vm2187_vm9 = vweird.f32 %v2181_v60  ;;  %v2191_v50 = vand.u32 2147483647, %v2181_v60 }
0x1565   :  { %v2194_v40 = vor.u32 1.1754944e-38, %v2193_v29  ;;  %vm2192_vm11 = vcmp.eq.f32.partialorder %v2191_v50, 8.507059e+37 }
0x1569   :  { %v3155_v31 = vpop.eup %3154 }
0x156a   :  { %v2183_v5 = vmul.f32 %v3155_v31, %v2181_v60  ;;  %vm2188_vm8 = vweird.f32 %v3155_v31 }
0x156b   :  { %vm2189_vm10 = vmor %vm2187_vm9, %vm2188_vm8 }
0x156c   :  { %v2184_v9 = vsub.f32 1.0, %v2183_v5  ;;  %v4240_v5 = vpop.f32.mrf.mxu1 }
0x156e   :  { %v2185_v15 = vmul.f32 %v3155_v31, %v2184_v9 }
0x1570   :  { %v2186_v39 = vadd.f32 %v3155_v31, %v2185_v15 }
0x1572   :  { %v2190_v23 = vsel %vm2189_vm10, %v3155_v31, %v2186_v39  ;;  %v338_v39 = vadd.f32 %v3823_v4, %v3699_v21  ;;  %v4251_v4 = vld [vmem:[%s4621_s11] ss:$0 sm:$0xff] }
0x1573   :  { %v2195_v36 = vsel %vm2192_vm11, %v2194_v40, %v2190_v23 }
0x1574   :  { %v2198_v12 = vmul.f32 %v2195_v36, %v4113_v30 }
0x15d1   :  { %v2201_v33 = vpop.permute.xlu0 %2200 }
0x15d2   :  { %v2203_v25 = vmul.f32 %v2201_v33, %v2195_v36 }
0x15d4   :  { %2205 = vrot.lane.b32.xlu1 %v2203_v25, %s3360_s22 }
0x15dc   :  { %2401 = vrot.lane.b32.xlu1 %v4199_v6, %s3360_s22 }
0x1646   :  { %v2206_v22 = vpop.permute.xlu1 %2205 }
0x1647   :  { %v4191_v51 = vadd.f32 %v2206_v22, %v2198_v12 }
0x1649   :  { %3156 = vtanh.f32 %v4191_v51 }
0x164f   :  { %v3157_v46 = vpop.eup %3156 }
0x1650   :  { %2211 = vrot.lane.b32.xlu2 %v3157_v46, %s3362_s25 }
0x16aa   :  { %v2212_v8 = vpop.permute.xlu2 %2211 }
0x16ab   :  { %v2214_v32 = vmul.f32 %v2212_v8, %v2195_v36 }
0x16ad   :  { %2309 = vrot.lane.b32.xlu0 %v2214_v32, %s3360_s22  ;;  %v578_v32 = vadd.f32 %v3701_v27, %v3680_v13 }
0x171f   :  { %v2310_v30 = vpop.permute.xlu0 %2309 }
0x1720   :  { %3038 = vmatmul.msk.f32.vlgmr.msra.gmra.mxu3 %vm116_vm0, %v2310_v30  ;;  %3039 = vmatmul.msk.f32.vlgmr.msrb.gmra.mxu0 %vm116_vm0, %v2310_v30 }
0x1721   :  { %3040 = vmatmul.msk.f32.vlgmr.msra.gmra.mxu1 %vm116_vm0, %v2310_v30  ;;  %3041 = vmatmul.msk.f32.vlgmr.msra.gmra.mxu2 %vm116_vm0, %v2310_v30 }
0x1722   :  { %2662 = vmatpush.msra.mxu3 %v3971_v61  ;;  %2682 = vmatpush.msrb.mxu0 %v3973_v19  ;;  %v297_v61 = vadd.f32 %v3783_v38, %v3616_v47 }
0x1723   :  { %2702 = vmatpush.msra.mxu1 %v3975_v58 }
0x1724   :  { %2663 = vmatpush.msra.mxu3 %v3979_v59  ;;  %2683 = vmatpush.msrb.mxu0 %v3981_v0  ;;  %v2402_v0 = vpop.permute.xlu1 %2401 }
0x1725   :  { %2703 = vmatpush.msra.mxu1 %v3983_v42 }
0x1726   :  { %2684 = vmatpush.msrb.mxu0 %v3986_v43 }
0x1727   :  { %2704 = vmatpush.msra.mxu1 %v3990_v44 }
0x1728   :  { %2685 = vmatpush.msrb.mxu0 %v3993_v57 }
0x1729   :  { %2705 = vmatpush.msra.mxu1 %v3997_v3 }
0x179d   :  { %v2350_v19 = vpop.f32.mrf.mxu0 }
0x179e   :  { %v2395_v16 = vadd.f32 %v2350_v19, %v297_v61  ;;  %v4242_v9 = vpop.f32.mrf.mxu1  ;;  %v579_v61 = vadd.f32 %v4251_v4, %v578_v32 }
0x17a0   :  { %v4219_v58 = vmax.f32 %v2395_v16, 0.0  ;;  %v4259_v16 = vld [vmem:[%s4622_s12] ss:$0 sm:$0xff] }
0x17a2   :  { %v2398_v59 = vmul.f32 1.442695, %v4219_v58 }
0x17a3   :  { %v2330_v43 = vpop.f32.mrf.mxu3 }
0x17a4   :  { %3158 = vpow2.f32 %v2398_v59  ;;  %v2393_v44 = vadd.f32 %v4152_v17, %v2330_v43  ;;  %v2390_v15 = vpop.f32.mrf.mxu2  ;;  %v580_v59 = vmax.f32 %v579_v61, 0.0  ;;  %v693_v61 = vsel %vm116_vm0, %v3649_v63, 0.0 }
0x17a5   :  { %v2493_v29 = vadd.f32 %v2390_v15, %v338_v39  ;;  %v904_v63 = vadd.f32 %v3884_v18, %v3827_v54 }
0x17a6   :  { %v4226_v57 = vmax.f32 %v2393_v44, 0.0 }
0x17a8   :  { %v4230_v38 = vadd.f32 %v4219_v58, %v4226_v57 }
0x17aa   :  { %v3159_v42 = vpop.eup %3158 }
0x17ab   :  { %v2404_v7 = vmul.f32 %v3159_v42, %v2402_v0  ;;  %v581_v42 = vadd.f32 %v4259_v16, %v580_v59 }
0x17ad   :  { %2406 = vrot.lane.b32.xlu2 %v2404_v7, %s3371_s26  ;;  %v627_v13 = vand.u32 2147483647, %v581_v42 }
0x17b5   :  { %640 = vrot.lane.b32.xlu2 %v3619_v52, %s3371_s26 }
0x1807   :  { %v2407_v3 = vpop.permute.xlu2 %2406 }
0x1808   :  { %v4233_v45 = vadd.f32 %v2407_v3, %v4230_v38 }
0x180a   :  { %3042 = vmatmul.msk.f32.vlgmr.msrb.gmra.mxu3 %vm116_vm0, %v4233_v45 }
0x180f   :  { %v641_v33 = vpop.permute.xlu2 %640 }
0x1810   :  { %v643_v36 = vsel %vm116_vm0, %v641_v33, 0.0 }
0x188d   :  { %v2434_v60 = vpop.f32.mrf.mxu3 }
0x188e   :  { %v2435_v31 = vadd.f32 %v4173_v35, %v2434_v60 }
0x1890   :  { %v2437_v52 = vmax.f32 %v2435_v31, 0.0 }
0x1892   :  { %3043 = vmatmul.msk.f32.vlgmr.msra.gmra.mxu0 %vm116_vm0, %v2437_v52  ;;  %3044 = vmatmul.msk.f32.vlgmr.msrb.gmra.mxu1 %vm116_vm0, %v2437_v52  ;;  %v628_v52 = vsub.f32 0.0, %v627_v13 }
0x1894   :  { %v629_v15 = vmul.f32 1.442695, %v628_v52 }
0x190f   :  { %v2486_v50 = vpop.f32.mrf.mxu1 }
0x1910   :  { %v2494_v23 = vadd.f32 %v2493_v29, %v2486_v50 }
0x1912   :  { %3160 = vtanh.f32 %v2494_v23  ;;  %v3045_v25 = vmul.f32 -1.442695, %v2494_v23  ;;  %v377_v23 = vld [vmem:[%s4611_s1] sm:$0xff]  }
0x1913   :  { %v378_v33 = vunpack.c.l.bf16 %v377_v23 }
0x1914   :  { %3162 = vpow2.f32 %v3045_v25 }
0x1918   :  { %v3161_v40 = vpop.eup %3160 }
0x1919   :  { %2517 = vrot.lane.b32.xlu0 %v3161_v40, %s3362_s25 }
0x191a   :  { %v3163_v12 = vpop.eup %3162 }
0x191b   :  { %v2498_v22 = vadd.f32 1.0, %v3163_v12  ;;  %v625_v12 = vmul.f32 %v581_v42, %v378_v33 }
0x191d   :  { %3164 = vrcp.f32 %v2498_v22  ;;  %v2510_v7 = vand.u32 2147483648, %v2498_v22  ;;  %vm2504_vm13 = vweird.f32 %v2498_v22  ;;  %v2508_v43 = vand.u32 2147483647, %v2498_v22 }
0x191e   :  { %3166 = vpow2.f32 %v629_v15 }
0x191f   :  { %v2511_v27 = vor.u32 1.1754944e-38, %v2510_v7  ;;  %vm2509_vm15 = vcmp.eq.f32.partialorder %v2508_v43, 8.507059e+37  ;;  %v648_v7 = vmul.f32 %v3577_v37, %v3577_v37 }
0x1921   :  { %v649_v43 = vsel %vm116_vm0, %v648_v7, 0.0 }
0x1923   :  { %v3165_v46 = vpop.eup %3164 }
0x1924   :  { %v2500_v8 = vmul.f32 %v3165_v46, %v2498_v22  ;;  %vm2505_vm12 = vweird.f32 %v3165_v46  ;;  %v3167_v39 = vpop.eup %3166 }
0x1925   :  { %vm2506_vm14 = vmor %vm2504_vm13, %vm2505_vm12  ;;  %v631_v29 = vadd.f32 1.0, %v3167_v39 }
0x1926   :  { %v2501_v30 = vsub.f32 1.0, %v2500_v8  ;;  %v655_v8 = vsub.f32 0.0, %v3645_v62 }
0x1927   :  { %3168 = vlog2.f32 %v631_v29  ;;  %v700_v29 = vunpack.c.h.bf16 %v377_v23 }
0x1928   :  { %v2502_v19 = vmul.f32 %v3165_v46, %v2501_v30  ;;  %v656_v32 = vmul.f32 1.442695, %v655_v8 }
0x192a   :  { %v2503_v0 = vadd.f32 %v3165_v46, %v2502_v19  ;;  %3170 = vpow2.f32 %v656_v32 }
0x192c   :  { %v2507_v44 = vsel %vm2506_vm14, %v3165_v46, %v2503_v0 }
0x192d   :  { %v4262_v60 = vsel %vm2509_vm15, %v2511_v27, %v2507_v44  ;;  %v3169_v50 = vpop.eup %3168  ;;  %v905_v44 = vadd.f32 %v4251_v4, %v904_v63  ;;  %v688_v63 = vsel %vm116_vm0, %v3645_v62, 0.0 }
0x192e   :  { %v633_v40 = vmul.f32 0.6931472, %v3169_v50  ;;  %v2515_v19 = vmul.f32 %v4262_v60, %v4191_v51 }
0x192f   :  { %v906_v51 = vmax.f32 %v905_v44, 0.0 }
0x1930   :  { %v3171_v30 = vpop.eup %3170 }
0x1931   :  { %v907_v13 = vadd.f32 %v4259_v16, %v906_v51 }
0x1933   :  { %v949_v27 = vand.u32 2147483647, %v907_v13  ;;  %v948_v50 = vmax.f32 %v907_v13, 0.0  ;;  %v947_v18 = vmul.f32 %v907_v13, %v700_v29 }
0x1943   :  { %644 = vadd.xlane.f32.xlu0 %v643_v36  ;;  %v626_v36 = vmax.f32 %v581_v42, 0.0 }
0x1945   :  { %v634_v25 = vadd.f32 %v633_v40, %v626_v36  ;;  %v977_v36 = vsub.f32 0.0, %v3793_v26 }
0x1947   :  { %v635_v22 = vsub.f32 %v625_v12, %v634_v25  ;;  %v978_v25 = vmul.f32 1.442695, %v977_v36 }
0x1949   :  { %v636_v46 = vsel %vm148_vm1, %v635_v22, 0.0  ;;  %v970_v22 = vmul.f32 %v3751_v49, %v3751_v49 }
0x198b   :  { %v2518_v3 = vpop.permute.xlu0 %2517 }
0x198c   :  { %v2520_v31 = vmul.f32 %v2518_v3, %v4262_v60  ;;  %v950_v3 = vsub.f32 0.0, %v949_v27 }
0x198e   :  { %2522 = vrot.lane.b32.xlu1 %v2520_v31, %s3360_s22  ;;  %v951_v31 = vmul.f32 1.442695, %v950_v3 }
0x19b8   :  { %637 = vadd.xlane.f32.xlu1 %v636_v46  ;;  %v971_v46 = vsel %vm116_vm0, %v970_v22, 0.0  ;;  %v2621_v22 = vld [vmem:[#allocation9 + $0x60] sm:$0xff] }
0x19b9   :  { %2642 = vmatpush.msrb.mxu2 %v2621_v22 }
0x19d1   :  { %659 = vrot.lane.b32.xlu1 %v3171_v30, %s3371_s26  ;;  %v4298_v30 = vunpack.c.h.bf16 %v4196_v41  ;;  %v1221_v41 = vadd.f32 %v3958_v11, %v3886_v14 }
0x19d3   :  { %v1222_v44 = vadd.f32 %v4251_v4, %v1221_v41 }
0x19d5   :  { %v1223_v51 = vmax.f32 %v1222_v44, 0.0 }
0x19fb   :  { %694 = vadd.xlane.f32.xlu1 %v693_v61 }
0x1a00   :  { %v2523_v59 = vpop.permute.xlu1 %2522 }
0x1a01   :  { %v4276_v0 = vadd.f32 %v2523_v59, %v2515_v19  ;;  %v654_v19 = vsub.f32 %v3652_v1, %v3645_v62  ;;  %v1224_v1 = vadd.f32 %v4259_v16, %v1223_v51 }
0x1a03   :  { %3172 = vtanh.f32 %v4276_v0  ;;  %972 = vadd.xlane.f32.xlu1 %v971_v46  ;;  %v1266_v13 = vand.u32 2147483647, %v1224_v1  ;;  %v2617_v46 = vld [vmem:[#allocation9 + $0x40] sm:$0xff] }
0x1a04   :  { %3174 = vpow2.f32 %v951_v31  ;;  %2643 = vmatpush.msrb.mxu2 %v2617_v46 }
0x1a05   :  { %v1267_v27 = vsub.f32 0.0, %v1266_v13 }
0x1a07   :  { %v1268_v31 = vmul.f32 1.442695, %v1267_v27 }
0x1a09   :  { %v3173_v42 = vpop.eup %3172 }
0x1a0a   :  { %2528 = vrot.lane.b32.xlu2 %v3173_v42, %s3362_s25  ;;  %v3175_v52 = vpop.eup %3174 }
0x1a0b   :  { %v953_v37 = vadd.f32 1.0, %v3175_v52 }
0x1a0d   :  { %3176 = vlog2.f32 %v953_v37  ;;  %v4662_v37 = vld [vmem:[#allocation21_spill] sm:$0xff] }
0x1a0e   :  { %3178 = vpow2.f32 %v978_v25 }
0x1a0f   :  { %3180 = vpow2.f32 %v1268_v31 }
0x1a13   :  { %v3177_v15 = vpop.eup %3176 }
0x1a14   :  { %v955_v39 = vmul.f32 0.6931472, %v3177_v15  ;;  %v3179_v12 = vpop.eup %3178  ;;  %v976_v15 = vsub.f32 %v4662_v37, %v3793_v26 }
0x1a15   :  { %v3181_v14 = vpop.eup %3180 }
0x1a16   :  { %v956_v54 = vadd.f32 %v955_v39, %v948_v50  ;;  %v1270_v11 = vadd.f32 1.0, %v3181_v14 }
0x1a18   :  { %v957_v40 = vsub.f32 %v947_v18, %v956_v54  ;;  %3182 = vlog2.f32 %v1270_v11  ;;  %v1265_v18 = vmax.f32 %v1224_v1, 0.0 }
0x1a1a   :  { %v958_v33 = vsel %vm148_vm1, %v957_v40, 0.0 }
0x1a1c   :  { %2718 = vrot.lane.b32.xlu1 %v4298_v30, %s3360_s22 }
0x1a1e   :  { %v3183_v52 = vpop.eup %3182 }
0x1a1f   :  { %v1272_v50 = vmul.f32 0.6931472, %v3183_v52 }
0x1a2b   :  { %v4295_v8 = vpop.xlane.xlu1 %637 }
0x1a33   :  { %650 = vadd.xlane.f32.xlu2 %v649_v43 }
0x1a43   :  { %v660_v61 = vpop.permute.xlu1 %659 }
0x1a44   :  { %v662_v42 = vmul.f32 %v660_v61, %v654_v19  ;;  %v2614_v61 = vld [vmem:[#allocation9 + $0x28] sm:$0xff] }
0x1a45   :  { %v2610_v19 = vld [vmem:[#allocation9 + $0x8] sm:$0xff]  ;;  %2664 = vmatpush.msra.mxu3 %v2614_v61 }
0x1a46   :  { %v672_v7 = vmul.f32 %v662_v42, %v662_v42  ;;  %v2609_v42 = vld [vmem:[#allocation9] sm:$0xff] }
0x1a47   :  { %2665 = vmatpush.msra.mxu3 %v2610_v19 }
0x1a48   :  { %v673_v43 = vsel %vm116_vm0, %v672_v7, 0.0 }
0x1a4b   :  { %664 = vrot.lane.b32.xlu2 %v3645_v62, %s3371_s26 }
0x1a64   :  { %v2529_v23 = vpop.permute.xlu2 %2528 }
0x1a65   :  { %v2531_v3 = vmul.f32 %v2529_v23, %v4262_v60  ;;  %v4323_v60 = vld [vmem:[%s4611_s1 + $0x8] sm:$0xff]   ;;  %v645_v23 = vpop.xlane.xlu0 %644 }
0x1a66   :  { %v646_v7 = vsub.f32 0.0, %v645_v23 }
0x1a68   :  { %v2980_v44 = vadd.f32 -29.406033, %v646_v7 }
0x1a6e   :  { %v695_v52 = vpop.xlane.xlu1 %694 }
0x1a74   :  { %959 = vadd.xlane.f32.xlu2 %v958_v33  ;;  %v1273_v33 = vadd.f32 %v1272_v50, %v1265_v18 }
0x1a76   :  { %v973_v46 = vpop.xlane.xlu1 %972 }
0x1a8c   :  { %981 = vrot.lane.b32.xlu2 %v3179_v12, %s3371_s26 }
0x1a8e   :  { %v4361_v19 = vpop.permute.xlu1 %2718 }
0x1aa6   :  { %v651_v32 = vpop.xlane.xlu2 %650 }
0x1aa7   :  { %v652_v41 = vmul.f32 0.5, %v651_v32 }
0x1aa9   :  { %v653_v13 = vsub.f32 %v2980_v44, %v652_v41  ;;  %v974_v41 = vmul.f32 0.5, %v973_v46 }
0x1aae   :  { %v665_v59 = vpop.permute.xlu2 %664 }
0x1aaf   :  { %v667_v49 = vsel %vm116_vm0, %v665_v59, 0.0  ;;  %v2613_v59 = vld [vmem:[#allocation9 + $0x20] sm:$0xff] }
0x1ab0   :  { %668 = vadd.xlane.f32.xlu0 %v667_v49  ;;  %2644 = vmatpush.msrb.mxu2 %v2613_v59 }
0x1ab2   :  { %2645 = vmatpush.msrb.mxu2 %v2609_v42 }
0x1ab8   :  { %674 = vadd.xlane.f32.xlu0 %v673_v43 }
0x1ac0   :  { %689 = vadd.xlane.f32.xlu0 %v688_v63 }
0x1ad4   :  { %2626 = vrot.lane.b32.xlu0 %v2531_v3, %s3360_s22  ;;  %v4331_v3 = vstv %s4610_s0 }
0x1adc   :  { %962 = vrot.lane.b32.xlu0 %v3788_v56, %s3371_s26  ;;  %v1017_v56 = vunpack.c.l.bf16 %v4323_v60 }
0x1ade   :  { %v1264_v36 = vmul.f32 %v1224_v1, %v1017_v56  ;;  %v4663_v56 = vld [vmem:[#allocation20_spill] sm:$0xff] }
0x1adf   :  { %v1011_v18 = vsel %vm116_vm0, %v4663_v56, 0.0  ;;  %v4667_v56 = vld [vmem:[#allocation25_spill] sm:$0xff] }
0x1ae0   :  { %v1274_v25 = vsub.f32 %v1264_v36, %v1273_v33 }
0x1ae2   :  { %v1275_v12 = vsel %vm148_vm1, %v1274_v25, 0.0  ;;  %v4665_v25 = vld [vmem:[#allocation37_spill] sm:$0xff] }
0x1ae7   :  { %v4316_v62 = vpop.xlane.xlu2 %959 }
0x1aef   :  { %v982_v39 = vpop.permute.xlu2 %981 }
0x1af0   :  { %v984_v29 = vmul.f32 %v982_v39, %v976_v15 }
0x1af2   :  { %v994_v54 = vmul.f32 %v984_v29, %v984_v29 }
0x1af4   :  { %v995_v40 = vsel %vm116_vm0, %v994_v54, 0.0 }
0x1af5   :  { %996 = vadd.xlane.f32.xlu1 %v995_v40  ;;  %v1294_v40 = vsub.f32 0.0, %v3866_v34 }
0x1af7   :  { %v1295_v33 = vmul.f32 1.442695, %v1294_v40 }
0x1af9   :  { %3184 = vpow2.f32 %v1295_v33 }
0x1afd   :  { %1276 = vadd.xlane.f32.xlu1 %v1275_v12 }
0x1aff   :  { %v3185_v36 = vpop.eup %3184 }
0x1b23   :  { %v669_v49 = vpop.xlane.xlu0 %668 }
0x1b24   :  { %v670_v43 = vsub.f32 0.0, %v669_v49 }
0x1b26   :  { %v2981_v51 = vadd.f32 -29.406033, %v670_v43 }
0x1b2b   :  { %v675_v63 = vpop.xlane.xlu0 %674 }
0x1b2c   :  { %v676_v1 = vmul.f32 0.5, %v675_v63 }
0x1b2e   :  { %v677_v27 = vsub.f32 %v2981_v51, %v676_v1 }
0x1b30   :  { %v678_v31 = vsub.f32 %v653_v13, %v677_v27 }
0x1b32   :  { %v680_v14 = vmul.f32 %v4331_v3, %v678_v31 }
0x1b33   :  { %v690_v32 = vpop.xlane.xlu0 %689 }
0x1b34   :  { %v681_v11 = vsub.f32 %v680_v14, %v4295_v8 }
0x1b36   :  { %683 = vst.msk [vmem:[#allocation14] sm:$0xff] %vm682_vm2, %v681_v11 }
0x1b37   :  { %685 = vst.msk [vmem:[#allocation14] sm:$0xff] %vm684_vm3, %v678_v31 }
0x1b38   :  { %687 = vst.msk [vmem:[#allocation14] sm:$0xff] %vm686_vm4, %v4295_v8  ;;  %v1007_v8 = vsel %vm116_vm0, %v3793_v26, 0.0 }
0x1b39   :  { %692 = vst.msk [vmem:[#allocation14] sm:$0xff] %vm691_vm5, %v690_v32 }
0x1b3a   :  { %697 = vst.msk [vmem:[#allocation14] sm:$0xff] %vm696_vm6, %v695_v52 }
0x1b46   :  { %v2627_v37 = vpop.permute.xlu0 %2626 }
0x1b47   :  { %3049 = vmatmul.msk.f32.vlgmr.msrb.gmra.mxu2 %vm116_vm0, %v2627_v37  ;;  %3050 = vmatmul.msk.f32.vlgmr.msra.gmra.mxu3 %vm116_vm0, %v2627_v37 }
0x1b48   :  { %3051 = vmatmul.msk.f32.vlgmr.msrb.gmra.mxu0 %vm116_vm0, %v2627_v37  ;;  %3052 = vmatmul.msk.f32.vlgmr.msra.gmra.mxu1 %vm116_vm0, %v2627_v37 }
0x1b4e   :  { %v963_v15 = vpop.permute.xlu0 %962 }
0x1b4f   :  { %v965_v39 = vsel %vm116_vm0, %v963_v15, 0.0 }
0x1b50   :  { %966 = vadd.xlane.f32.xlu0 %v965_v39 }
0x1b64   :  { %986 = vrot.lane.b32.xlu0 %v3793_v26, %s3371_s26  ;;  %v4664_v26 = vld [vmem:[#allocation31_spill] sm:$0xff] }
0x1b65   :  { %v1538_v12 = vadd.f32 %v4665_v25, %v4664_v26  ;;  %v1334_v25 = vunpack.c.h.bf16 %v4323_v60 }
0x1b67   :  { %v1539_v22 = vadd.f32 %v4251_v4, %v1538_v12 }
0x1b69   :  { %v1540_v23 = vmax.f32 %v1539_v22, 0.0 }
0x1b6b   :  { %v1541_v61 = vadd.f32 %v4259_v16, %v1540_v23 }
0x1b6d   :  { %v1583_v59 = vand.u32 2147483647, %v1541_v61  ;;  %v1582_v12 = vmax.f32 %v1541_v61, 0.0  ;;  %v1581_v23 = vmul.f32 %v1541_v61, %v1334_v25 }
0x1b6f   :  { %v1584_v42 = vsub.f32 0.0, %v1583_v59 }
0x1b71   :  { %v1585_v7 = vmul.f32 1.442695, %v1584_v42 }
0x1b73   :  { %3186 = vpow2.f32 %v1585_v7  ;;  %v4668_v7 = vld [vmem:[#allocation26_spill] sm:$0xff] }
0x1b74   :  { %v1604_v60 = vmul.f32 %v4668_v7, %v4668_v7 }
0x1b79   :  { %v3187_v11 = vpop.eup %3186 }
0x1b7a   :  { %v1587_v37 = vadd.f32 1.0, %v3187_v11 }
0x1b7c   :  { %3188 = vlog2.f32 %v1587_v37 }
0x1b8e   :  { %1008 = vadd.xlane.f32.xlu0 %v1007_v8 }
0x1bc3   :  { %v967_v29 = vpop.xlane.xlu0 %966 }
0x1bc4   :  { %v968_v49 = vsub.f32 0.0, %v967_v29  ;;  %v4666_v29 = vld [vmem:[#allocation23_spill] sm:$0xff] }
0x1bc6   :  { %v2991_v63 = vadd.f32 -29.406033, %v968_v49  ;;  %v1324_v49 = vsel %vm116_vm0, %v3866_v34, 0.0 }
0x1bc8   :  { %v975_v13 = vsub.f32 %v2991_v63, %v974_v41 }
0x1bd6   :  { %v987_v50 = vpop.permute.xlu0 %986 }
0x1bd7   :  { %v989_v54 = vsel %vm116_vm0, %v987_v50, 0.0  ;;  %v1287_v50 = vmul.f32 %v4666_v29, %v4666_v29 }
0x1bd8   :  { %990 = vadd.xlane.f32.xlu2 %v989_v54  ;;  %v3189_v54 = vpop.eup %3188 }
0x1bd9   :  { %v1288_v40 = vsel %vm116_vm0, %v1287_v50, 0.0  ;;  %v4672_v50 = vld [vmem:[#allocation27_spill] sm:$0xff] }
0x1be0   :  { %1012 = vadd.xlane.f32.xlu2 %v1011_v18  ;;  %v1293_v18 = vsub.f32 %v4667_v56, %v3866_v34  ;;  %v2728_v56 = vld [vmem:[#allocation12 + $0x8] sm:$0xff] }
0x1bf8   :  { %1279 = vrot.lane.b32.xlu2 %v3861_v28, %s3371_s26  ;;  %v997_v28 = vpop.xlane.xlu1 %996 }
0x1bf9   :  { %v998_v51 = vmul.f32 0.5, %v997_v28  ;;  %v1605_v28 = vsel %vm116_vm0, %v1604_v60, 0.0 }
0x1c00   :  { %1298 = vrot.lane.b32.xlu2 %v3185_v36, %s3371_s26  ;;  %v1589_v36 = vmul.f32 0.6931472, %v3189_v54  ;;  %v2729_v54 = vld [vmem:[#allocation12 + $0x10] sm:$0xff] }
0x1c01   :  { %v1009_v15 = vpop.xlane.xlu0 %1008 }
0x1c02   :  { %v1590_v46 = vadd.f32 %v1589_v36, %v1582_v12 }
0x1c04   :  { %v1591_v59 = vsub.f32 %v1581_v23, %v1590_v46 }
0x1c06   :  { %v1592_v42 = vsel %vm148_vm1, %v1591_v59, 0.0 }
0x1c4b   :  { %v991_v43 = vpop.xlane.xlu2 %990 }
0x1c4c   :  { %v992_v44 = vsub.f32 0.0, %v991_v43  ;;  %v4669_v43 = vld [vmem:[#allocation28_spill] sm:$0xff] }
0x1c4e   :  { %v2992_v1 = vadd.f32 -29.406033, %v992_v44 }
0x1c50   :  { %v999_v27 = vsub.f32 %v2992_v1, %v998_v51 }
0x1c52   :  { %v1000_v31 = vsub.f32 %v975_v13, %v999_v27  ;;  %v1641_v13 = vsel %vm116_vm0, %v4669_v43, 0.0  ;;  %v2667_v27 = vpop.f32.mrf.mxu3 }
0x1c53   :  { %v1013_v14 = vpop.xlane.xlu2 %1012 }
0x1c54   :  { %v1001_v32 = vmul.f32 %v1000_v31, %v4331_v3 }
0x1c56   :  { %v1002_v52 = vsub.f32 %v1001_v32, %v4316_v62 }
0x1c58   :  { %1004 = vst.msk [vmem:[#allocation14 + $0x8] sm:$0xff] %vm682_vm2, %v1002_v52 }
0x1c59   :  { %1005 = vst.msk [vmem:[#allocation14 + $0x8] sm:$0xff] %vm684_vm3, %v1000_v31 }
0x1c5a   :  { %1006 = vst.msk [vmem:[#allocation14 + $0x8] sm:$0xff] %vm686_vm4, %v4316_v62 }
0x1c5b   :  { %1010 = vst.msk [vmem:[#allocation14 + $0x8] sm:$0xff] %vm691_vm5, %v1009_v15  ;;  %v1280_v39 = vpop.permute.xlu2 %1279 }
0x1c5c   :  { %1014 = vst.msk [vmem:[#allocation14 + $0x8] sm:$0xff] %vm696_vm6, %v1013_v14  ;;  %v1282_v8 = vsel %vm116_vm0, %v1280_v39, 0.0  ;;  %v4670_v14 = vld [vmem:[#allocation19_spill] sm:$0xff] }
0x1c5d   :  { %1283 = vadd.xlane.f32.xlu0 %v1282_v8  ;;  %v300_v11 = vadd.f32 %v4670_v14, %v3616_v47  ;;  %v4671_v8 = vld [vmem:[#allocation24_spill] sm:$0xff]  ;;  %v2730_v47 = vld [vmem:[#allocation12 + $0x18] sm:$0xff]  ;;  %v2761_v14 = vld [vmem:[#allocation11 + $0x30] sm:$0xff] }
0x1c5e   :  { %v1328_v29 = vsel %vm116_vm0, %v4671_v8, 0.0  ;;  %2746 = vmatpush.msra.mxu2 %v2730_v47  ;;  %2778 = vmatpush.msrb.mxu3 %v2761_v14  ;;  %v2758_v8 = vld [vmem:[#allocation11 + $0x18] sm:$0xff] }
0x1c5f   :  { %v2712_v32 = vadd.f32 %v2667_v27, %v300_v11  ;;  %v1611_v27 = vsub.f32 0.0, %v4669_v43  ;;  %v2762_v11 = vld [vmem:[#allocation11 + $0x38] sm:$0xff] }
0x1c60   :  { %2747 = vmatpush.msra.mxu2 %v2729_v54  ;;  %2798 = vmatpush.msra.mxu0 %v2762_v11  ;;  %v3015_v11 = vld [vmem:[%s4611_s1 + $0x10] sm:$0xff]  }
0x1c61   :  { %v4394_v52 = vmax.f32 %v2712_v32, 0.0 }
0x1c62   :  { %2748 = vmatpush.msra.mxu2 %v2728_v56 }
0x1c63   :  { %v1299_v33 = vpop.permute.xlu2 %1298  ;;  %v2715_v37 = vmul.f32 1.442695, %v4394_v52 }
0x1c64   :  { %v1301_v62 = vmul.f32 %v1299_v33, %v1293_v18  ;;  %v1277_v18 = vpop.xlane.xlu1 %1276 }
0x1c65   :  { %1289 = vadd.xlane.f32.xlu0 %v1288_v40  ;;  %3190 = vpow2.f32 %v2715_v37  ;;  %v2727_v40 = vld [vmem:[#allocation12] sm:$0xff] }
0x1c66   :  { %v1311_v26 = vmul.f32 %v1301_v62, %v1301_v62  ;;  %2749 = vmatpush.msra.mxu2 %v2727_v40  ;;  %v2759_v37 = vld [vmem:[#allocation11 + $0x20] sm:$0xff] }
0x1c67   :  { %2779 = vmatpush.msrb.mxu3 %v2759_v37 }
0x1c68   :  { %v1312_v22 = vsel %vm116_vm0, %v1311_v26, 0.0 }
0x1c69   :  { %1313 = vadd.xlane.f32.xlu2 %v1312_v22 }
0x1c6b   :  { %v3191_v15 = vpop.eup %3190 }
0x1c6c   :  { %v2721_v39 = vmul.f32 %v3191_v15, %v4361_v19  ;;  %v2760_v15 = vld [vmem:[#allocation11 + $0x28] sm:$0xff] }
0x1c6d   :  { %2799 = vmatpush.msra.mxu0 %v2760_v15 }
0x1c6f   :  { %2800 = vmatpush.msra.mxu0 %v2758_v8 }
0x1c71   :  { %1593 = vadd.xlane.f32.xlu2 %v1592_v42  ;;  %v2647_v42 = vpop.f32.mrf.mxu2 }
0x1c79   :  { %1303 = vrot.lane.b32.xlu0 %v3866_v34, %s3371_s26 }
0x1ca3   :  { %1325 = vadd.xlane.f32.xlu0 %v1324_v49  ;;  %v2710_v49 = vadd.f32 %v4152_v17, %v2647_v42 }
0x1cab   :  { %1606 = vadd.xlane.f32.xlu0 %v1605_v28  ;;  %v4412_v28 = vmax.f32 %v2710_v49, 0.0 }
0x1cbf   :  { %1620 = vrot.lane.b32.xlu0 %v4669_v43, %s3371_s26 }
0x1cd0   :  { %v1284_v61 = vpop.xlane.xlu0 %1283 }
0x1cd1   :  { %v1285_v41 = vsub.f32 0.0, %v1284_v61  ;;  %v4416_v61 = vadd.f32 %v4394_v52, %v4412_v28 }
0x1cd3   :  { %v3002_v44 = vadd.f32 -29.406033, %v1285_v41 }
0x1cd8   :  { %v1290_v63 = vpop.xlane.xlu0 %1289 }
0x1cd9   :  { %v1291_v51 = vmul.f32 0.5, %v1290_v63 }
0x1cdb   :  { %v1292_v1 = vsub.f32 %v3002_v44, %v1291_v51  ;;  %v4673_v44 = vld [vmem:[#allocation29_spill] sm:$0xff] }
0x1cdc   :  { %v1314_v19 = vpop.xlane.xlu2 %1313  ;;  %v1645_v17 = vsel %vm116_vm0, %v4673_v44, 0.0  ;;  %v4674_v51 = vld [vmem:[#allocation33_spill] sm:$0xff] }
0x1cdd   :  { %v1315_v26 = vmul.f32 0.5, %v1314_v19  ;;  %v4675_v19 = vld [vmem:[#allocation38_spill] sm:$0xff] }
0x1ce9   :  { %1642 = vadd.xlane.f32.xlu0 %v1641_v13 }
0x1ceb   :  { %v1304_v34 = vpop.permute.xlu0 %1303 }
0x1cec   :  { %v1306_v31 = vsel %vm116_vm0, %v1304_v34, 0.0 }
0x1ced   :  { %1307 = vadd.xlane.f32.xlu1 %v1306_v31  ;;  %v1612_v31 = vmul.f32 1.442695, %v1611_v27  ;;  %v4677_v27 = vld [vmem:[#allocation30_spill] sm:$0xff] }
0x1cef   :  { %3192 = vpow2.f32 %v1612_v31  ;;  %v1610_v31 = vsub.f32 %v4677_v27, %v4669_v43  ;;  %v4678_v43 = vld [vmem:[#allocation32_spill] sm:$0xff] }
0x1cf5   :  { %v3193_v32 = vpop.eup %3192 }
0x1d06   :  { %2723 = vrot.lane.b32.xlu1 %v2721_v39, %s3371_s26  ;;  %v2757_v39 = vld [vmem:[#allocation11 + $0x10] sm:$0xff] }
0x1d07   :  { %2780 = vmatpush.msrb.mxu3 %v2757_v39  ;;  %v1651_v39 = vunpack.c.l.bf16 %v3015_v11 }
0x1d16   :  { %v1326_v33 = vpop.xlane.xlu0 %1325 }
0x1d1e   :  { %v4403_v12 = vpop.xlane.xlu0 %1606 }
0x1d30   :  { %1329 = vadd.xlane.f32.xlu1 %v1328_v29  ;;  %v2755_v29 = vld [vmem:[#allocation11] sm:$0xff] }
0x1d31   :  { %v1621_v7 = vpop.permute.xlu0 %1620  ;;  %2781 = vmatpush.msrb.mxu3 %v2755_v29 }
0x1d32   :  { %v1623_v60 = vsel %vm116_vm0, %v1621_v7, 0.0 }
0x1d49   :  { %1596 = vrot.lane.b32.xlu1 %v4672_v50, %s3371_s26  ;;  %v2756_v50 = vld [vmem:[#allocation11 + $0x8] sm:$0xff] }
0x1d4a   :  { %2801 = vmatpush.msra.mxu0 %v2756_v50 }
0x1d60   :  { %v1308_v62 = vpop.xlane.xlu1 %1307 }
0x1d61   :  { %v1309_v36 = vsub.f32 0.0, %v1308_v62  ;;  %v1855_v62 = vadd.f32 %v4182_v2, %v4675_v19  ;;  %v4445_v2 = vpop.xlane.xlu2 %1593  ;;  %v2172_v19 = vadd.f32 %v4240_v5, %v4184_v10  ;;  %v4679_v10 = vld [vmem:[#allocation36_spill] sm:$0xff] }
0x1d63   :  { %v3003_v25 = vadd.f32 -29.406033, %v1309_v36 }
0x1d65   :  { %v1316_v22 = vsub.f32 %v3003_v25, %v1315_v26  ;;  %v1856_v26 = vadd.f32 %v4251_v4, %v1855_v62  ;;  %v4676_v25 = vld [vmem:[#allocation34_spill] sm:$0xff]  ;;  %v2173_v62 = vadd.f32 %v4251_v4, %v2172_v19 }
0x1d66   :  { %v1927_v5 = vsub.f32 %v4679_v10, %v4676_v25 }
0x1d67   :  { %v1317_v46 = vsub.f32 %v1292_v1, %v1316_v22  ;;  %v1928_v22 = vsub.f32 0.0, %v4676_v25 }
0x1d69   :  { %v1318_v23 = vmul.f32 %v1317_v46, %v4331_v3 }
0x1d6b   :  { %v1319_v59 = vsub.f32 %v1318_v23, %v1277_v18  ;;  %v1929_v23 = vmul.f32 1.442695, %v1928_v22 }
0x1d6d   :  { %1321 = vst.msk [vmem:[#allocation14 + $0x10] sm:$0xff] %vm682_vm2, %v1319_v59  ;;  %3194 = vpow2.f32 %v1929_v23 }
0x1d6e   :  { %1322 = vst.msk [vmem:[#allocation14 + $0x10] sm:$0xff] %vm684_vm3, %v1317_v46  ;;  %v1857_v46 = vmax.f32 %v1856_v26, 0.0 }
0x1d6f   :  { %1323 = vst.msk [vmem:[#allocation14 + $0x10] sm:$0xff] %vm686_vm4, %v1277_v18 }
0x1d70   :  { %1327 = vst.msk [vmem:[#allocation14 + $0x10] sm:$0xff] %vm691_vm5, %v1326_v33 }
0x1d73   :  { %1624 = vadd.xlane.f32.xlu1 %v1623_v60  ;;  %v3195_v42 = vpop.eup %3194 }
0x1d78   :  { %v2724_v41 = vpop.permute.xlu1 %2723 }
0x1d79   :  { %v4419_v63 = vadd.f32 %v2724_v41, %v4416_v61 }
0x1d7b   :  { %1646 = vadd.xlane.f32.xlu1 %v1645_v17  ;;  %3053 = vmatmul.msk.f32.vlgmr.msra.gmra.mxu2 %vm116_vm0, %v4419_v63 }
0x1d94   :  { %1913 = vrot.lane.b32.xlu1 %v4674_v51, %s3371_s26  ;;  %v1608_v51 = vmul.f32 0.5, %v4403_v12 }
0x1da3   :  { %v1330_v1 = vpop.xlane.xlu1 %1329 }
0x1da4   :  { %1331 = vst.msk [vmem:[#allocation14 + $0x10] sm:$0xff] %vm696_vm6, %v1330_v1 }
0x1dbb   :  { %v1597_v13 = vpop.permute.xlu1 %1596 }
0x1dbc   :  { %v1599_v34 = vsel %vm116_vm0, %v1597_v13, 0.0 }
0x1dbd   :  { %1600 = vadd.xlane.f32.xlu2 %v1599_v34 }
0x1dd5   :  { %1615 = vrot.lane.b32.xlu2 %v3193_v32, %s3371_s26 }
0x1de6   :  { %v4431_v47 = vpop.xlane.xlu1 %1624 }
0x1dee   :  { %v4433_v54 = vpop.xlane.xlu1 %1646 }
0x1dfe   :  { %v2751_v56 = vpop.f32.mrf.mxu2 }
0x1dff   :  { %v2752_v18 = vadd.f32 %v4173_v35, %v2751_v56  ;;  %v1858_v35 = vadd.f32 %v4259_v16, %v1857_v46 }
0x1e01   :  { %v2754_v40 = vmax.f32 %v2752_v18, 0.0  ;;  %v1900_v59 = vand.u32 2147483647, %v1858_v35  ;;  %v1899_v8 = vmax.f32 %v1858_v35, 0.0  ;;  %v1898_v12 = vmul.f32 %v1858_v35, %v1651_v39  ;;  %v1643_v35 = vpop.xlane.xlu0 %1642 }
0x1e02   :  { %v1626_v39 = vsub.f32 0.0, %v4431_v47 }
0x1e03   :  { %3054 = vmatmul.msk.f32.vlgmr.msrb.gmra.mxu3 %vm116_vm0, %v2754_v40  ;;  %3055 = vmatmul.msk.f32.vlgmr.msra.gmra.mxu0 %vm116_vm0, %v2754_v40  ;;  %v1901_v49 = vsub.f32 0.0, %v1900_v59  ;;  %v1921_v40 = vmul.f32 %v4678_v43, %v4678_v43 }
0x1e05   :  { %v1902_v7 = vmul.f32 1.442695, %v1901_v49 }
0x1e06   :  { %v1914_v33 = vpop.permute.xlu1 %1913 }
0x1e07   :  { %v1916_v36 = vsel %vm116_vm0, %v1914_v33, 0.0  ;;  %3196 = vpow2.f32 %v1902_v7  ;;  %v1922_v33 = vsel %vm116_vm0, %v1921_v40, 0.0 }
0x1e08   :  { %1917 = vadd.xlane.f32.xlu0 %v1916_v36  ;;  %v2174_v36 = vmax.f32 %v2173_v62, 0.0 }
0x1e0a   :  { %v2175_v26 = vadd.f32 %v4259_v16, %v2174_v36  ;;  %v4680_v36 = vld [vmem:[#allocation35_spill] sm:$0xff] }
0x1e0c   :  { %v2217_v22 = vand.u32 2147483647, %v2175_v26 }
0x1e0d   :  { %v3197_v60 = vpop.eup %3196 }
0x1e0e   :  { %v1904_v41 = vadd.f32 1.0, %v3197_v60  ;;  %v2218_v46 = vsub.f32 0.0, %v2217_v22 }
0x1e10   :  { %3198 = vlog2.f32 %v1904_v41  ;;  %v2219_v23 = vmul.f32 1.442695, %v2218_v46  ;;  %v1958_v41 = vsel %vm116_vm0, %v4676_v25, 0.0 }
0x1e12   :  { %3200 = vpow2.f32 %v2219_v23 }
0x1e16   :  { %v3199_v34 = vpop.eup %3198 }
0x1e17   :  { %v1906_v37 = vmul.f32 0.6931472, %v3199_v34  ;;  %v2216_v34 = vmax.f32 %v2175_v26, 0.0 }
0x1e18   :  { %v3201_v59 = vpop.eup %3200 }
0x1e19   :  { %v1907_v50 = vadd.f32 %v1906_v37, %v1899_v8 }
0x1e1b   :  { %v1908_v56 = vsub.f32 %v1898_v12, %v1907_v50 }
0x1e1c   :  { %1932 = vrot.lane.b32.xlu0 %v3195_v42, %s3371_s26  ;;  %v2221_v42 = vadd.f32 1.0, %v3201_v59 }
0x1e1d   :  { %v1909_v18 = vsel %vm148_vm1, %v1908_v56, 0.0 }
0x1e1e   :  { %3202 = vlog2.f32 %v2221_v42 }
0x1e24   :  { %v3203_v7 = vpop.eup %3202 }
0x1e30   :  { %v1601_v44 = vpop.xlane.xlu2 %1600 }
0x1e31   :  { %v1602_v17 = vsub.f32 0.0, %v1601_v44 }
0x1e33   :  { %v3013_v1 = vadd.f32 -29.406033, %v1602_v17  ;;  %v2223_v17 = vmul.f32 0.6931472, %v3203_v7 }
0x1e35   :  { %v1609_v13 = vsub.f32 %v3013_v1, %v1608_v51  ;;  %v1968_v1 = vunpack.c.h.bf16 %v3015_v11  ;;  %v3014_v11 = vadd.f32 -29.406033, %v1626_v39 }
0x1e38   :  { %v1616_v14 = vpop.permute.xlu2 %1615 }
0x1e39   :  { %v1618_v32 = vmul.f32 %v1616_v14, %v1610_v31  ;;  %v2224_v31 = vadd.f32 %v2223_v17, %v2216_v34  ;;  %v2215_v14 = vmul.f32 %v2175_v26, %v1968_v1  ;;  %v1962_v26 = vsel %vm116_vm0, %v4680_v36, 0.0 }
0x1e3b   :  { %v1628_v15 = vmul.f32 %v1618_v32, %v1618_v32  ;;  %v2225_v32 = vsub.f32 %v2215_v14, %v2224_v31  ;;  %v2555_v14 = vmul.f32 %v4199_v6, %v4199_v6 }
0x1e3d   :  { %v1629_v29 = vsel %vm116_vm0, %v1628_v15, 0.0  ;;  %v2226_v37 = vsel %vm148_vm1, %v2225_v32, 0.0  ;;  %v2238_v15 = vmul.f32 %v4119_v24, %v4119_v24  ;;  %v2556_v39 = vsel %vm116_vm0, %v2555_v14, 0.0 }
0x1e3e   :  { %1630 = vadd.xlane.f32.xlu2 %v1629_v29 }
0x1e46   :  { %1910 = vadd.xlane.f32.xlu2 %v1909_v18 }
0x1e4e   :  { %1923 = vadd.xlane.f32.xlu2 %v1922_v33 }
0x1e66   :  { %1937 = vrot.lane.b32.xlu2 %v4676_v25, %s3371_s26  ;;  %v2239_v25 = vsel %vm116_vm0, %v2238_v15, 0.0 }
0x1e7b   :  { %v1918_v49 = vpop.xlane.xlu0 %1917 }
0x1e7c   :  { %v1919_v24 = vsub.f32 0.0, %v1918_v49 }
0x1e8e   :  { %v1933_v60 = vpop.permute.xlu0 %1932 }
0x1e8f   :  { %v1935_v44 = vmul.f32 %v1933_v60, %v1927_v5  ;;  %1959 = vadd.xlane.f32.xlu2 %v1958_v41 }
0x1e91   :  { %v1945_v51 = vmul.f32 %v1935_v44, %v1935_v44 }
0x1e93   :  { %v1946_v27 = vsel %vm116_vm0, %v1945_v51, 0.0  ;;  %v2279_v51 = vsel %vm116_vm0, %v4159_v55, 0.0 }
0x1e94   :  { %1947 = vadd.xlane.f32.xlu0 %v1946_v27 }
0x1e9c   :  { %2227 = vadd.xlane.f32.xlu0 %v2226_v37 }
0x1ea4   :  { %2240 = vadd.xlane.f32.xlu0 %v2239_v25 }
0x1eb1   :  { %v1631_v8 = vpop.xlane.xlu2 %1630 }
0x1eb2   :  { %v1632_v29 = vmul.f32 0.5, %v1631_v8 }
0x1eb4   :  { %v1633_v50 = vsub.f32 %v3014_v11, %v1632_v29 }
0x1eb6   :  { %v1634_v12 = vsub.f32 %v1609_v13, %v1633_v50  ;;  %v3024_v13 = vadd.f32 -29.406033, %v1919_v24 }
0x1eb8   :  { %v1635_v56 = vmul.f32 %v1634_v12, %v4331_v3  ;;  %2254 = vrot.lane.b32.xlu0 %v4155_v48, %s3371_s26 }
0x1eb9   :  { %v1911_v18 = vpop.xlane.xlu2 %1910 }
0x1eba   :  { %v1636_v43 = vsub.f32 %v1635_v56, %v4445_v2 }
0x1ebc   :  { %1638 = vst.msk [vmem:[#allocation14 + $0x18] sm:$0xff] %vm682_vm2, %v1636_v43  ;;  %v2245_v43 = vsub.f32 0.0, %v4155_v48 }
0x1ebd   :  { %1639 = vst.msk [vmem:[#allocation14 + $0x18] sm:$0xff] %vm684_vm3, %v1634_v12 }
0x1ebe   :  { %1640 = vst.msk [vmem:[#allocation14 + $0x18] sm:$0xff] %vm686_vm4, %v4445_v2  ;;  %v2466_v2 = vpop.f32.mrf.mxu0  ;;  %v2246_v24 = vmul.f32 1.442695, %v2245_v43 }
0x1ebf   :  { %1644 = vst.msk [vmem:[#allocation14 + $0x18] sm:$0xff] %vm691_vm5, %v1643_v35  ;;  %v2489_v22 = vadd.f32 %v2466_v2, %v4242_v9 }
0x1ec0   :  { %1648 = vst.msk [vmem:[#allocation14 + $0x18] sm:$0xff] %vm696_vm6, %v4433_v54 }
0x1ec1   :  { %v1924_v47 = vpop.xlane.xlu2 %1923  ;;  %v2490_v54 = vadd.f32 %v4251_v4, %v2489_v22  ;;  %v4499_v4 = vld [vmem:[%s4611_s1 + $0x18] sm:$0xff]  }
0x1ec2   :  { %v1925_v40 = vmul.f32 0.5, %v1924_v47  ;;  %v2285_v44 = vunpack.c.l.bf16 %v4499_v4 }
0x1ec3   :  { %v2491_v46 = vmax.f32 %v2490_v54, 0.0 }
0x1ec4   :  { %v1926_v33 = vsub.f32 %v3024_v13, %v1925_v40  ;;  %v2275_v13 = vsel %vm116_vm0, %v4155_v48, 0.0 }
0x1ec5   :  { %v2492_v23 = vadd.f32 %v4259_v16, %v2491_v46 }
0x1ec7   :  { %v2534_v35 = vand.u32 2147483647, %v2492_v23  ;;  %v2533_v17 = vmax.f32 %v2492_v23, 0.0  ;;  %v2532_v34 = vmul.f32 %v2492_v23, %v2285_v44 }
0x1ec9   :  { %v1938_v19 = vpop.permute.xlu2 %1937  ;;  %v2535_v42 = vsub.f32 0.0, %v2534_v35 }
0x1eca   :  { %v1940_v62 = vsel %vm116_vm0, %v1938_v19, 0.0 }
0x1ecb   :  { %1941 = vadd.xlane.f32.xlu1 %v1940_v62  ;;  %v2536_v49 = vmul.f32 1.442695, %v2535_v42 }
0x1ecd   :  { %3204 = vpow2.f32 %v2536_v49 }
0x1ed3   :  { %1963 = vadd.xlane.f32.xlu1 %v1962_v26  ;;  %v3205_v10 = vpop.eup %3204  ;;  %v2244_v26 = vsub.f32 %v4162_v20, %v4155_v48  ;;  %v2783_v48 = vpop.f32.mrf.mxu3 }
0x1ed4   :  { %v2538_v60 = vadd.f32 1.0, %v3205_v10  ;;  %v2687_v20 = vpop.f32.mrf.mxu0 }
0x1ed6   :  { %3206 = vlog2.f32 %v2538_v60  ;;  %v2596_v60 = vsel %vm116_vm0, %v4230_v38, 0.0 }
0x1ed7   :  { %3208 = vpow2.f32 %v2246_v24 }
0x1edc   :  { %v3207_v9 = vpop.eup %3206  ;;  %v2803_v44 = vpop.f32.mrf.mxu0 }
0x1edd   :  { %v2540_v16 = vmul.f32 0.6931472, %v3207_v9  ;;  %v3209_v47 = vpop.eup %3208  ;;  %v4681_v9 = vld [vmem:[#allocation22_spill] sm:$0xff] }
0x1edf   :  { %v2541_v1 = vadd.f32 %v2540_v16, %v2533_v17  ;;  %v341_v16 = vadd.f32 %v4681_v9, %v3699_v21 }
0x1ee1   :  { %v2542_v27 = vsub.f32 %v2532_v34, %v2541_v1  ;;  %v3229_v34 = vld [vmem:[%s4622_s12] ss:$0 sm:$0xff] }
0x1ee3   :  { %v2543_v31 = vsel %vm148_vm1, %v2542_v27, 0.0 }
0x1eec   :  { %2230 = vrot.lane.b32.xlu1 %v4145_v53, %s3371_s26 }
0x1f02   :  { %v1960_v50 = vpop.xlane.xlu2 %1959 }
0x1f07   :  { %v1948_v59 = vpop.xlane.xlu0 %1947 }
0x1f08   :  { %v1949_v15 = vmul.f32 0.5, %v1948_v59 }
0x1f0f   :  { %v4493_v7 = vpop.xlane.xlu0 %2227 }
0x1f17   :  { %v2241_v5 = vpop.xlane.xlu0 %2240 }
0x1f18   :  { %v2242_v19 = vmul.f32 0.5, %v2241_v5  ;;  %v2806_v5 = vadd.f32 %v2783_v48, %v2687_v20 }
0x1f2a   :  { %v2255_v53 = vpop.permute.xlu0 %2254 }
0x1f2b   :  { %v2257_v41 = vsel %vm116_vm0, %v2255_v53, 0.0 }
0x1f2c   :  { %2258 = vadd.xlane.f32.xlu1 %v2257_v41  ;;  %v2707_v41 = vpop.f32.mrf.mxu1 }
0x1f2d   :  { %v2810_v17 = vadd.f32 %v2707_v41, %v341_v16 }
0x1f2f   :  { %v2811_v1 = vadd.f32 %v2810_v17, %v2803_v44  ;;  %v2878_v17 = vsub.f32 %v4419_v63, %v4412_v28 }
0x1f31   :  { %3210 = vtanh.f32 %v2811_v1 }
0x1f34   :  { %2280 = vadd.xlane.f32.xlu1 %v2279_v51 }
0x1f3c   :  { %2544 = vadd.xlane.f32.xlu1 %v2543_v31  ;;  %v3211_v31 = vpop.eup %3210 }
0x1f3e   :  { %v1942_v32 = vpop.xlane.xlu1 %1941 }
0x1f3f   :  { %v1943_v37 = vsub.f32 0.0, %v1942_v32 }
0x1f41   :  { %v3025_v25 = vadd.f32 -29.406033, %v1943_v37 }
0x1f43   :  { %v1950_v8 = vsub.f32 %v3025_v25, %v1949_v15 }
0x1f44   :  { %2557 = vadd.xlane.f32.xlu1 %v2556_v39 }
0x1f45   :  { %v1951_v11 = vsub.f32 %v1926_v33, %v1950_v8 }
0x1f46   :  { %v1964_v6 = vpop.xlane.xlu1 %1963 }
0x1f47   :  { %v1952_v55 = vmul.f32 %v1951_v11, %v4331_v3 }
0x1f49   :  { %v1953_v29 = vsub.f32 %v1952_v55, %v1911_v18 }
0x1f4b   :  { %1955 = vst.msk [vmem:[#allocation14 + $0x20] sm:$0xff] %vm682_vm2, %v1953_v29 }
0x1f4c   :  { %1956 = vst.msk [vmem:[#allocation14 + $0x20] sm:$0xff] %vm684_vm3, %v1951_v11 }
0x1f4d   :  { %1957 = vst.msk [vmem:[#allocation14 + $0x20] sm:$0xff] %vm686_vm4, %v1911_v18  ;;  %v2592_v18 = vsel %vm116_vm0, %v4226_v57, 0.0 }
0x1f4e   :  { %1961 = vst.msk [vmem:[#allocation14 + $0x20] sm:$0xff] %vm691_vm5, %v1960_v50 }
0x1f4f   :  { %1965 = vst.msk [vmem:[#allocation14 + $0x20] sm:$0xff] %vm696_vm6, %v1964_v6  ;;  %v2602_v6 = vunpack.c.h.bf16 %v4499_v4 }
0x1f5d   :  { %2571 = vrot.lane.b32.xlu1 %v4226_v57, %s3371_s26 }
0x1f5e   :  { %v2231_v12 = vpop.permute.xlu1 %2230 }
0x1f5f   :  { %v2233_v56 = vsel %vm116_vm0, %v2231_v12, 0.0 }
0x1f60   :  { %2234 = vadd.xlane.f32.xlu2 %v2233_v56 }
0x1f78   :  { %2249 = vrot.lane.b32.xlu2 %v3209_v47, %s3371_s26 }
0x1f87   :  { %2593 = vadd.xlane.f32.xlu1 %v2592_v18 }
0x1f9f   :  { %v2259_v23 = vpop.xlane.xlu1 %2258 }
0x1fa0   :  { %v2260_v21 = vsub.f32 0.0, %v2259_v23 }
0x1fa1   :  { %2276 = vadd.xlane.f32.xlu2 %v2275_v13 }
0x1fa2   :  { %v3036_v8 = vadd.f32 -29.406033, %v2260_v21 }
0x1fa7   :  { %v2281_v35 = vpop.xlane.xlu1 %2280 }
0x1faf   :  { %v4528_v59 = vpop.xlane.xlu1 %2544 }
0x1fb7   :  { %v4530_v42 = vpop.xlane.xlu1 %2557 }
0x1fcf   :  { %v2572_v49 = vpop.permute.xlu1 %2571 }
0x1fd0   :  { %v2574_v10 = vsel %vm116_vm0, %v2572_v49, 0.0 }
0x1fd3   :  { %v2235_v40 = vpop.xlane.xlu2 %2234 }
0x1fd4   :  { %v2236_v33 = vsub.f32 0.0, %v2235_v40 }
0x1fd6   :  { %v3035_v62 = vadd.f32 -29.406033, %v2236_v33 }
0x1fd8   :  { %v2243_v36 = vsub.f32 %v3035_v62, %v2242_v19  ;;  %v2879_v19 = vsub.f32 0.0, %v4412_v28 }
0x1fda   :  { %v2880_v62 = vmul.f32 1.442695, %v2879_v19 }
0x1fdb   :  { %v2250_v2 = vpop.permute.xlu2 %2249 }
0x1fdc   :  { %v2252_v22 = vmul.f32 %v2250_v2, %v2244_v26 }
0x1fde   :  { %v2262_v54 = vmul.f32 %v2252_v22, %v2252_v22 }
0x1fe0   :  { %v2263_v46 = vsel %vm116_vm0, %v2262_v54, 0.0 }
0x1fe1   :  { %2264 = vadd.xlane.f32.xlu0 %v2263_v46  ;;  %v3056_v46 = vmul.f32 -1.442695, %v2811_v1 }
0x1ff5   :  { %2547 = vrot.lane.b32.xlu0 %v4219_v58, %s3371_s26  ;;  %v3228_v58 = vld [vmem:[%s4621_s11] ss:$0 sm:$0xff]  ;;  %s3372_s11 = smov [#allocation14]  }
0x1ff6   :  { %v2807_v53 = vadd.f32 %v3228_v58, %v2806_v5  ;;  %s2931_s12 = sshll.u32 %s3372_s11, 4  ;;  %s2932_s12 = int_to_ptr.vmem [resolvable:$true] %s2931_s12 }
0x1ff8   :  { %v2808_v51 = vmax.f32 %v2807_v53, 0.0 }
0x1ffa   :  { %v2809_v27 = vadd.f32 %v3229_v34, %v2808_v51 }
0x1ffc   :  { %v2851_v38 = vand.u32 2147483647, %v2809_v27  ;;  %v2850_v12 = vmax.f32 %v2809_v27, 0.0  ;;  %v2849_v47 = vmul.f32 %v2809_v27, %v2602_v6 }
0x1ffe   :  { %v2852_v14 = vsub.f32 0.0, %v2851_v38 }
0x2000   :  { %v2853_v32 = vmul.f32 1.442695, %v2852_v14 }
0x2002   :  { %3212 = vpow2.f32 %v2853_v32 }
0x2008   :  { %v3213_v37 = vpop.eup %3212 }
0x2009   :  { %v2855_v15 = vadd.f32 1.0, %v3213_v37 }
0x200b   :  { %3214 = vlog2.f32 %v2855_v15 }
0x200c   :  { %3216 = vpow2.f32 %v2880_v62 }
0x2011   :  { %v3215_v39 = vpop.eup %3214 }
0x2012   :  { %v2857_v29 = vmul.f32 0.6931472, %v3215_v39  ;;  %v3217_v2 = vpop.eup %3216 }
0x2014   :  { %v2858_v43 = vadd.f32 %v2857_v29, %v2850_v12  ;;  %v2277_v13 = vpop.xlane.xlu2 %2276 }
0x2016   :  { %v2859_v18 = vsub.f32 %v2849_v47, %v2858_v43 }
0x2018   :  { %v2860_v4 = vsel %vm148_vm1, %v2859_v18, 0.0 }
0x201f   :  { %2575 = vadd.xlane.f32.xlu0 %v2574_v10  ;;  %v2559_v10 = vmul.f32 0.5, %v4530_v42 }
0x2027   :  { %2597 = vadd.xlane.f32.xlu0 %v2596_v60  ;;  %v2561_v60 = vsub.f32 %v4233_v45, %v4226_v57 }
0x203b   :  { %2834 = vrot.lane.b32.xlu0 %v3211_v31, %s3362_s25 }
0x2054   :  { %v2265_v25 = vpop.xlane.xlu0 %2264 }
0x2055   :  { %v2266_v11 = vmul.f32 0.5, %v2265_v25  ;;  %v2872_v25 = vmul.f32 %v4298_v30, %v4298_v30  ;;  %v2594_v30 = vpop.xlane.xlu1 %2593 }
0x2057   :  { %v2267_v55 = vsub.f32 %v3036_v8, %v2266_v11  ;;  %v2873_v39 = vsel %vm116_vm0, %v2872_v25, 0.0 }
0x2059   :  { %v2268_v50 = vsub.f32 %v2243_v36, %v2267_v55  ;;  %v2562_v36 = vsub.f32 0.0, %v4226_v57 }
0x205b   :  { %v2269_v56 = vmul.f32 %v2268_v50, %v4331_v3  ;;  %v2563_v26 = vmul.f32 1.442695, %v2562_v36 }
0x205d   :  { %v2270_v24 = vsub.f32 %v2269_v56, %v4493_v7  ;;  %3218 = vpow2.f32 %v2563_v26 }
0x205e   :  { %3220 = vpow2.f32 %v3056_v46 }
0x205f   :  { %2272 = vst.msk [vmem:[#allocation14 + $0x28] sm:$0xff] %vm682_vm2, %v2270_v24 }
0x2060   :  { %2273 = vst.msk [vmem:[#allocation14 + $0x28] sm:$0xff] %vm684_vm3, %v2268_v50 }
0x2061   :  { %2274 = vst.msk [vmem:[#allocation14 + $0x28] sm:$0xff] %vm686_vm4, %v4493_v7 }
0x2062   :  { %2278 = vst.msk [vmem:[#allocation14 + $0x28] sm:$0xff] %vm691_vm5, %v2277_v13 }
0x2063   :  { %2282 = vst.msk [vmem:[#allocation14 + $0x28] sm:$0xff] %vm696_vm6, %v2281_v35  ;;  %v3219_v7 = vpop.eup %3218 }
0x2064   :  { %v3221_v58 = vpop.eup %3220 }
0x2065   :  { %2861 = vadd.xlane.f32.xlu0 %v2860_v4  ;;  %v2815_v9 = vadd.f32 1.0, %v3221_v58  ;;  %v2909_v4 = vsel %vm116_vm0, %v4412_v28, 0.0 }
0x2067   :  { %v2548_v40 = vpop.permute.xlu0 %2547  ;;  %3222 = vrcp.f32 %v2815_v9  ;;  %v2827_v14 = vand.u32 2147483648, %v2815_v9  ;;  %vm2821_vm7 = vweird.f32 %v2815_v9  ;;  %v2825_v32 = vand.u32 2147483647, %v2815_v9 }
0x2068   :  { %v2550_v33 = vsel %vm116_vm0, %v2548_v40, 0.0 }
0x2069   :  { %2551 = vadd.xlane.f32.xlu2 %v2550_v33  ;;  %v2828_v37 = vor.u32 1.1754944e-38, %v2827_v14  ;;  %vm2826_vm9 = vcmp.eq.f32.partialorder %v2825_v32, 8.507059e+37 }
0x206d   :  { %v3223_v27 = vpop.eup %3222 }
0x206e   :  { %v2817_v57 = vmul.f32 %v3223_v27, %v2815_v9  ;;  %vm2822_vm1 = vweird.f32 %v3223_v27 }
0x206f   :  { %vm2823_vm8 = vmor %vm2821_vm7, %vm2822_vm1 }
0x2070   :  { %v2818_v45 = vsub.f32 1.0, %v2817_v57 }
0x2072   :  { %v2819_v38 = vmul.f32 %v3223_v27, %v2818_v45 }
0x2074   :  { %v2820_v31 = vadd.f32 %v3223_v27, %v2819_v38 }
0x2076   :  { %v2824_v63 = vsel %vm2823_vm8, %v3223_v27, %v2820_v31 }
0x2077   :  { %v2829_v15 = vsel %vm2826_vm9, %v2828_v37, %v2824_v63 }
0x2078   :  { %v2832_v40 = vmul.f32 %v2829_v15, %v4276_v0 }
0x2079   :  { %2883 = vrot.lane.b32.xlu0 %v3217_v2, %s3371_s26 }
0x2081   :  { %2566 = vrot.lane.b32.xlu2 %v3219_v7, %s3371_s26 }
0x2092   :  { %v2576_v22 = vpop.xlane.xlu0 %2575 }
0x2093   :  { %v2577_v8 = vsub.f32 0.0, %v2576_v22 }
0x209a   :  { %v2598_v54 = vpop.xlane.xlu0 %2597 }
0x20ad   :  { %v2835_v23 = vpop.permute.xlu0 %2834 }
0x20ae   :  { %v2837_v21 = vmul.f32 %v2835_v23, %v2829_v15 }
0x20d8   :  { %v4560_v5 = vpop.xlane.xlu0 %2861 }
0x20dc   :  { %v2552_v35 = vpop.xlane.xlu2 %2551 }
0x20dd   :  { %v2553_v49 = vsub.f32 0.0, %v2552_v35 }
0x20df   :  { %v3046_v48 = vadd.f32 -29.406033, %v2553_v49 }
0x20e1   :  { %v2560_v20 = vsub.f32 %v3046_v48, %v2559_v10 }
0x20e4   :  { %v2567_v53 = vpop.permute.xlu2 %2566 }
0x20e5   :  { %v2569_v41 = vmul.f32 %v2567_v53, %v2561_v60 }
0x20e7   :  { %v2579_v16 = vmul.f32 %v2569_v41, %v2569_v41 }
0x20e9   :  { %v2580_v44 = vsel %vm116_vm0, %v2579_v16, 0.0 }
0x20ea   :  { %2581 = vadd.xlane.f32.xlu2 %v2580_v44 }
0x20eb   :  { %v2884_v42 = vpop.permute.xlu0 %2883 }
0x20ec   :  { %v2886_v51 = vmul.f32 %v2884_v42, %v2878_v17 }
0x20ee   :  { %v2896_v1 = vmul.f32 %v2886_v51, %v2886_v51 }
0x20f0   :  { %v2897_v34 = vsel %vm116_vm0, %v2896_v1, 0.0 }
0x20f1   :  { %2898 = vadd.xlane.f32.xlu0 %v2897_v34 }
0x2102   :  { %2864 = vrot.lane.b32.xlu2 %v4394_v52, %s3371_s26  ;;  %v3047_v52 = vadd.f32 -29.406033, %v2577_v8 }
0x210a   :  { %2839 = vrot.lane.b32.xlu2 %v2837_v21, %s3360_s22 }
0x2133   :  { %2874 = vadd.xlane.f32.xlu2 %v2873_v39 }
0x214b   :  { %2888 = vrot.lane.b32.xlu2 %v4412_v28, %s3371_s26 }
0x215d   :  { %v2582_v11 = vpop.xlane.xlu2 %2581 }
0x215e   :  { %v2583_v55 = vmul.f32 0.5, %v2582_v11 }
0x2160   :  { %v2584_v29 = vsub.f32 %v3047_v52, %v2583_v55 }
0x2162   :  { %v2585_v50 = vsub.f32 %v2560_v20, %v2584_v29 }
0x2164   :  { %v2586_v6 = vmul.f32 %v2585_v50, %v4331_v3  ;;  %v2899_v26 = vpop.xlane.xlu0 %2898 }
0x2165   :  { %v2865_v12 = vpop.permute.xlu2 %2864  ;;  %v2900_v22 = vmul.f32 0.5, %v2899_v26 }
0x2166   :  { %v2587_v56 = vsub.f32 %v2586_v6, %v4528_v59  ;;  %v2867_v43 = vsel %vm116_vm0, %v2865_v12, 0.0 }
0x2167   :  { %2868 = vadd.xlane.f32.xlu1 %v2867_v43 }
0x2168   :  { %2589 = vst.msk [vmem:[#allocation14 + $0x30] sm:$0xff] %vm682_vm2, %v2587_v56 }
0x2169   :  { %2590 = vst.msk [vmem:[#allocation14 + $0x30] sm:$0xff] %vm684_vm3, %v2585_v50 }
0x216a   :  { %2591 = vst.msk [vmem:[#allocation14 + $0x30] sm:$0xff] %vm686_vm4, %v4528_v59  ;;  %v2913_v59 = vsel %vm116_vm0, %v4416_v61, 0.0 }
0x216b   :  { %2595 = vst.msk [vmem:[#allocation14 + $0x30] sm:$0xff] %vm691_vm5, %v2594_v30 }
0x216c   :  { %2599 = vst.msk [vmem:[#allocation14 + $0x30] sm:$0xff] %vm696_vm6, %v2598_v54 }
0x216d   :  { %v2840_v24 = vpop.permute.xlu2 %2839 }
0x216e   :  { %v2842_v33 = vadd.f32 %v2840_v24, %v2832_v40 }
0x2170   :  { %3224 = vtanh.f32 %v2842_v33 }
0x2176   :  { %v3225_v19 = vpop.eup %3224 }
0x21a6   :  { %v2875_v47 = vpop.xlane.xlu2 %2874 }
0x21a7   :  { %v2876_v54 = vmul.f32 0.5, %v2875_v47 }
0x21ae   :  { %v2889_v18 = vpop.permute.xlu2 %2888 }
0x21af   :  { %v2891_v13 = vsel %vm116_vm0, %v2889_v18, 0.0 }
0x21b0   :  { %2892 = vadd.xlane.f32.xlu1 %v2891_v13 }
0x21b8   :  { %2910 = vadd.xlane.f32.xlu1 %v2909_v4 }
0x21d1   :  { %2845 = vrot.lane.b32.xlu1 %v3225_v19, %s3362_s25 }
0x21da   :  { %v2869_v62 = vpop.xlane.xlu1 %2868 }
0x21db   :  { %v2870_v36 = vsub.f32 0.0, %v2869_v62 }
0x21dd   :  { %v3057_v7 = vadd.f32 -29.406033, %v2870_v36 }
0x21df   :  { %v2877_v46 = vsub.f32 %v3057_v7, %v2876_v54 }
0x21fb   :  { %2914 = vadd.xlane.f32.xlu1 %v2913_v59 }
0x2214   :  { %2923 = vrot.lane.b32.xlu1 %v2842_v33, %s3371_s26 }
0x2223   :  { %v2893_v2 = vpop.xlane.xlu1 %2892 }
0x2224   :  { %v2894_v28 = vsub.f32 0.0, %v2893_v2 }
0x2226   :  { %v3058_v0 = vadd.f32 -29.406033, %v2894_v28 }
0x2228   :  { %v2901_v23 = vsub.f32 %v3058_v0, %v2900_v22 }
0x222a   :  { %v2902_v35 = vsub.f32 %v2877_v46, %v2901_v23 }
0x222b   :  { %v2911_v61 = vpop.xlane.xlu1 %2910 }
0x222c   :  { %v2903_v49 = vmul.f32 %v2902_v35, %v4331_v3 }
0x222e   :  { %v2904_v10 = vsub.f32 %v2903_v49, %v4560_v5 }
0x2230   :  { %2906 = vst.msk [vmem:[#allocation14 + $0x38] sm:$0xff] %vm682_vm2, %v2904_v10 }
0x2231   :  { %2907 = vst.msk [vmem:[#allocation14 + $0x38] sm:$0xff] %vm684_vm3, %v2902_v35 }
0x2232   :  { %2908 = vst.msk [vmem:[#allocation14 + $0x38] sm:$0xff] %vm686_vm4, %v4560_v5 }
0x2233   :  { %2912 = vst.msk [vmem:[#allocation14 + $0x38] sm:$0xff] %vm691_vm5, %v2911_v61 }
0x2243   :  { %v2846_v48 = vpop.permute.xlu1 %2845 }
0x2244   :  { %v2848_v20 = vmul.f32 %v2846_v48, %v2829_v15 }
0x2246   :  { %2918 = vrot.lane.b32.xlu2 %v2848_v20, %s3360_s22 }
0x226e   :  { %v2915_v3 = vpop.xlane.xlu1 %2914 }
0x226f   :  { %2916 = vst.msk [vmem:[#allocation14 + $0x38] sm:$0xff] %vm696_vm6, %v2915_v3 }
0x2270   :  { %2939 = dma.vmem_to_hbm [thread:$0]  %s2932_s12, 1024, %s2934_s15, [#allocation8], %s3368_s20, %s3368_s20, %s3369_s23  }
0x2286   :  { %v2924_v5 = vpop.permute.xlu1 %2923 }
0x2287   :  { %2926 = vst.msk [vmem:[#allocation4] sm:$0xff] %vm116_vm0, %v2924_v5 }
0x22a0   :  { %v2919_v60 = vpop.permute.xlu2 %2918 }
0x22a1   :  { %2921 = vst.msk [vmem:[#allocation3] sm:$0xff] %vm116_vm0, %v2919_v60 }
0x22a2   :  { %3356 = dma.done.wait [#allocation8], 1024  }
0x22a3   :  { %3357 = vsyncadd [#allocation8], 4294966272 }
0x22a4   :  { %2944 = vsyncpa [#allocation7], 1 }
0x22a5   :  { %2945 = vsyncpa [#allocation10], 1 }
0x22a6   :  { %2946 = vsyncpa [#allocation13], 1 }
0x22a7   :  { %2947 = vsyncpa [#allocation8], 1 }

</bundles_post_ra>
